<compile_context>
chip_gen: v7x
topology: tpu7x:2x2x1
jax: 0.10.0
libtpu: 0.0.40
codegen_flags: <defaults>
</compile_context>

<pallas_src>
import functools

import jax
import jax.numpy as jnp
from jax.experimental import pallas as pl
from jax.experimental.pallas import tpu as pltpu


_LANE_STRIDE = 128      # per-sample chunk width on the lane axis
_SEQ_LEN = 120          # conv part sees L = 120 so Flatten yields 64*30 = 1920


def _round_up(a, b):
    return (a + b - 1) // b * b


def _fused_forward_kernel(x_ref, w1_ref, s1_ref, b1_ref,
                          w2_ref, s2_ref, b2_ref,
                          w3_ref, s3_ref, b3_ref,
                          wd_ref, bh_ref, out_ref, *, block_n):
    S = _LANE_STRIDE
    L = _SEQ_LEN
    M = block_n * S
    f32 = jnp.float32

    def shift_left(v, k):          # v[:, m] <- v[:, m+k], zero fill at the end
        zero = jnp.zeros((v.shape[0], k), v.dtype)
        return jnp.concatenate([v[:, k:], zero], axis=1)

    def shift_right(v, k):         # v[:, m] <- v[:, m-k], zero fill at the start
        zero = jnp.zeros((v.shape[0], k), v.dtype)
        return jnp.concatenate([zero, v[:, :v.shape[1] - k]], axis=1)

    # Per-sample lane coordinate: lanes >= L of each 128-lane chunk are the
    # conv zero padding / halo separator between neighbouring samples.
    lane = jax.lax.broadcasted_iota(jnp.int32, (1, M), 1)
    pad_mask = (lane & (S - 1)) < L                           # (1, M) bool

    def conv_bn_relu(prev, w_ref, s_ref, b_ref, dil, mask):
        # k=3 / pad=1 conv at dilation `dil` (the dilation tracks the pooling
        # stride, so pooled activations are never compacted -> no lane gathers).
        slab = jnp.concatenate(
            [shift_right(prev, dil), prev, shift_left(prev, dil)], axis=0)
        w = w_ref[...]                                        # (Cout, 3*Cin) bf16
        y = jnp.dot(w, slab.astype(w.dtype), preferred_element_type=f32)
        y = jnp.maximum(y * s_ref[...] + b_ref[...], 0.0)     # folded BN + ReLU
        if mask:
            y = jnp.where(pad_mask, y, 0.0)                   # keep halo lanes zero
        return y

    x = x_ref[0].astype(f32)                                  # (1, M)

    # inc:   Conv1d(1->16) + BN + ReLU
    h = conv_bn_relu(x, w1_ref, s1_ref, b1_ref, dil=1, mask=True)     # (16, M)
    # down1: MaxPool1d(2) -> Conv1d(16->32) + BN + ReLU  (dilation 2)
    h = jnp.maximum(h, shift_left(h, 1))
    h = conv_bn_relu(h, w2_ref, s2_ref, b2_ref, dil=2, mask=True)     # (32, M)
    # down2: MaxPool1d(2) -> Conv1d(32->64) + BN + ReLU  (dilation 4)
    h = jnp.maximum(h, shift_left(h, 2))
    h = conv_bn_relu(h, w3_ref, s3_ref, b3_ref, dil=4, mask=False)    # (64, M)

    # Flatten + pre-composed Linear(1920->512->128->32->1) + Sigmoid.
    # wd holds the composed weight at the dilated (stride-4) lane positions of
    # every 128-lane sample chunk; its zeros discard all garbage lanes.
    col = jnp.sum(h * wd_ref[...], axis=0, keepdims=True)             # (1, M)
    # Per-chunk lane sum via a log2(128) shift-add cascade; the total for
    # sample chunk n lands on lane n*128 (extracted by the wrapper).
    for sh in (64, 32, 16, 8, 4, 2, 1):
        col = col + shift_left(col, sh)
    logit = col + bh_ref[...]
    out_ref[0] = (1.0 / (1.0 + jnp.exp(-logit))).astype(out_ref.dtype)


def depth_encode_net(x, params, *, block_n=None, compute_dtype=jnp.bfloat16,
                     eps=1e-5):
    """Forward pass of Depth_Encode_Net. x: (N, 1, 120) NCL -> (N, 1)."""
    N, cin, L = x.shape
    if cin != 1 or L != _SEQ_LEN:
        raise ValueError("expected input of shape (N, 1, 120)")
    S = _LANE_STRIDE
    f32 = jnp.float32
    if block_n is None:
        block_n = max(8, min(64, _round_up(N, 8)))
    n_pad = _round_up(N, block_n)
    G = n_pad // block_n
    M = block_n * S

    # ---- fold Conv bias + BatchNorm (running stats) into scale / bias ------
    # TODO(synk): training-mode BN (batch statistics over N and L) is not fused.
    def fold_conv(w, b, gamma, beta, mean, var):
        cout, ci, _ = w.shape
        inv_std = jax.lax.rsqrt(var.astype(f32) + eps)
        scale = (gamma.astype(f32) * inv_std).reshape(cout, 1)
        bias = (beta.astype(f32)
                + (b.astype(f32) - mean.astype(f32)) * scale[:, 0]).reshape(cout, 1)
        # (Cout, Cin, 3) -> (Cout, 3*Cin): row order matches the in-kernel slab.
        w_flat = jnp.transpose(w, (0, 2, 1)).reshape(cout, 3 * ci)
        return w_flat.astype(compute_dtype), scale, bias

    w1, s1, b1 = fold_conv(*params['inc'])
    w2, s2, b2 = fold_conv(*params['down1'])
    w3, s3, b3 = fold_conv(*params['down2'])

    # ---- pre-compose the 4 Linear layers in f32 (no nonlinearity between) --
    (lw1, lb1), (lw2, lb2), (lw3, lb3), (lw4, lb4) = params['linears']
    wc = lw1.astype(f32).T @ lw2.astype(f32).T
    wc = wc @ lw3.astype(f32).T
    wc = wc @ lw4.astype(f32).T                                  # (1920, 1)
    bc = lb1.astype(f32) @ lw2.astype(f32).T + lb2.astype(f32)
    bc = bc @ lw3.astype(f32).T + lb3.astype(f32)
    bc = bc @ lw4.astype(f32).T + lb4.astype(f32)                # (1,)

    c_last, l_last = 64, L // 4                                  # 64 x 30 = 1920
    # Dilated per-sample head weight: feature (c, i) lives at lane 4*i of
    # channel c of each 128-lane chunk; tiled over the block_n sample chunks.
    wd = jnp.zeros((c_last, S), f32).at[:, 0:4 * l_last:4].set(
        wc.reshape(c_last, l_last))
    wd = jnp.tile(wd, (1, block_n))                              # (64, M)
    bh = bc.reshape(1, 1)

    # ---- input: (N,1,L) -> zero-padded, lane-merged (G, 1, block_n*128) ----
    xp = jnp.pad(x[:, 0, :].astype(f32), ((0, n_pad - N), (0, S - L)))
    xm = xp.reshape(G, 1, M)

    kernel = functools.partial(_fused_forward_kernel, block_n=block_n)

    conv_macs = 16 * 3 + 32 * 48 + 64 * 96
    flops = G * (2 * conv_macs * M + 5 * 64 * M)
    bytes_accessed = (xm.size * 4 + G * M * 4 + wd.size * 4
                      + sum(int(a.size) * 2 for a in (w1, w2, w3)) + 4096)

    out = pl.pallas_call(
        kernel,
        out_shape=jax.ShapeDtypeStruct((G, 1, M), f32),
        grid_spec=pltpu.PrefetchScalarGridSpec(
            num_scalar_prefetch=0,
            grid=(G,),
            in_specs=[
                pl.BlockSpec((1, 1, M), lambda i: (i, 0, 0)),    # x (per-step)
                pl.BlockSpec(w1.shape, lambda i: (0, 0)),        # VMEM-resident
                pl.BlockSpec(s1.shape, lambda i: (0, 0)),
                pl.BlockSpec(b1.shape, lambda i: (0, 0)),
                pl.BlockSpec(w2.shape, lambda i: (0, 0)),
                pl.BlockSpec(s2.shape, lambda i: (0, 0)),
                pl.BlockSpec(b2.shape, lambda i: (0, 0)),
                pl.BlockSpec(w3.shape, lambda i: (0, 0)),
                pl.BlockSpec(s3.shape, lambda i: (0, 0)),
                pl.BlockSpec(b3.shape, lambda i: (0, 0)),
                pl.BlockSpec(wd.shape, lambda i: (0, 0)),        # composed head
                pl.BlockSpec(bh.shape, lambda i: (0, 0)),
            ],
            out_specs=pl.BlockSpec((1, 1, M), lambda i: (i, 0, 0)),
        ),
        compiler_params=pltpu.CompilerParams(
            dimension_semantics=("parallel",),
            vmem_limit_bytes=32 * 1024 * 1024),
        cost_estimate=pl.CostEstimate(
            flops=int(flops), transcendentals=int(G * M),
            bytes_accessed=int(bytes_accessed)),
    )(xm, w1, s1, b1, w2, s2, b2, w3, s3, b3, wd, bh)

    # Each sample's sigmoid(logit) sits on lane n*128 of its chunk.
    return out[:, 0, ::S].reshape(-1)[:N].reshape(N, 1)


if __name__ == "__main__":
    key = jax.random.PRNGKey(0)
    N, L = 2, 120   # L = 120 so the flatten yields 1920 features as in the module.

    def conv_params(k, cin, cout):
        ks = jax.random.split(k, 6)
        w = jax.random.normal(ks[0], (cout, cin, 3), jnp.float32) * 0.1
        b = jax.random.normal(ks[1], (cout,), jnp.float32) * 0.1
        gamma = 1.0 + 0.1 * jax.random.normal(ks[2], (cout,), jnp.float32)
        beta = 0.1 * jax.random.normal(ks[3], (cout,), jnp.float32)
        mean = 0.1 * jax.random.normal(ks[4], (cout,), jnp.float32)
        var = jnp.abs(1.0 + 0.1 * jax.random.normal(ks[5], (cout,), jnp.float32))
        return (w, b, gamma, beta, mean, var)

    def linear_params(k, din, dout):
        k1, k2 = jax.random.split(k)
        w = jax.random.normal(k1, (dout, din), jnp.float32) / jnp.sqrt(float(din))
        b = 0.1 * jax.random.normal(k2, (dout,), jnp.float32)
        return (w, b)

    keys = jax.random.split(key, 8)
    x = jax.random.normal(keys[0], (N, 1, L), jnp.float32)
    params = {
        'inc': conv_params(keys[1], 1, 16),
        'down1': conv_params(keys[2], 16, 32),
        'down2': conv_params(keys[3], 32, 64),
        'linears': [
            linear_params(keys[4], 1920, 512),
            linear_params(keys[5], 512, 128),
            linear_params(keys[6], 128, 32),
            linear_params(keys[7], 32, 1),
        ],
    }

    out = jax.jit(depth_encode_net)(x, params)
    jax.block_until_ready(out)
    assert out.shape == (N, 1)
    print("KERNEL_OK")
</pallas_src>

<mosaic_0001>
module attributes {stable_mosaic.version = 11 : i64} {
  func.func @_fused_forward_kernel(%arg0: i32, %arg1: memref<1x1x1024xf32, #tpu.memory_space<vmem>>, %arg2: memref<16x3xbf16, #tpu.memory_space<vmem>>, %arg3: memref<16x1xf32, #tpu.memory_space<vmem>>, %arg4: memref<16x1xf32, #tpu.memory_space<vmem>>, %arg5: memref<32x48xbf16, #tpu.memory_space<vmem>>, %arg6: memref<32x1xf32, #tpu.memory_space<vmem>>, %arg7: memref<32x1xf32, #tpu.memory_space<vmem>>, %arg8: memref<64x96xbf16, #tpu.memory_space<vmem>>, %arg9: memref<64x1xf32, #tpu.memory_space<vmem>>, %arg10: memref<64x1xf32, #tpu.memory_space<vmem>>, %arg11: memref<64x1024xf32, #tpu.memory_space<vmem>>, %arg12: memref<1x1xf32, #tpu.memory_space<vmem>>, %arg13: memref<1x1x1024xf32, #tpu.memory_space<vmem>>) attributes {dimension_semantics = [#tpu.dimension_semantics<parallel>], iteration_bounds = array<i64: 1>, scalar_prefetch = 0 : i64, scratch_operands = 0 : i64, tpu.core_type = #tpu.core_type<tc>, window_params = [{transform_indices = @transform_0, window_bounds = array<i64: 1, 1, 1024>}, {pipeline_mode = #tpu.pipeline_mode<synchronous>, transform_indices = @transform_1, window_bounds = array<i64: 16, 3>}, {pipeline_mode = #tpu.pipeline_mode<synchronous>, transform_indices = @transform_2, window_bounds = array<i64: 16, 1>}, {pipeline_mode = #tpu.pipeline_mode<synchronous>, transform_indices = @transform_3, window_bounds = array<i64: 16, 1>}, {pipeline_mode = #tpu.pipeline_mode<synchronous>, transform_indices = @transform_4, window_bounds = array<i64: 32, 48>}, {pipeline_mode = #tpu.pipeline_mode<synchronous>, transform_indices = @transform_5, window_bounds = array<i64: 32, 1>}, {pipeline_mode = #tpu.pipeline_mode<synchronous>, transform_indices = @transform_6, window_bounds = array<i64: 32, 1>}, {pipeline_mode = #tpu.pipeline_mode<synchronous>, transform_indices = @transform_7, window_bounds = array<i64: 64, 96>}, {pipeline_mode = #tpu.pipeline_mode<synchronous>, transform_indices = @transform_8, window_bounds = array<i64: 64, 1>}, {pipeline_mode = #tpu.pipeline_mode<synchronous>, transform_indices = @transform_9, window_bounds = array<i64: 64, 1>}, {pipeline_mode = #tpu.pipeline_mode<synchronous>, transform_indices = @transform_10, window_bounds = array<i64: 64, 1024>}, {pipeline_mode = #tpu.pipeline_mode<synchronous>, transform_indices = @transform_11, window_bounds = array<i64: 1, 1>}, {transform_indices = @transform_12, window_bounds = array<i64: 1, 1, 1024>}]} {
    %0 = tpu.iota {dimensions = array<i32: 1>} : vector<1x1024xi32>
    %c127_i32 = arith.constant 127 : i32
    %1 = vector.broadcast %c127_i32 : i32 to vector<1x1024xi32>
    %2 = arith.andi %0, %1 : vector<1x1024xi32>
    %c120_i32 = arith.constant 120 : i32
    %3 = vector.broadcast %c120_i32 : i32 to vector<1x1024xi32>
    %4 = arith.cmpi slt, %2, %3 : vector<1x1024xi32>
    %c0 = arith.constant 0 : index
    %c0_0 = arith.constant 0 : index
    %c0_1 = arith.constant 0 : index
    %5 = vector.load %arg1[%c0, %c0_0, %c0_1] : memref<1x1x1024xf32, #tpu.memory_space<vmem>>, vector<1x1x1024xf32>
    %6 = vector.shape_cast %5 : vector<1x1x1024xf32> to vector<1x1024xf32>
    %cst = arith.constant 0.000000e+00 : f32
    %7 = vector.broadcast %cst : f32 to vector<1x1xf32>
    %8 = vector.extract_strided_slice %6 {offsets = [0, 0], sizes = [1, 1023], strides = [1, 1]} : vector<1x1024xf32> to vector<1x1023xf32>
    %9 = tpu.concatenate %7, %8 in 1 : vector<1x1xf32>, vector<1x1023xf32> -> vector<1x1024xf32>
    %cst_2 = arith.constant 0.000000e+00 : f32
    %10 = vector.broadcast %cst_2 : f32 to vector<1x1xf32>
    %11 = vector.extract_strided_slice %6 {offsets = [0, 1], sizes = [1, 1023], strides = [1, 1]} : vector<1x1024xf32> to vector<1x1023xf32>
    %12 = tpu.concatenate %11, %10 in 1 : vector<1x1023xf32>, vector<1x1xf32> -> vector<1x1024xf32>
    %13 = tpu.concatenate %9, %6, %12 in 0 : vector<1x1024xf32>, vector<1x1024xf32>, vector<1x1024xf32> -> vector<3x1024xf32>
    %c0_3 = arith.constant 0 : index
    %c0_4 = arith.constant 0 : index
    %14 = vector.load %arg2[%c0_3, %c0_4] : memref<16x3xbf16, #tpu.memory_space<vmem>>, vector<16x3xbf16>
    %15 = arith.truncf %13 : vector<3x1024xf32> to vector<3x1024xbf16>
    %cst_5 = arith.constant dense<0.000000e+00> : vector<16x1024xf32>
    %16 = tpu.matmul %14, %15, %cst_5 {dimension_numbers = #tpu.dot_dimension_numbers<[1], [0], [0], [1], [0, 0, 1, 1], [], []>} : vector<16x3xbf16>, vector<3x1024xbf16>, vector<16x1024xf32> -> vector<16x1024xf32>
    %c0_6 = arith.constant 0 : index
    %c0_7 = arith.constant 0 : index
    %17 = vector.load %arg3[%c0_6, %c0_7] : memref<16x1xf32, #tpu.memory_space<vmem>>, vector<16x1xf32>
    %18 = vector.broadcast %17 : vector<16x1xf32> to vector<16x1024xf32>
    %19 = arith.mulf %16, %18 : vector<16x1024xf32>
    %c0_8 = arith.constant 0 : index
    %c0_9 = arith.constant 0 : index
    %20 = vector.load %arg4[%c0_8, %c0_9] : memref<16x1xf32, #tpu.memory_space<vmem>>, vector<16x1xf32>
    %21 = vector.broadcast %20 : vector<16x1xf32> to vector<16x1024xf32>
    %22 = arith.addf %19, %21 : vector<16x1024xf32>
    %cst_10 = arith.constant 0.000000e+00 : f32
    %23 = vector.broadcast %cst_10 : f32 to vector<16x1024xf32>
    %24 = arith.maximumf %22, %23 : vector<16x1024xf32>
    %cst_11 = arith.constant 0.000000e+00 : f32
    %25 = vector.shape_cast %4 : vector<1x1024xi1> to vector<1x1024xi1>
    %26 = vector.broadcast %25 : vector<1x1024xi1> to vector<16x1024xi1>
    %27 = vector.broadcast %cst_11 : f32 to vector<16x1024xf32>
    %28 = arith.select %26, %24, %27 : vector<16x1024xi1>, vector<16x1024xf32>
    %cst_12 = arith.constant 0.000000e+00 : f32
    %29 = vector.broadcast %cst_12 : f32 to vector<16x1xf32>
    %30 = vector.extract_strided_slice %28 {offsets = [0, 1], sizes = [16, 1023], strides = [1, 1]} : vector<16x1024xf32> to vector<16x1023xf32>
    %31 = tpu.concatenate %30, %29 in 1 : vector<16x1023xf32>, vector<16x1xf32> -> vector<16x1024xf32>
    %32 = arith.maximumf %28, %31 : vector<16x1024xf32>
    %cst_13 = arith.constant 0.000000e+00 : f32
    %33 = vector.broadcast %cst_13 : f32 to vector<16x2xf32>
    %34 = vector.extract_strided_slice %32 {offsets = [0, 0], sizes = [16, 1022], strides = [1, 1]} : vector<16x1024xf32> to vector<16x1022xf32>
    %35 = tpu.concatenate %33, %34 in 1 : vector<16x2xf32>, vector<16x1022xf32> -> vector<16x1024xf32>
    %cst_14 = arith.constant 0.000000e+00 : f32
    %36 = vector.broadcast %cst_14 : f32 to vector<16x2xf32>
    %37 = vector.extract_strided_slice %32 {offsets = [0, 2], sizes = [16, 1022], strides = [1, 1]} : vector<16x1024xf32> to vector<16x1022xf32>
    %38 = tpu.concatenate %37, %36 in 1 : vector<16x1022xf32>, vector<16x2xf32> -> vector<16x1024xf32>
    %39 = tpu.concatenate %35, %32, %38 in 0 : vector<16x1024xf32>, vector<16x1024xf32>, vector<16x1024xf32> -> vector<48x1024xf32>
    %c0_15 = arith.constant 0 : index
    %c0_16 = arith.constant 0 : index
    %40 = vector.load %arg5[%c0_15, %c0_16] : memref<32x48xbf16, #tpu.memory_space<vmem>>, vector<32x48xbf16>
    %41 = arith.truncf %39 : vector<48x1024xf32> to vector<48x1024xbf16>
    %cst_17 = arith.constant dense<0.000000e+00> : vector<32x1024xf32>
    %42 = tpu.matmul %40, %41, %cst_17 {dimension_numbers = #tpu.dot_dimension_numbers<[1], [0], [0], [1], [0, 0, 1, 1], [], []>} : vector<32x48xbf16>, vector<48x1024xbf16>, vector<32x1024xf32> -> vector<32x1024xf32>
    %c0_18 = arith.constant 0 : index
    %c0_19 = arith.constant 0 : index
    %43 = vector.load %arg6[%c0_18, %c0_19] : memref<32x1xf32, #tpu.memory_space<vmem>>, vector<32x1xf32>
    %44 = vector.broadcast %43 : vector<32x1xf32> to vector<32x1024xf32>
    %45 = arith.mulf %42, %44 : vector<32x1024xf32>
    %c0_20 = arith.constant 0 : index
    %c0_21 = arith.constant 0 : index
    %46 = vector.load %arg7[%c0_20, %c0_21] : memref<32x1xf32, #tpu.memory_space<vmem>>, vector<32x1xf32>
    %47 = vector.broadcast %46 : vector<32x1xf32> to vector<32x1024xf32>
    %48 = arith.addf %45, %47 : vector<32x1024xf32>
    %cst_22 = arith.constant 0.000000e+00 : f32
    %49 = vector.broadcast %cst_22 : f32 to vector<32x1024xf32>
    %50 = arith.maximumf %48, %49 : vector<32x1024xf32>
    %cst_23 = arith.constant 0.000000e+00 : f32
    %51 = vector.shape_cast %4 : vector<1x1024xi1> to vector<1x1024xi1>
    %52 = vector.broadcast %51 : vector<1x1024xi1> to vector<32x1024xi1>
    %53 = vector.broadcast %cst_23 : f32 to vector<32x1024xf32>
    %54 = arith.select %52, %50, %53 : vector<32x1024xi1>, vector<32x1024xf32>
    %cst_24 = arith.constant 0.000000e+00 : f32
    %55 = vector.broadcast %cst_24 : f32 to vector<32x2xf32>
    %56 = vector.extract_strided_slice %54 {offsets = [0, 2], sizes = [32, 1022], strides = [1, 1]} : vector<32x1024xf32> to vector<32x1022xf32>
    %57 = tpu.concatenate %56, %55 in 1 : vector<32x1022xf32>, vector<32x2xf32> -> vector<32x1024xf32>
    %58 = arith.maximumf %54, %57 : vector<32x1024xf32>
    %cst_25 = arith.constant 0.000000e+00 : f32
    %59 = vector.broadcast %cst_25 : f32 to vector<32x4xf32>
    %60 = vector.extract_strided_slice %58 {offsets = [0, 0], sizes = [32, 1020], strides = [1, 1]} : vector<32x1024xf32> to vector<32x1020xf32>
    %61 = tpu.concatenate %59, %60 in 1 : vector<32x4xf32>, vector<32x1020xf32> -> vector<32x1024xf32>
    %cst_26 = arith.constant 0.000000e+00 : f32
    %62 = vector.broadcast %cst_26 : f32 to vector<32x4xf32>
    %63 = vector.extract_strided_slice %58 {offsets = [0, 4], sizes = [32, 1020], strides = [1, 1]} : vector<32x1024xf32> to vector<32x1020xf32>
    %64 = tpu.concatenate %63, %62 in 1 : vector<32x1020xf32>, vector<32x4xf32> -> vector<32x1024xf32>
    %65 = tpu.concatenate %61, %58, %64 in 0 : vector<32x1024xf32>, vector<32x1024xf32>, vector<32x1024xf32> -> vector<96x1024xf32>
    %c0_27 = arith.constant 0 : index
    %c0_28 = arith.constant 0 : index
    %66 = vector.load %arg8[%c0_27, %c0_28] : memref<64x96xbf16, #tpu.memory_space<vmem>>, vector<64x96xbf16>
    %67 = arith.truncf %65 : vector<96x1024xf32> to vector<96x1024xbf16>
    %cst_29 = arith.constant dense<0.000000e+00> : vector<64x1024xf32>
    %68 = tpu.matmul %66, %67, %cst_29 {dimension_numbers = #tpu.dot_dimension_numbers<[1], [0], [0], [1], [0, 0, 1, 1], [], []>} : vector<64x96xbf16>, vector<96x1024xbf16>, vector<64x1024xf32> -> vector<64x1024xf32>
    %c0_30 = arith.constant 0 : index
    %c0_31 = arith.constant 0 : index
    %69 = vector.load %arg9[%c0_30, %c0_31] : memref<64x1xf32, #tpu.memory_space<vmem>>, vector<64x1xf32>
    %70 = vector.broadcast %69 : vector<64x1xf32> to vector<64x1024xf32>
    %71 = arith.mulf %68, %70 : vector<64x1024xf32>
    %c0_32 = arith.constant 0 : index
    %c0_33 = arith.constant 0 : index
    %72 = vector.load %arg10[%c0_32, %c0_33] : memref<64x1xf32, #tpu.memory_space<vmem>>, vector<64x1xf32>
    %73 = vector.broadcast %72 : vector<64x1xf32> to vector<64x1024xf32>
    %74 = arith.addf %71, %73 : vector<64x1024xf32>
    %cst_34 = arith.constant 0.000000e+00 : f32
    %75 = vector.broadcast %cst_34 : f32 to vector<64x1024xf32>
    %76 = arith.maximumf %74, %75 : vector<64x1024xf32>
    %c0_35 = arith.constant 0 : index
    %c0_36 = arith.constant 0 : index
    %77 = vector.load %arg11[%c0_35, %c0_36] : memref<64x1024xf32, #tpu.memory_space<vmem>>, vector<64x1024xf32>
    %78 = arith.mulf %76, %77 : vector<64x1024xf32>
    %cst_37 = arith.constant dense<0.000000e+00> : vector<1024xf32>
    %79 = vector.multi_reduction <add>, %78, %cst_37 [0] : vector<64x1024xf32> to vector<1024xf32>
    %80 = vector.shape_cast %79 : vector<1024xf32> to vector<1x1024xf32>
    %cst_38 = arith.constant 0.000000e+00 : f32
    %81 = vector.broadcast %cst_38 : f32 to vector<1x64xf32>
    %82 = vector.extract_strided_slice %80 {offsets = [0, 64], sizes = [1, 960], strides = [1, 1]} : vector<1x1024xf32> to vector<1x960xf32>
    %83 = tpu.concatenate %82, %81 in 1 : vector<1x960xf32>, vector<1x64xf32> -> vector<1x1024xf32>
    %84 = arith.addf %80, %83 : vector<1x1024xf32>
    %cst_39 = arith.constant 0.000000e+00 : f32
    %85 = vector.broadcast %cst_39 : f32 to vector<1x32xf32>
    %86 = vector.extract_strided_slice %84 {offsets = [0, 32], sizes = [1, 992], strides = [1, 1]} : vector<1x1024xf32> to vector<1x992xf32>
    %87 = tpu.concatenate %86, %85 in 1 : vector<1x992xf32>, vector<1x32xf32> -> vector<1x1024xf32>
    %88 = arith.addf %84, %87 : vector<1x1024xf32>
    %cst_40 = arith.constant 0.000000e+00 : f32
    %89 = vector.broadcast %cst_40 : f32 to vector<1x16xf32>
    %90 = vector.extract_strided_slice %88 {offsets = [0, 16], sizes = [1, 1008], strides = [1, 1]} : vector<1x1024xf32> to vector<1x1008xf32>
    %91 = tpu.concatenate %90, %89 in 1 : vector<1x1008xf32>, vector<1x16xf32> -> vector<1x1024xf32>
    %92 = arith.addf %88, %91 : vector<1x1024xf32>
    %cst_41 = arith.constant 0.000000e+00 : f32
    %93 = vector.broadcast %cst_41 : f32 to vector<1x8xf32>
    %94 = vector.extract_strided_slice %92 {offsets = [0, 8], sizes = [1, 1016], strides = [1, 1]} : vector<1x1024xf32> to vector<1x1016xf32>
    %95 = tpu.concatenate %94, %93 in 1 : vector<1x1016xf32>, vector<1x8xf32> -> vector<1x1024xf32>
    %96 = arith.addf %92, %95 : vector<1x1024xf32>
    %cst_42 = arith.constant 0.000000e+00 : f32
    %97 = vector.broadcast %cst_42 : f32 to vector<1x4xf32>
    %98 = vector.extract_strided_slice %96 {offsets = [0, 4], sizes = [1, 1020], strides = [1, 1]} : vector<1x1024xf32> to vector<1x1020xf32>
    %99 = tpu.concatenate %98, %97 in 1 : vector<1x1020xf32>, vector<1x4xf32> -> vector<1x1024xf32>
    %100 = arith.addf %96, %99 : vector<1x1024xf32>
    %cst_43 = arith.constant 0.000000e+00 : f32
    %101 = vector.broadcast %cst_43 : f32 to vector<1x2xf32>
    %102 = vector.extract_strided_slice %100 {offsets = [0, 2], sizes = [1, 1022], strides = [1, 1]} : vector<1x1024xf32> to vector<1x1022xf32>
    %103 = tpu.concatenate %102, %101 in 1 : vector<1x1022xf32>, vector<1x2xf32> -> vector<1x1024xf32>
    %104 = arith.addf %100, %103 : vector<1x1024xf32>
    %cst_44 = arith.constant 0.000000e+00 : f32
    %105 = vector.broadcast %cst_44 : f32 to vector<1x1xf32>
    %106 = vector.extract_strided_slice %104 {offsets = [0, 1], sizes = [1, 1023], strides = [1, 1]} : vector<1x1024xf32> to vector<1x1023xf32>
    %107 = tpu.concatenate %106, %105 in 1 : vector<1x1023xf32>, vector<1x1xf32> -> vector<1x1024xf32>
    %108 = arith.addf %104, %107 : vector<1x1024xf32>
    %c0_45 = arith.constant 0 : index
    %c0_46 = arith.constant 0 : index
    %109 = vector.load %arg12[%c0_45, %c0_46] : memref<1x1xf32, #tpu.memory_space<vmem>>, vector<1x1xf32>
    %110 = vector.broadcast %109 : vector<1x1xf32> to vector<1x1024xf32>
    %111 = arith.addf %108, %110 : vector<1x1024xf32>
    %cst_47 = arith.constant 0.000000e+00 : f32
    %112 = vector.broadcast %cst_47 : f32 to vector<1x1024xf32>
    %113 = arith.subf %112, %111 : vector<1x1024xf32>
    %114 = math.exp %113 : vector<1x1024xf32>
    %cst_48 = arith.constant 1.000000e+00 : f32
    %115 = vector.broadcast %cst_48 : f32 to vector<1x1024xf32>
    %116 = arith.addf %115, %114 : vector<1x1024xf32>
    %cst_49 = arith.constant 1.000000e+00 : f32
    %117 = vector.broadcast %cst_49 : f32 to vector<1x1024xf32>
    %118 = arith.divf %117, %116 : vector<1x1024xf32>
    %c0_50 = arith.constant 0 : index
    %c0_51 = arith.constant 0 : index
    %c0_52 = arith.constant 0 : index
    %119 = vector.load %arg13[%c0_50, %c0_51, %c0_52] : memref<1x1x1024xf32, #tpu.memory_space<vmem>>, vector<1x1x1024xf32>
    %120 = vector.shape_cast %119 : vector<1x1x1024xf32> to vector<1x1024xf32>
    %121 = vector.shape_cast %118 : vector<1x1024xf32> to vector<1x1x1024xf32>
    tpu.vector_store %arg13[%c0_50, %c0_51, %c0_52], %121 {strides = array<i32>} : memref<1x1x1024xf32, #tpu.memory_space<vmem>>, vector<1x1x1024xf32>,
    return
  }
  func.func @transform_0(%arg0: i32) -> (i32, i32, i32) {
    %c0_i32 = arith.constant 0 : i32
    %c0_i32_0 = arith.constant 0 : i32
    %c0_i32_1 = arith.constant 0 : i32
    return %arg0, %c0_i32, %c0_i32_0 : i32, i32, i32
  }
  func.func @transform_1(%arg0: i32) -> (i32, i32) {
    %c0_i32 = arith.constant 0 : i32
    %c0_i32_0 = arith.constant 0 : i32
    %c0_i32_1 = arith.constant 0 : i32
    return %c0_i32, %c0_i32_0 : i32, i32
  }
  func.func @transform_2(%arg0: i32) -> (i32, i32) {
    %c0_i32 = arith.constant 0 : i32
    %c0_i32_0 = arith.constant 0 : i32
    %c0_i32_1 = arith.constant 0 : i32
    return %c0_i32, %c0_i32_0 : i32, i32
  }
  func.func @transform_3(%arg0: i32) -> (i32, i32) {
    %c0_i32 = arith.constant 0 : i32
    %c0_i32_0 = arith.constant 0 : i32
    %c0_i32_1 = arith.constant 0 : i32
    return %c0_i32, %c0_i32_0 : i32, i32
  }
  func.func @transform_4(%arg0: i32) -> (i32, i32) {
    %c0_i32 = arith.constant 0 : i32
    %c0_i32_0 = arith.constant 0 : i32
    %c0_i32_1 = arith.constant 0 : i32
    return %c0_i32, %c0_i32_0 : i32, i32
  }
  func.func @transform_5(%arg0: i32) -> (i32, i32) {
    %c0_i32 = arith.constant 0 : i32
    %c0_i32_0 = arith.constant 0 : i32
    %c0_i32_1 = arith.constant 0 : i32
    return %c0_i32, %c0_i32_0 : i32, i32
  }
  func.func @transform_6(%arg0: i32) -> (i32, i32) {
    %c0_i32 = arith.constant 0 : i32
    %c0_i32_0 = arith.constant 0 : i32
    %c0_i32_1 = arith.constant 0 : i32
    return %c0_i32, %c0_i32_0 : i32, i32
  }
  func.func @transform_7(%arg0: i32) -> (i32, i32) {
    %c0_i32 = arith.constant 0 : i32
    %c0_i32_0 = arith.constant 0 : i32
    %c0_i32_1 = arith.constant 0 : i32
    return %c0_i32, %c0_i32_0 : i32, i32
  }
  func.func @transform_8(%arg0: i32) -> (i32, i32) {
    %c0_i32 = arith.constant 0 : i32
    %c0_i32_0 = arith.constant 0 : i32
    %c0_i32_1 = arith.constant 0 : i32
    return %c0_i32, %c0_i32_0 : i32, i32
  }
  func.func @transform_9(%arg0: i32) -> (i32, i32) {
    %c0_i32 = arith.constant 0 : i32
    %c0_i32_0 = arith.constant 0 : i32
    %c0_i32_1 = arith.constant 0 : i32
    return %c0_i32, %c0_i32_0 : i32, i32
  }
  func.func @transform_10(%arg0: i32) -> (i32, i32) {
    %c0_i32 = arith.constant 0 : i32
    %c0_i32_0 = arith.constant 0 : i32
    %c0_i32_1 = arith.constant 0 : i32
    return %c0_i32, %c0_i32_0 : i32, i32
  }
  func.func @transform_11(%arg0: i32) -> (i32, i32) {
    %c0_i32 = arith.constant 0 : i32
    %c0_i32_0 = arith.constant 0 : i32
    %c0_i32_1 = arith.constant 0 : i32
    return %c0_i32, %c0_i32_0 : i32, i32
  }
  func.func @transform_12(%arg0: i32) -> (i32, i32, i32) {
    %c0_i32 = arith.constant 0 : i32
    %c0_i32_0 = arith.constant 0 : i32
    %c0_i32_1 = arith.constant 0 : i32
    return %arg0, %c0_i32, %c0_i32_0 : i32, i32, i32
  }
}

</mosaic_0001>

<bundles_post_ra>
// kernel: depth_encode_net.1
= control target key start
LH: loop header
LB: loop body
LE: loop exit
PB: predicated region body
PF: predicated region fallthrough
CT: control target
= control target key end

     0   :  { %v44_v0 = vlaneseq  ;;  %s3561_s23 = smov 1   ;;  %v5657_v23 = vmov 0   ;;  %vm152_vm0 = vcmask 1039360   ;;  %vm187_vm1 = vcmask 1040384   ;;  %s3565_s14 = smov 126   ;;  %s5643_s0 = inlined_call_operand.vmem [shape: f32[1,1,1024], index: 0, kind: input, shape index: {}]   ;;  %s5644_s1 = inlined_call_operand.vmem [shape: bf16[16,3], index: 1, kind: input, shape index: {}]   ;;  %s5645_s2 = inlined_call_operand.vmem [shape: f32[16,1], index: 2, kind: input, shape index: {}]   ;;  %s5646_s3 = inlined_call_operand.vmem [shape: f32[16,1], index: 3, kind: input, shape index: {}]   ;;  %s5647_s4 = inlined_call_operand.vmem [shape: bf16[32,48], index: 4, kind: input, shape index: {}]   ;;  %s5648_s5 = inlined_call_operand.vmem [shape: f32[32,1], index: 5, kind: input, shape index: {}]   ;;  %s5649_s6 = inlined_call_operand.vmem [shape: f32[32,1], index: 6, kind: input, shape index: {}]   ;;  %s5650_s7 = inlined_call_operand.vmem [shape: bf16[64,96], index: 7, kind: input, shape index: {}]   ;;  %s5651_s8 = inlined_call_operand.vmem [shape: f32[64,1], index: 8, kind: input, shape index: {}]   ;;  %s5652_s9 = inlined_call_operand.vmem [shape: f32[64,1], index: 9, kind: input, shape index: {}]   ;;  %s5653_s10 = inlined_call_operand.vmem [shape: f32[64,1024], index: 10, kind: input, shape index: {}]   ;;  %s5654_s11 = inlined_call_operand.<no memory space> [shape: f32[1,1], index: 11, kind: input, shape index: {}]   ;;  %s5655_s12 = inlined_call_operand.vmem [shape: f32[1,1,1024], index: 12, kind: output, shape index: {}]  }
   0x1   :  { %v69_v2 = vld [vmem:[%s5643_s0] sm:$0xff]  ;;  %s3560_s0 = smov 127   ;;  %282 = vmatprep.mubr.bf16.mxu0 %v5657_v23  ;;  %325 = vmatprep.mubr.bf16.mxu1 %v5657_v23  ;;  %v423_v28 = vld [vmem:[%s5645_s2 + $0x8] sm:$0xff]  ;;  %v3563_v37 = vmov 65535   ;;  %vm119_vm2 = vcmask 7168   ;;  %vm196_vm3 = vcmask 1041408  }
   0x2   :  { %v3639_v1 = vshrl.u32 %v44_v0, 7  ;;  %3159 = vset.pattern.permute.xlu1 %v5657_v23  ;;  %3160 = vset.pattern.permute.xlu0 %v5657_v23  ;;  %v422_v27 = vld [vmem:[%s5645_s2] sm:$0xff]  ;;  %v451_v30 = vld [vmem:[%s5646_s3 + $0x8] sm:$0xff]  ;;  %v224_v38 = vsel %vm187_vm1, 4294967295, %v3563_v37  ;;  %vm220_vm4 = vcmask 23552   ;;  %vm670_vm13 = vcmask 15360  }
   0x3   :  { %v450_v29 = vld [vmem:[%s5646_s3] sm:$0xff]  ;;  %v3711_v45 = vsel %vm196_vm3, %v224_v38, 0  ;;  %vm4091_vm14 = vmneg %vm670_vm13  ;;  %s3567_s3 = smov 124   ;;  %s3571_s2 = smov 120  }
   0x4   :  { %v77_v3 = vsub.s32 1, %v3639_v1  ;;  %v81_v4 = vsub.s32 2, %v3639_v1  ;;  %v5656_v5 = vsub.s32 0, %v3639_v1  ;;  %v85_v6 = vsub.s32 3, %v3639_v1  ;;  %vm3061_vm15 = vmpackc.low %vm4091_vm14, %vm4091_vm14 }
   0x5   :  { %v89_v7 = vsub.s32 4, %v3639_v1  ;;  %v93_v8 = vsub.s32 5, %v3639_v1  ;;  %v97_v9 = vsub.s32 6, %v3639_v1  ;;  %v101_v22 = vsub.s32 7, %v3639_v1 }
   0x6   :  { %v3651_v10 = vrot.slane %v69_v2, %v77_v3  ;;  %v3653_v11 = vrot.slane %v69_v2, %v81_v4  ;;  %v3657_v12 = vrot.slane %v69_v2, %v5656_v5  ;;  %v3659_v13 = vrot.slane %v69_v2, %v85_v6 }
   0x7   :  { %v3665_v16 = vrot.slane %v69_v2, %v89_v7  ;;  %v3671_v18 = vrot.slane %v69_v2, %v93_v8  ;;  %v3673_v19 = vrot.slane %v69_v2, %v97_v9  ;;  %v3689_v25 = vrot.slane %v69_v2, %v101_v22 }
   0x8   :  { %v3124_v14 = vpack.i.bf16 %v3653_v11, %v3651_v10  ;;  %v3134_v15 = vpack.i.bf16 %v3659_v13, %v3657_v12  ;;  %v3129_v17 = vpack.i.bf16 %v3651_v10, %v3657_v12  ;;  %v3139_v21 = vpack.i.bf16 %v3659_v13, %v3653_v11 }
   0x9   :  { %v3144_v20 = vpack.i.bf16 %v3673_v19, %v3671_v18  ;;  %v3149_v24 = vpack.i.bf16 %v3671_v18, %v3665_v16  ;;  %v3154_v26 = vpack.i.bf16 %v3689_v25, %v3673_v19 }
   0xa   :  { %3125 = vrot.lane.b32.xlu0 %v3124_v14, %s3560_s0  ;;  %3135 = vrot.lane.b32.xlu1 %v3134_v15, %s3560_s0 }
   0xe   :  { %144 = vrot.lane.b32.xlu1 %v3665_v16, %s3560_s0  ;;  %3130 = vrot.lane.b32.xlu0 %v3129_v17, %s3561_s23 }
  0x12   :  { %3145 = vrot.lane.b32.xlu1 %v3144_v20, %s3560_s0  ;;  %3140 = vrot.lane.b32.xlu0 %v3139_v21, %s3561_s23 }
  0x16   :  { %3150 = vrot.lane.b32.xlu0 %v3149_v24, %s3561_s23  ;;  %150 = vrot.lane.b32.xlu1 %v3689_v25, %s3560_s0 }
  0x1a   :  { %3155 = vrot.lane.b32.xlu0 %v3154_v26, %s3561_s23  ;;  %426 = vperm.xlu1 %3159, %v422_v27  }
  0x1e   :  { %431 = vperm.xlu0 %3160, %v423_v28   ;;  %454 = vperm.xlu1 %3159, %v450_v29  }
  0x22   :  { %459 = vperm.xlu1 %3159, %v451_v30  }
  0x7c   :  { %v3126_v31 = vpop.permute.xlu0 %3125  ;;  %v3136_v32 = vpop.permute.xlu1 %3135 }
  0x7d   :  { %v3128_v33 = vunpack.i.h.bf16 %v3126_v31  ;;  %v3127_v34 = vunpack.i.l.bf16 %v3126_v31  ;;  %v3137_v35 = vunpack.i.l.bf16 %v3136_v32  ;;  %v3138_v36 = vunpack.i.h.bf16 %v3136_v32  ;;  %v3521_v31 = vld [vmem:[%s5644_s1] sm:$0xff]   ;;  %s3564_s1 = smov 2  }
  0x7f   :  { %v153_v41 = vsel %vm152_vm0, %v3137_v35, %v3127_v34  ;;  %v154_v44 = vsel %vm152_vm0, %v3127_v34, %v3128_v33  ;;  %v155_v46 = vsel %vm152_vm0, %v3128_v33, %v3138_v36 }
  0x80   :  { %v145_v39 = vpop.permute.xlu1 %144  ;;  %v3131_v40 = vpop.permute.xlu0 %3130  ;;  %v172_v52 = vrot.slane %v154_v44, 6  ;;  %v171_v54 = vrot.slane %v153_v41, 6  ;;  %v173_v63 = vrot.slane %v155_v46, 6 }
  0x81   :  { %v3133_v42 = vunpack.i.h.bf16 %v3131_v40  ;;  %v3132_v43 = vunpack.i.l.bf16 %v3131_v40  ;;  %v156_v47 = vsel %vm152_vm0, %v3138_v36, %v145_v39 }
  0x82   :  { %v174_v60 = vrot.slane %v156_v47, 6 }
  0x83   :  { %v135_v48 = vsel %vm119_vm2, 0.0, %v3132_v43  ;;  %v120_v49 = vsel %vm119_vm2, %v3132_v43, %v3133_v42 }
  0x84   :  { %v3146_v50 = vpop.permute.xlu1 %3145  ;;  %v3141_v51 = vpop.permute.xlu0 %3140  ;;  %v189_v53 = vsel %vm187_vm1, %v120_v49, %v3651_v10  ;;  %v188_v55 = vsel %vm187_vm1, %v135_v48, %v3657_v12 }
  0x85   :  { %v3148_v56 = vunpack.i.h.bf16 %v3146_v50  ;;  %v3147_v57 = vunpack.i.l.bf16 %v3146_v50  ;;  %v3143_v58 = vunpack.i.h.bf16 %v3141_v51  ;;  %v3142_v59 = vunpack.i.l.bf16 %v3141_v51 }
  0x86   :  { %v198_v61 = vsel %vm196_vm3, %v189_v53, %v172_v52  ;;  %v197_v62 = vsel %vm196_vm3, %v188_v55, %v171_v54 }
  0x87   :  { %v157_v2 = vsel %vm152_vm0, %v145_v39, %v3147_v57  ;;  %v158_v3 = vsel %vm152_vm0, %v3147_v57, %v3148_v56  ;;  %v121_v4 = vsel %vm119_vm2, %v3133_v42, %v3142_v59  ;;  %v208_v6 = vpack.c.bf16 %v198_v61, %v198_v61 }
  0x88   :  { %v175_v7 = vrot.slane %v157_v2, 6  ;;  %v176_v8 = vrot.slane %v158_v3, 6  ;;  %v3151_v9 = vpop.permute.xlu0 %3150  ;;  %v207_v10 = vpack.c.bf16 %v197_v62, %v197_v62  ;;  %v151_v12 = vpop.permute.xlu1 %150  ;;  %v122_v14 = vsel %vm119_vm2, %v3142_v59, %v3143_v58 }
  0x89   :  { %v3153_v15 = vunpack.i.h.bf16 %v3151_v9  ;;  %v3152_v17 = vunpack.i.l.bf16 %v3151_v9  ;;  %v230_v20 = vand.u32 %v3711_v45, %v208_v6  ;;  %v159_v21 = vsel %vm152_vm0, %v3148_v56, %v151_v12 }
  0x8a   :  { %v227_v22 = vand.u32 %v3711_v45, %v207_v10  ;;  %v161_v24 = vsel %vm152_vm0, %v151_v12, 0.0  ;;  %v177_v26 = vrot.slane %v159_v21, 6  ;;  %v191_v27 = vsel %vm187_vm1, %v122_v14, %v3659_v13 }
  0x8b   :  { %v123_v28 = vsel %vm119_vm2, %v3143_v58, %v3152_v17  ;;  %v124_v29 = vsel %vm119_vm2, %v3152_v17, %v3153_v15  ;;  %250 = vmatprep.subr.bf16.mxu0 %v230_v20  ;;  %v178_v30 = vrot.slane %v161_v24, 6  ;;  %v200_v32 = vsel %vm196_vm3, %v191_v27, %v174_v60 }
  0x8c   :  { %v192_v33 = vsel %vm187_vm1, %v123_v28, %v3665_v16  ;;  %251 = vmatpush1.bf16.msra.mxu0 %v227_v22  ;;  %v3156_v34 = vpop.permute.xlu0 %3155  ;;  %v210_v35 = vpack.c.bf16 %v200_v32, %v200_v32  ;;  %v190_v13 = vsel %vm187_vm1, %v121_v4, %v3653_v11  ;;  %v193_v36 = vsel %vm187_vm1, %v124_v29, %v3671_v18 }
  0x8d   :  { %v3158_v37 = vunpack.i.h.bf16 %v3156_v34  ;;  %v3157_v38 = vunpack.i.l.bf16 %v3156_v34  ;;  %v199_v39 = vsel %vm196_vm3, %v190_v13, %v173_v63  ;;  %v202_v40 = vsel %vm196_vm3, %v193_v36, %v176_v8 }
  0x8e   :  { %v236_v41 = vand.u32 %v3711_v45, %v210_v35  ;;  %v209_v42 = vpack.c.bf16 %v199_v39, %v199_v39  ;;  %v212_v43 = vpack.c.bf16 %v202_v40, %v202_v40  ;;  %v201_v16 = vsel %vm196_vm3, %v192_v33, %v175_v7 }
  0x8f   :  { %v125_v44 = vsel %vm119_vm2, %v3153_v15, %v3157_v38  ;;  %v126_v46 = vsel %vm119_vm2, %v3157_v38, %v3158_v37  ;;  %3053 = vmatmul.mubr.msk.bf16.vlgmr.msra.gmra.mrb[0].mxu0 %vm220_vm4, %v3521_v31  ;;  %v211_v11 = vpack.c.bf16 %v201_v16, %v201_v16  ;;  %v3773_v56 = vand.u32 127, %v44_v0 }
  0x90   :  { %v194_v18 = vsel %vm187_vm1, %v125_v44, %v3673_v19  ;;  %293 = vmatprep.subr.bf16.mxu1 %v236_v41  ;;  %v233_v47 = vand.u32 %v3711_v45, %v209_v42  ;;  %v242_v48 = vand.u32 %v3711_v45, %v212_v43  ;;  %368 = vmatprep.mubr.bf16.mxu0 %v5657_v23  ;;  %vm806_vm2 = vcmask 392192  }
  0x91   :  { %v203_v49 = vsel %vm196_vm3, %v194_v18, %v177_v26  ;;  %v239_v50 = vand.u32 %v3711_v45, %v211_v11  ;;  %v195_v51 = vsel %vm187_vm1, %v126_v46, %v3689_v25  ;;  %v46_v57 = vadd.s32 128, %v3773_v56 }
  0x92   :  { %v213_v52 = vpack.c.bf16 %v203_v49, %v203_v49  ;;  %294 = vmatpush1.bf16.msra.mxu1 %v233_v47  ;;  %336 = vmatprep.subr.bf16.mxu0 %v242_v48  ;;  %v204_v53 = vsel %vm196_vm3, %v195_v51, %v178_v30  ;;  %v48_v58 = vadd.s32 384, %v3773_v56  ;;  %v49_v60 = vadd.s32 512, %v3773_v56 }
  0x93   :  { %337 = vmatpush1.bf16.msra.mxu0 %v239_v50  ;;  %v214_v19 = vpack.c.bf16 %v204_v53, %v204_v53  ;;  %v54_v63 = vand.u32 127, %v46_v57  ;;  %v50_v9 = vadd.s32 640, %v3773_v56  ;;  %vm61_vm5 = vcmp.lt.s32.totalorder %v3773_v56, 120 }
  0x94   :  { %v245_v54 = vand.u32 %v3711_v45, %v213_v52  ;;  %v56_v0 = vand.u32 127, %v48_v58  ;;  %v57_v8 = vand.u32 127, %v49_v60  ;;  %v51_v15 = vadd.s32 768, %v3773_v56 }
  0x95   :  { %3054 = vmatmul.mubr.msk.bf16.vlgmr.msra.gmra.mrb[0].mxu1 %vm220_vm4, %v3521_v31  ;;  %v248_v55 = vand.u32 %v3711_v45, %v214_v19  ;;  %v47_v45 = vadd.s32 256, %v3773_v56  ;;  %vm3794_vm6 = vcmp.lt.s32.totalorder %v54_v63, 120  ;;  %v3799_v24 = vadd.s32 896, %v3773_v56 }
  0x96   :  { %411 = vmatprep.mubr.bf16.mxu1 %v5657_v23  ;;  %vm3806_vm8 = vcmp.lt.s32.totalorder %v56_v0, 120  ;;  %vm3811_vm9 = vcmp.lt.s32.totalorder %v57_v8, 120  ;;  %v58_v34 = vand.u32 127, %v50_v9  ;;  %v59_v38 = vand.u32 127, %v51_v15 }
  0x97   :  { %3055 = vmatmul.mubr.msk.bf16.vlgmr.msra.gmra.mrb[4].mxu0 %vm220_vm4, %v3521_v31  ;;  %379 = vmatprep.subr.bf16.mxu1 %v248_v55  ;;  %v55_v4 = vand.u32 127, %v47_v45  ;;  %v60_v16 = vand.u32 127, %v3799_v24  ;;  %vm735_vm1 = vcmask 1031168  }
  0x98   :  { %380 = vmatpush1.bf16.msra.mxu1 %v245_v54  ;;  %845 = vmatprep.mubr.bf16.mxu0 %v5657_v23  ;;  %vm3838_vm10 = vcmp.lt.s32.totalorder %v58_v34, 120  ;;  %vm3857_vm11 = vcmp.lt.s32.totalorder %v59_v38, 120  ;;  %vm3070_vm3 = vmpackc.low %vm735_vm1, %vm735_vm1 }
  0x99   :  { %v3770_v25 = vpop.permute.xlu1 %426  ;;  %vm3802_vm7 = vcmp.lt.s32.totalorder %v55_v4, 120  ;;  %vm3909_vm12 = vcmp.lt.s32.totalorder %v60_v16, 120 }
  0x9d   :  { %3056 = vmatmul.mubr.msk.bf16.vlgmr.msra.gmra.mrb[4].mxu1 %vm220_vm4, %v3521_v31  ;;  %v3778_v59 = vpop.permute.xlu1 %454  ;;  %v3781_v62 = vpop.permute.xlu0 %431  ;;  %vm1489_vm4 = vcmask 31744  }
  0x9e   :  { %898 = vmatprep.mubr.bf16.mxu1 %v5657_v23 }
  0xa1   :  { %v3790_v17 = vpop.permute.xlu1 %459 }
 0x162   :  { %v284_v61 = vpop.f32.mrb[0].mxu0 }
 0x163   :  { %v434_v2 = vmul.f32 %v3770_v25, %v284_v61  ;;  %v286_v3 = vpop.f32.mrb[1].mxu0 }
 0x164   :  { %v435_v6 = vmul.f32 %v3770_v25, %v286_v3  ;;  %v288_v7 = vpop.f32.mrb[2].mxu0 }
 0x165   :  { %v462_v10 = vadd.f32 %v3778_v59, %v434_v2  ;;  %v442_v12 = vmul.f32 %v3781_v62, %v288_v7  ;;  %v290_v14 = vpop.f32.mrb[3].mxu0 }
 0x166   :  { %v463_v20 = vadd.f32 %v3778_v59, %v435_v6  ;;  %v443_v21 = vmul.f32 %v3781_v62, %v290_v14 }
 0x167   :  { %v478_v26 = vmax.f32 %v462_v10, 0.0  ;;  %v470_v27 = vadd.f32 %v3790_v17, %v442_v12 }
 0x168   :  { %v479_v30 = vmax.f32 %v463_v20, 0.0  ;;  %v471_v31 = vadd.f32 %v3790_v17, %v443_v21  ;;  %v327_v32 = vpop.f32.mrb[0].mxu1 }
 0x169   :  { %v486_v35 = vmax.f32 %v470_v27, 0.0  ;;  %v436_v13 = vmul.f32 %v3770_v25, %v327_v32  ;;  %v329_v36 = vpop.f32.mrb[1].mxu1  ;;  %v3818_v37 = vsel %vm61_vm5, %v478_v26, 0.0 }
 0x16a   :  { %v487_v39 = vmax.f32 %v471_v31, 0.0  ;;  %v437_v40 = vmul.f32 %v3770_v25, %v329_v36  ;;  %v331_v41 = vpop.f32.mrb[2].mxu1  ;;  %v370_v42 = vpop.f32.mrb[4].mxu0  ;;  %v3823_v43 = vsel %vm3794_vm6, %v479_v30, 0.0 }
 0x16b   :  { %v464_v44 = vadd.f32 %v3778_v59, %v436_v13  ;;  %v444_v46 = vmul.f32 %v3781_v62, %v331_v41  ;;  %v333_v11 = vpop.f32.mrb[3].mxu1  ;;  %v438_v18 = vmul.f32 %v3770_v25, %v370_v42  ;;  %v372_v47 = vpop.f32.mrb[5].mxu0  ;;  %v3161_v48 = vpack.i.bf16 %v3823_v43, %v3818_v37 }
 0x16c   :  { %v465_v49 = vadd.f32 %v3778_v59, %v437_v40  ;;  %v445_v50 = vmul.f32 %v3781_v62, %v333_v11  ;;  %v439_v51 = vmul.f32 %v3770_v25, %v372_v47  ;;  %v374_v52 = vpop.f32.mrb[6].mxu0  ;;  %v3836_v53 = vsel %vm61_vm5, %v486_v35, 0.0 }
 0x16d   :  { %v480_v54 = vmax.f32 %v464_v44, 0.0  ;;  %v472_v55 = vadd.f32 %v3790_v17, %v444_v46  ;;  %v466_v57 = vadd.f32 %v3778_v59, %v438_v18  ;;  %v446_v45 = vmul.f32 %v3781_v62, %v374_v52  ;;  %3162 = vrot.lane.b32.xlu0 %v3161_v48, %s3560_s0  ;;  %v376_v58 = vpop.f32.mrb[7].mxu0 }
 0x16e   :  { %v481_v60 = vmax.f32 %v465_v49, 0.0  ;;  %v473_v61 = vadd.f32 %v3790_v17, %v445_v50  ;;  %v467_v63 = vadd.f32 %v3778_v59, %v439_v51  ;;  %v447_v2 = vmul.f32 %v3781_v62, %v376_v58 }
 0x16f   :  { %v488_v3 = vmax.f32 %v472_v55, 0.0  ;;  %v482_v4 = vmax.f32 %v466_v57, 0.0  ;;  %v474_v0 = vadd.f32 %v3790_v17, %v446_v45  ;;  %v3852_v6 = vsel %vm3802_vm7, %v480_v54, 0.0 }
 0x170   :  { %v489_v7 = vmax.f32 %v473_v61, 0.0  ;;  %v475_v8 = vadd.f32 %v3790_v17, %v447_v2  ;;  %v413_v9 = vpop.f32.mrb[4].mxu1  ;;  %v3166_v10 = vpack.i.bf16 %v3836_v53, %v3852_v6  ;;  %v519_v21 = vsel %vm3794_vm6, %v487_v39, 0.0 }
 0x171   :  { %v490_v14 = vmax.f32 %v474_v0, 0.0  ;;  %v440_v15 = vmul.f32 %v3770_v25, %v413_v9  ;;  %v415_v20 = vpop.f32.mrb[5].mxu1  ;;  %v3866_v26 = vsel %vm3802_vm7, %v488_v3, 0.0  ;;  %v483_v27 = vmax.f32 %v467_v63, 0.0 }
 0x172   :  { %v441_v30 = vmul.f32 %v3770_v25, %v415_v20  ;;  %v417_v31 = vpop.f32.mrb[6].mxu1  ;;  %3167 = vrot.lane.b32.xlu1 %v3166_v10, %s3560_s0  ;;  %v3171_v32 = vpack.i.bf16 %v3866_v26, %v519_v21  ;;  %v3873_v34 = vsel %vm3806_vm8, %v481_v60, 0.0  ;;  %v3879_v38 = vsel %vm3806_vm8, %v489_v7, 0.0 }
 0x173   :  { %v468_v35 = vadd.f32 %v3778_v59, %v440_v15  ;;  %v448_v13 = vmul.f32 %v3781_v62, %v417_v31  ;;  %v419_v36 = vpop.f32.mrb[7].mxu1  ;;  %v3883_v25 = vsel %vm3811_vm9, %v482_v4, 0.0  ;;  %v3176_v41 = vpack.i.bf16 %v3879_v38, %v3873_v34 }
 0x174   :  { %v469_v39 = vadd.f32 %v3778_v59, %v441_v30  ;;  %v449_v40 = vmul.f32 %v3781_v62, %v419_v36  ;;  %3172 = vrot.lane.b32.xlu0 %v3171_v32, %s3560_s0  ;;  %v3892_v42 = vsel %vm3811_vm9, %v490_v14, 0.0  ;;  %v491_v44 = vmax.f32 %v475_v8, 0.0 }
 0x175   :  { %v484_v46 = vmax.f32 %v468_v35, 0.0  ;;  %v476_v11 = vadd.f32 %v3790_v17, %v448_v13  ;;  %v3186_v18 = vpack.i.bf16 %v3892_v42, %v3883_v25  ;;  %v3901_v48 = vsel %vm3838_vm10, %v483_v27, 0.0 }
 0x176   :  { %v485_v47 = vmax.f32 %v469_v39, 0.0  ;;  %v477_v59 = vadd.f32 %v3790_v17, %v449_v40  ;;  %3177 = vrot.lane.b32.xlu1 %v3176_v41, %s3560_s0  ;;  %v3918_v52 = vsel %vm3838_vm10, %v491_v44, 0.0 }
 0x177   :  { %v492_v62 = vmax.f32 %v476_v11, 0.0  ;;  %v3905_v49 = vsel %vm3857_vm11, %v484_v46, 0.0 }
 0x178   :  { %v493_v51 = vmax.f32 %v477_v59, 0.0  ;;  %3187 = vrot.lane.b32.xlu0 %v3186_v18, %s3560_s0  ;;  %v3181_v17 = vpack.i.bf16 %v3905_v49, %v3901_v48  ;;  %v3929_v16 = vsel %vm3909_vm12, %v485_v47, 0.0 }
 0x179   :  { %v3922_v54 = vsel %vm3857_vm11, %v492_v62, 0.0 }
 0x17a   :  { %3182 = vrot.lane.b32.xlu1 %v3181_v17, %s3560_s0  ;;  %v3191_v24 = vpack.i.bf16 %v3922_v54, %v3918_v52  ;;  %v3933_v55 = vsel %vm3909_vm12, %v493_v51, 0.0 }
 0x17b   :  { %v3196_v57 = vpack.i.bf16 %v3933_v55, %v3929_v16 }
 0x17c   :  { %3192 = vrot.lane.b32.xlu0 %v3191_v24, %s3560_s0 }
 0x17e   :  { %3197 = vrot.lane.b32.xlu1 %v3196_v57, %s3560_s0 }
 0x1df   :  { %v3163_v45 = vpop.permute.xlu0 %3162 }
 0x1e0   :  { %v3165_v58 = vunpack.i.h.bf16 %v3163_v45  ;;  %v3164_v60 = vunpack.i.l.bf16 %v3163_v45 }
 0x1e2   :  { %v574_v63 = vsel %vm152_vm0, %v3164_v60, %v3165_v58 }
 0x1e3   :  { %v3942_v10 = vmax.f32 %v3818_v37, %v574_v63 }
 0x1e4   :  { %v3168_v61 = vpop.permute.xlu1 %3167 }
 0x1e5   :  { %v3169_v2 = vunpack.i.l.bf16 %v3168_v61  ;;  %v3170_v4 = vunpack.i.h.bf16 %v3168_v61 }
 0x1e6   :  { %v3173_v3 = vpop.permute.xlu0 %3172 }
 0x1e7   :  { %v575_v0 = vsel %vm152_vm0, %v3165_v58, %v3169_v2  ;;  %v3175_v7 = vunpack.i.h.bf16 %v3173_v3  ;;  %v3174_v8 = vunpack.i.l.bf16 %v3173_v3 }
 0x1e8   :  { %v3178_v9 = vpop.permute.xlu1 %3177  ;;  %v3945_v14 = vmax.f32 %v3823_v43, %v575_v0 }
 0x1e9   :  { %v581_v15 = vsel %vm152_vm0, %v3170_v4, %v3174_v8  ;;  %v582_v20 = vsel %vm152_vm0, %v3174_v8, %v3175_v7  ;;  %v3180_v27 = vunpack.i.h.bf16 %v3178_v9  ;;  %v3179_v30 = vunpack.i.l.bf16 %v3178_v9 }
 0x1ea   :  { %v3188_v31 = vpop.permute.xlu0 %3187  ;;  %v3201_v32 = vpack.i.bf16 %v3945_v14, %v3942_v10  ;;  %v3952_v35 = vmax.f32 %v3836_v53, %v581_v15  ;;  %v3954_v13 = vmax.f32 %v519_v21, %v582_v20 }
 0x1eb   :  { %v576_v37 = vsel %vm152_vm0, %v3169_v2, %v3179_v30  ;;  %v583_v43 = vsel %vm152_vm0, %v3175_v7, %v3180_v27  ;;  %v3190_v36 = vunpack.i.h.bf16 %v3188_v31  ;;  %v3189_v39 = vunpack.i.l.bf16 %v3188_v31 }
 0x1ec   :  { %v3183_v40 = vpop.permute.xlu1 %3182  ;;  %3202 = vrot.lane.b32.xlu0 %v3201_v32, %s3564_s1  ;;  %v3206_v41 = vpack.i.bf16 %v3954_v13, %v3952_v35  ;;  %v3962_v44 = vmax.f32 %v3852_v6, %v576_v37  ;;  %v3965_v53 = vmax.f32 %v3866_v26, %v583_v43  ;;  %v3221_v45 = vpack.i.bf16 %v3952_v35, %v3942_v10 }
 0x1ed   :  { %v577_v21 = vsel %vm152_vm0, %v3179_v30, %v3189_v39  ;;  %v3185_v46 = vunpack.i.h.bf16 %v3183_v40  ;;  %v3184_v11 = vunpack.i.l.bf16 %v3183_v40  ;;  %v584_v18 = vsel %vm152_vm0, %v3180_v27, %v3190_v36 }
 0x1ee   :  { %3207 = vrot.lane.b32.xlu1 %v3206_v41, %s3564_s1  ;;  %v3193_v47 = vpop.permute.xlu0 %3192  ;;  %v3211_v59 = vpack.i.bf16 %v3962_v44, %v3945_v14  ;;  %v3973_v62 = vmax.f32 %v3873_v34, %v577_v21  ;;  %v3216_v57 = vpack.i.bf16 %v3965_v53, %v3954_v13  ;;  %v3988_v2 = vmax.f32 %v3879_v38, %v584_v18  ;;  %v1025_v18 = vld [vmem:[%s5648_s5] sm:$0xff] }
 0x1ef   :  { %v578_v6 = vsel %vm152_vm0, %v3189_v39, %v3184_v11  ;;  %v579_v26 = vsel %vm152_vm0, %v3184_v11, %v3185_v46  ;;  %v3195_v51 = vunpack.i.h.bf16 %v3193_v47  ;;  %v3194_v17 = vunpack.i.l.bf16 %v3193_v47  ;;  %v1026_v47 = vld [vmem:[%s5648_s5 + $0x8] sm:$0xff] }
 0x1f0   :  { %v3198_v24 = vpop.permute.xlu1 %3197  ;;  %3212 = vrot.lane.b32.xlu0 %v3211_v59, %s3565_s14  ;;  %v3226_v63 = vpack.i.bf16 %v3973_v62, %v3962_v44  ;;  %v3991_v3 = vmax.f32 %v3883_v25, %v578_v6  ;;  %v3994_v4 = vmax.f32 %v3901_v48, %v579_v26  ;;  %v1081_v59 = vld [vmem:[%s5649_s6] sm:$0xff]  ;;  %v1082_v6 = vld [vmem:[%s5649_s6 + $0x8] sm:$0xff]  ;;  %v1027_v26 = vld [vmem:[%s5648_s5 + $0x10] sm:$0xff] }
 0x1f1   :  { %v585_v58 = vsel %vm152_vm0, %v3190_v36, %v3194_v17  ;;  %v586_v34 = vsel %vm152_vm0, %v3194_v17, %v3195_v51  ;;  %v3200_v60 = vunpack.i.h.bf16 %v3198_v24  ;;  %v3199_v61 = vunpack.i.l.bf16 %v3198_v24  ;;  %v1083_v17 = vld [vmem:[%s5649_s6 + $0x10] sm:$0xff]  ;;  %v1084_v24 = vld [vmem:[%s5649_s6 + $0x18] sm:$0xff] }
 0x1f2   :  { %3217 = vrot.lane.b32.xlu1 %v3216_v57, %s3565_s14  ;;  %v4008_v25 = vmax.f32 %v3892_v42, %v585_v58  ;;  %v4011_v48 = vmax.f32 %v3918_v52, %v586_v34  ;;  %v3246_v42 = vpack.i.bf16 %v3988_v2, %v3965_v53  ;;  %v783_v52 = vpack.c.bf16 %v3988_v2, %v3973_v62 }
 0x1f3   :  { %v605_v0 = vsel %vm152_vm0, %v3200_v60, 0.0  ;;  %v580_v7 = vsel %vm152_vm0, %v3185_v46, %v3199_v61  ;;  %v587_v8 = vsel %vm152_vm0, %v3195_v51, %v3200_v60  ;;  %v604_v9 = vsel %vm152_vm0, %v3199_v61, 0.0  ;;  %v1028_v51 = vld [vmem:[%s5648_s5 + $0x18] sm:$0xff] }
 0x1f4   :  { %v4001_v15 = vmax.f32 %v3933_v55, %v605_v0  ;;  %v4004_v38 = vmax.f32 %v3929_v16, %v604_v9  ;;  %3222 = vrot.lane.b32.xlu0 %v3221_v45, %s3565_s14  ;;  %v4014_v20 = vmax.f32 %v3905_v49, %v580_v7  ;;  %v4017_v27 = vmax.f32 %v3922_v54, %v587_v8 }
 0x1f5   :  { %v781_v55 = vpack.c.bf16 %v3954_v13, %v3945_v14  ;;  %v780_v16 = vpack.c.bf16 %v3952_v35, %v3942_v10  ;;  %v782_v49 = vpack.c.bf16 %v3965_v53, %v3962_v44  ;;  %v3231_v54 = vpack.i.bf16 %v3994_v4, %v3991_v3 }
 0x1f6   :  { %3227 = vrot.lane.b32.xlu1 %v3226_v63, %s3564_s1  ;;  %v785_v30 = vpack.c.bf16 %v4011_v48, %v3994_v4  ;;  %v784_v31 = vpack.c.bf16 %v4008_v25, %v3991_v3  ;;  %v787_v32 = vpack.c.bf16 %v4001_v15, %v4004_v38  ;;  %v786_v37 = vpack.c.bf16 %v4017_v27, %v4014_v20 }
 0x1f7   :  { %v3251_v43 = vpack.i.bf16 %v4011_v48, %v4008_v25  ;;  %v3236_v36 = vpack.i.bf16 %v3991_v3, %v3973_v62  ;;  %v3256_v39 = vpack.i.bf16 %v4008_v25, %v3988_v2  ;;  %v3241_v40 = vpack.i.bf16 %v4014_v20, %v3994_v4 }
 0x1f8   :  { %3247 = vrot.lane.b32.xlu0 %v3246_v42, %s3564_s1  ;;  %v3261_v41 = vpack.i.bf16 %v4017_v27, %v4011_v48  ;;  %v3266_v21 = vpack.i.bf16 %v4004_v38, %v4014_v20  ;;  %v3271_v46 = vpack.i.bf16 %v4001_v15, %v4017_v27  ;;  %v3276_v11 = vpack.i.bf16 %v4001_v15, %v4004_v38 }
 0x1fa   :  { %3232 = vrot.lane.b32.xlu1 %v3231_v54, %s3564_s1 }
 0x1fc   :  { %3252 = vrot.lane.b32.xlu0 %v3251_v43, %s3564_s1 }
 0x1fe   :  { %3237 = vrot.lane.b32.xlu1 %v3236_v36, %s3565_s14 }
 0x200   :  { %3257 = vrot.lane.b32.xlu0 %v3256_v39, %s3565_s14 }
 0x202   :  { %3242 = vrot.lane.b32.xlu1 %v3241_v40, %s3565_s14 }
 0x204   :  { %3262 = vrot.lane.b32.xlu0 %v3261_v41, %s3565_s14 }
 0x206   :  { %3267 = vrot.lane.b32.xlu1 %v3266_v21, %s3564_s1 }
 0x208   :  { %3272 = vrot.lane.b32.xlu0 %v3271_v46, %s3564_s1 }
 0x20a   :  { %3277 = vrot.lane.b32.xlu1 %v3276_v11, %s3565_s14 }
 0x20c   :  { %1031 = vperm.xlu0 %3160, %v1025_v18  }
 0x20e   :  { %1036 = vperm.xlu1 %3159, %v1026_v47  }
 0x210   :  { %1087 = vperm.xlu0 %3160, %v1081_v59  }
 0x212   :  { %1092 = vperm.xlu1 %3159, %v1082_v6  }
 0x214   :  { %1041 = vperm.xlu0 %3160, %v1027_v26  }
 0x216   :  { %1046 = vperm.xlu1 %3159, %v1028_v51  }
 0x218   :  { %1097 = vperm.xlu0 %3160, %v1083_v17  }
 0x21a   :  { %1102 = vperm.xlu1 %3159, %v1084_v24  }
 0x25e   :  { %v3203_v57 = vpop.permute.xlu0 %3202 }
 0x25f   :  { %v3205_v45 = vunpack.i.h.bf16 %v3203_v57  ;;  %v3204_v58 = vunpack.i.l.bf16 %v3203_v57 }
 0x260   :  { %v3208_v34 = vpop.permute.xlu1 %3207 }
 0x261   :  { %v3210_v60 = vunpack.i.h.bf16 %v3208_v34  ;;  %v3209_v61 = vunpack.i.l.bf16 %v3208_v34  ;;  %v671_v7 = vsel %vm670_vm13, %v3204_v58, %v3205_v45 }
 0x262   :  { %v4095_v0 = vpop.permute.xlu0 %3212 }
 0x263   :  { %v678_v8 = vsel %vm670_vm13, %v3209_v61, %v3210_v60  ;;  %v3215_v9 = vunpack.i.h.bf16 %v4095_v0  ;;  %v3214_v42 = vunpack.i.l.bf16 %v4095_v0  ;;  %v3062_v36 = vpack.c.bf16 %v3209_v61, %v3204_v58 }
 0x264   :  { %v4101_v54 = vpop.permute.xlu1 %3217  ;;  %v773_v43 = vpack.c.bf16 %v678_v8, %v671_v7 }
 0x265   :  { %v3220_v39 = vunpack.i.h.bf16 %v4101_v54  ;;  %v3219_v40 = vunpack.i.l.bf16 %v4101_v54  ;;  %v737_v47 = vsel %vm735_vm1, %v3214_v42, %v3215_v9 }
 0x266   :  { %v3223_v41 = vpop.permute.xlu0 %3222  ;;  %813 = vmatprep.subr.bf16.mxu0 %v773_v43 }
 0x267   :  { %v3225_v21 = vunpack.i.h.bf16 %v3223_v41  ;;  %v3224_v46 = vunpack.i.l.bf16 %v3223_v41  ;;  %3063 = vmatpush1.bf16.msk.msra.mxu0 %vm3061_vm15, %v3062_v36  ;;  %v744_v11 = vsel %vm735_vm1, %v3219_v40, %v3220_v39 }
 0x268   :  { %v3228_v18 = vpop.permute.xlu1 %3227  ;;  %815 = vmatprep.subr.bf16.mxu0 %v781_v55  ;;  %v789_v24 = vpack.c.bf16 %v744_v11, %v737_v47 }
 0x269   :  { %v743_v59 = vsel %vm735_vm1, %v3225_v21, %v3219_v40  ;;  %v736_v6 = vsel %vm735_vm1, %v3224_v46, %v3214_v42  ;;  %v3230_v26 = vunpack.i.h.bf16 %v3228_v18  ;;  %v3229_v51 = vunpack.i.l.bf16 %v3228_v18 }
 0x26a   :  { %v3248_v17 = vpop.permute.xlu0 %3247  ;;  %v788_v13 = vpack.c.bf16 %v743_v59, %v736_v6 }
 0x26b   :  { %v3250_v57 = vunpack.i.h.bf16 %v3248_v17  ;;  %v3249_v58 = vunpack.i.l.bf16 %v3248_v17  ;;  %816 = vmatpush1.bf16.msra.mxu0 %v780_v16  ;;  %v672_v34 = vsel %vm670_vm13, %v3205_v45, %v3229_v51  ;;  %v673_v55 = vsel %vm670_vm13, %v3229_v51, %v3230_v26  ;;  %v4131_v16 = vld [vmem:[%s5647_s4] sm:$0xff]  }
 0x26c   :  { %v4119_v14 = vpop.permute.xlu1 %3232  ;;  %817 = vmatprep.subr.bf16.mxu0 %v789_v24 }
 0x26d   :  { %v679_v61 = vsel %vm670_vm13, %v3210_v60, %v3249_v58  ;;  %v3235_v63 = vunpack.i.h.bf16 %v4119_v14  ;;  %v3234_v0 = vunpack.i.l.bf16 %v4119_v14  ;;  %v680_v7 = vsel %vm670_vm13, %v3249_v58, %v3250_v57 }
 0x26e   :  { %v4126_v8 = vpop.permute.xlu0 %3252  ;;  %v775_v10 = vpack.c.bf16 %v680_v7, %v673_v55  ;;  %v774_v35 = vpack.c.bf16 %v679_v61, %v672_v34 }
 0x26f   :  { %v3255_v45 = vunpack.i.h.bf16 %v4126_v8  ;;  %v3254_v42 = vunpack.i.l.bf16 %v4126_v8  ;;  %818 = vmatpush1.bf16.msra.mxu0 %v788_v13  ;;  %v674_v60 = vsel %vm670_vm13, %v3230_v26, %v3234_v0  ;;  %v675_v43 = vsel %vm670_vm13, %v3234_v0, %v3235_v63 }
 0x270   :  { %v3238_v54 = vpop.permute.xlu1 %3237  ;;  %866 = vmatprep.subr.bf16.mxu1 %v775_v10 }
 0x271   :  { %v681_v36 = vsel %vm670_vm13, %v3250_v57, %v3254_v42  ;;  %v3240_v40 = vunpack.i.h.bf16 %v3238_v54  ;;  %v3239_v41 = vunpack.i.l.bf16 %v3238_v54  ;;  %867 = vmatpush1.bf16.msra.mxu1 %v774_v35  ;;  %v682_v21 = vsel %vm670_vm13, %v3254_v42, %v3255_v45 }
 0x272   :  { %3064 = vmatmul.mubr.msk.bf16.vlgmr.msra.gmra.mrb[8].mxu0 %vm806_vm2, %v4131_v16  ;;  %868 = vmatprep.subr.bf16.mxu1 %v783_v52  ;;  %v3258_v46 = vpop.permute.xlu0 %3257  ;;  %v777_v11 = vpack.c.bf16 %v682_v21, %v675_v43  ;;  %v776_v18 = vpack.c.bf16 %v681_v36, %v674_v60 }
 0x273   :  { %v3260_v47 = vunpack.i.h.bf16 %v3258_v46  ;;  %v3259_v59 = vunpack.i.l.bf16 %v3258_v46  ;;  %855 = vmatprep.mubr.bf16.mxu0 %v5657_v23  ;;  %v738_v6 = vsel %vm735_vm1, %v3215_v9, %v3239_v41  ;;  %v739_v51 = vsel %vm735_vm1, %v3239_v41, %v3240_v40 }
 0x274   :  { %v3243_v26 = vpop.permute.xlu1 %3242  ;;  %919 = vmatprep.subr.bf16.mxu0 %v777_v11 }
 0x275   :  { %v745_v17 = vsel %vm735_vm1, %v3220_v39, %v3259_v59  ;;  %v3245_v24 = vunpack.i.h.bf16 %v3243_v26  ;;  %v3244_v57 = vunpack.i.l.bf16 %v3243_v26  ;;  %869 = vmatpush1.bf16.msra.mxu1 %v782_v49  ;;  %920 = vmatpush1.bf16.msra.mxu0 %v776_v18  ;;  %v746_v62 = vsel %vm735_vm1, %v3259_v59, %v3260_v47  ;;  %v3523_v39 = vld [vmem:[%s5647_s4 + $0x8] sm:$0xff]   ;;  %s3566_s4 = smov 4  }
 0x276   :  { %v3263_v2 = vpop.permute.xlu0 %3262  ;;  %921 = vmatprep.subr.bf16.mxu0 %v785_v30  ;;  %v791_v52 = vpack.c.bf16 %v746_v62, %v739_v51  ;;  %v790_v9 = vpack.c.bf16 %v745_v17, %v738_v6 }
 0x277   :  { %v3265_v58 = vunpack.i.h.bf16 %v3263_v2  ;;  %v3264_v34 = vunpack.i.l.bf16 %v3263_v2  ;;  %v740_v13 = vsel %vm735_vm1, %v3240_v40, %v3244_v57  ;;  %v741_v53 = vsel %vm735_vm1, %v3244_v57, %v3245_v24 }
 0x278   :  { %v3268_v44 = vpop.permute.xlu1 %3267  ;;  %870 = vmatprep.subr.bf16.mxu1 %v791_v52 }
 0x279   :  { %v747_v49 = vsel %vm735_vm1, %v3260_v47, %v3264_v34  ;;  %v3270_v55 = vunpack.i.h.bf16 %v3268_v44  ;;  %v3269_v61 = vunpack.i.l.bf16 %v3268_v44  ;;  %871 = vmatpush1.bf16.msra.mxu1 %v790_v9  ;;  %922 = vmatpush1.bf16.msra.mxu0 %v784_v31  ;;  %v748_v4 = vsel %vm735_vm1, %v3264_v34, %v3265_v58 }
 0x27a   :  { %3065 = vmatmul.mubr.msk.bf16.gmra.mrb[12].mxu0 %vm806_vm2, %v3523_v39  ;;  %v3273_v48 = vpop.permute.xlu0 %3272  ;;  %v793_v30 = vpack.c.bf16 %v748_v4, %v741_v53  ;;  %v792_v0 = vpack.c.bf16 %v747_v49, %v740_v13 }
 0x27b   :  { %v3275_v7 = vunpack.i.h.bf16 %v3273_v48  ;;  %v3274_v8 = vunpack.i.l.bf16 %v3273_v48  ;;  %951 = vmatprep.mubr.bf16.mxu0 %v5657_v23  ;;  %v676_v10 = vsel %vm670_vm13, %v3235_v63, %v3269_v61  ;;  %v677_v31 = vsel %vm670_vm13, %v3269_v61, %v3270_v55 }
 0x27c   :  { %3066 = vmatmul.mubr.msk.bf16.vlgmr.msra.gmra.mrb[8].mxu1 %vm806_vm2, %v4131_v16  ;;  %923 = vmatprep.subr.bf16.mxu0 %v793_v30  ;;  %v3278_v25 = vpop.permute.xlu1 %3277 }
 0x27d   :  { %v683_v3 = vsel %vm670_vm13, %v3255_v45, %v3274_v8  ;;  %924 = vmatpush1.bf16.msra.mxu0 %v792_v0  ;;  %v684_v35 = vsel %vm670_vm13, %v3274_v8, %v3275_v7  ;;  %908 = vmatprep.mubr.bf16.mxu1 %v5657_v23  ;;  %v3280_v54 = vunpack.i.h.bf16 %v3278_v25  ;;  %v3279_v14 = vunpack.i.l.bf16 %v3278_v25 }
 0x27e   :  { %v779_v42 = vpack.c.bf16 %v684_v35, %v677_v31  ;;  %v778_v60 = vpack.c.bf16 %v683_v3, %v676_v10 }
 0x27f   :  { %v742_v63 = vsel %vm735_vm1, %v3245_v24, %v3279_v14  ;;  %v749_v45 = vsel %vm735_vm1, %v3265_v58, %v3280_v54  ;;  %v3071_v43 = vpack.c.bf16 %v3280_v54, %v3279_v14 }
 0x280   :  { %972 = vmatprep.subr.bf16.mxu1 %v779_v42  ;;  %v794_v15 = vpack.c.bf16 %v749_v45, %v742_v63 }
 0x281   :  { %973 = vmatpush1.bf16.msra.mxu1 %v778_v60 }
 0x282   :  { %3068 = vmatmul.mubr.msk.bf16.vlgmr.msra.gmra.mrb[16].mxu0 %vm806_vm2, %v4131_v16  ;;  %974 = vmatprep.subr.bf16.mxu1 %v787_v32 }
 0x283   :  { %961 = vmatprep.mubr.bf16.mxu0 %v5657_v23 }
 0x284   :  { %3067 = vmatmul.mubr.msk.bf16.gmra.mrb[12].mxu1 %vm806_vm2, %v3523_v39 }
 0x285   :  { %975 = vmatpush1.bf16.msra.mxu1 %v786_v37  ;;  %1004 = vmatprep.mubr.bf16.mxu1 %v5657_v23 }
 0x286   :  { %3072 = vmatprep.subr.msk.bf16.mxu1 %vm3070_vm3, %v3071_v43 }
 0x289   :  { %977 = vmatpush1.bf16.msra.mxu1 %v794_v15 }
 0x28a   :  { %3069 = vmatmul.mubr.msk.bf16.gmra.mrb[20].mxu0 %vm806_vm2, %v3523_v39 }
 0x28b   :  { %1804 = vmatprep.mubr.bf16.mxu0 %v5657_v23  ;;  %v4200_v38 = vpop.permute.xlu0 %1031 }
 0x28c   :  { %3073 = vmatmul.mubr.msk.bf16.vlgmr.msra.gmra.mrb[16].mxu1 %vm806_vm2, %v4131_v16 }
 0x28d   :  { %1014 = vmatprep.mubr.bf16.mxu1 %v5657_v23  ;;  %v4202_v20 = vpop.permute.xlu1 %1036 }
 0x28f   :  { %v4204_v27 = vpop.permute.xlu0 %1087 }
 0x291   :  { %v4206_v32 = vpop.permute.xlu1 %1092 }
 0x293   :  { %v4210_v21 = vpop.permute.xlu0 %1041 }
 0x294   :  { %3074 = vmatmul.mubr.msk.bf16.gmra.mrb[20].mxu1 %vm806_vm2, %v3523_v39 }
 0x295   :  { %1877 = vmatprep.mubr.bf16.mxu1 %v5657_v23  ;;  %v4215_v6 = vpop.permute.xlu1 %1046 }
 0x297   :  { %v4227_v2 = vpop.permute.xlu0 %1097 }
 0x299   :  { %v4238_v48 = vpop.permute.xlu1 %1102 }
 0x345   :  { %v847_v37 = vpop.f32.mrb[8].mxu0 }
 0x346   :  { %v1049_v36 = vmul.f32 %v4200_v38, %v847_v37  ;;  %v849_v40 = vpop.f32.mrb[9].mxu0 }
 0x347   :  { %v1050_v16 = vmul.f32 %v4200_v38, %v849_v40  ;;  %v851_v41 = vpop.f32.mrb[10].mxu0 }
 0x348   :  { %v1105_v46 = vadd.f32 %v4204_v27, %v1049_v36  ;;  %v853_v11 = vpop.f32.mrb[11].mxu0  ;;  %v1057_v47 = vmul.f32 %v4202_v20, %v851_v41 }
 0x349   :  { %v1106_v18 = vadd.f32 %v4204_v27, %v1050_v16  ;;  %v1058_v51 = vmul.f32 %v4202_v20, %v853_v11 }
 0x34a   :  { %v1137_v59 = vmax.f32 %v1105_v46, 0.0  ;;  %v1113_v24 = vadd.f32 %v4206_v32, %v1057_v47 }
 0x34b   :  { %v1138_v26 = vmax.f32 %v1106_v18, 0.0  ;;  %v1114_v44 = vadd.f32 %v4206_v32, %v1058_v51 }
 0x34c   :  { %v4220_v17 = vsel %vm61_vm5, %v1137_v59, 0.0  ;;  %v1145_v30 = vmax.f32 %v1113_v24, 0.0 }
 0x34d   :  { %v857_v57 = vpop.f32.mrb[12].mxu0  ;;  %v4225_v62 = vsel %vm3794_vm6, %v1138_v26, 0.0  ;;  %v1146_v43 = vmax.f32 %v1114_v44, 0.0 }
 0x34e   :  { %v1065_v52 = vmul.f32 %v4210_v21, %v857_v57  ;;  %v859_v9 = vpop.f32.mrb[13].mxu0  ;;  %v3281_v39 = vpack.i.bf16 %v4225_v62, %v4220_v17  ;;  %v4254_v40 = vsel %vm61_vm5, %v1145_v30, 0.0 }
 0x34f   :  { %v1066_v58 = vmul.f32 %v4210_v21, %v859_v9  ;;  %v861_v34 = vpop.f32.mrb[14].mxu0  ;;  %v900_v13 = vpop.f32.mrb[8].mxu1 }
 0x350   :  { %v1121_v53 = vadd.f32 %v4227_v2, %v1065_v52  ;;  %v1073_v49 = vmul.f32 %v4215_v6, %v861_v34  ;;  %v1051_v55 = vmul.f32 %v4200_v38, %v900_v13  ;;  %v863_v61 = vpop.f32.mrb[15].mxu0  ;;  %3282 = vrot.lane.b32.xlu0 %v3281_v39, %s3565_s14  ;;  %v902_v4 = vpop.f32.mrb[9].mxu1 }
 0x351   :  { %v1122_v0 = vadd.f32 %v4227_v2, %v1066_v58  ;;  %v1074_v7 = vmul.f32 %v4215_v6, %v863_v61  ;;  %v1052_v8 = vmul.f32 %v4200_v38, %v902_v4  ;;  %v904_v10 = vpop.f32.mrb[10].mxu1 }
 0x352   :  { %v1129_v3 = vadd.f32 %v4238_v48, %v1073_v49  ;;  %v1107_v25 = vadd.f32 %v4204_v27, %v1051_v55  ;;  %v1059_v31 = vmul.f32 %v4202_v20, %v904_v10  ;;  %v906_v35 = vpop.f32.mrb[11].mxu1  ;;  %v1153_v42 = vmax.f32 %v1121_v53, 0.0 }
 0x353   :  { %v1154_v60 = vmax.f32 %v1122_v0, 0.0  ;;  %v1108_v54 = vadd.f32 %v4204_v27, %v1052_v8  ;;  %v1060_v14 = vmul.f32 %v4202_v20, %v906_v35  ;;  %v4250_v15 = vadd.f32 %v4238_v48, %v1074_v7 }
 0x354   :  { %v1139_v63 = vmax.f32 %v1107_v25, 0.0  ;;  %v1115_v45 = vadd.f32 %v4206_v32, %v1059_v31  ;;  %v1161_v16 = vmax.f32 %v1129_v3, 0.0  ;;  %v4270_v24 = vsel %vm61_vm5, %v1153_v42, 0.0 }
 0x355   :  { %v1140_v37 = vmax.f32 %v1108_v54, 0.0  ;;  %v953_v36 = vpop.f32.mrb[16].mxu0  ;;  %v4262_v47 = vadd.f32 %v4206_v32, %v1060_v14  ;;  %v4274_v57 = vsel %vm3794_vm6, %v1154_v60, 0.0  ;;  %v1162_v44 = vmax.f32 %v4250_v15, 0.0 }
 0x356   :  { %v1147_v41 = vmax.f32 %v1115_v45, 0.0  ;;  %v1053_v46 = vmul.f32 %v4200_v38, %v953_v36  ;;  %v955_v11 = vpop.f32.mrb[17].mxu0  ;;  %v4259_v18 = vsel %vm3802_vm7, %v1139_v63, 0.0  ;;  %v4285_v55 = vsel %vm3794_vm6, %v1146_v43, 0.0 }
 0x357   :  { %v910_v59 = vpop.f32.mrb[12].mxu1  ;;  %v957_v26 = vpop.f32.mrb[18].mxu0  ;;  %v4266_v51 = vsel %vm3806_vm8, %v1140_v37, 0.0  ;;  %v1054_v30 = vmul.f32 %v4200_v38, %v955_v11  ;;  %v3296_v31 = vpack.i.bf16 %v4274_v57, %v4270_v24  ;;  %v1148_v35 = vmax.f32 %v4262_v47, 0.0 }
 0x358   :  { %v1109_v52 = vadd.f32 %v4204_v27, %v1053_v46  ;;  %v1067_v9 = vmul.f32 %v4210_v21, %v910_v59  ;;  %v1061_v39 = vmul.f32 %v4202_v20, %v957_v26  ;;  %v912_v58 = vpop.f32.mrb[13].mxu1  ;;  %v959_v34 = vpop.f32.mrb[19].mxu0  ;;  %v3286_v13 = vpack.i.bf16 %v4266_v51, %v4259_v18 }
 0x359   :  { %v1068_v53 = vmul.f32 %v4210_v21, %v912_v58  ;;  %v914_v49 = vpop.f32.mrb[14].mxu1  ;;  %v4289_v61 = vsel %vm3802_vm7, %v1147_v41, 0.0  ;;  %v4305_v54 = vsel %vm61_vm5, %v1161_v16, 0.0  ;;  %v1062_v63 = vmul.f32 %v4202_v20, %v959_v34  ;;  %vm4778_vm5 = vmneg %vm1489_vm4 }
 0x35a   :  { %v1141_v4 = vmax.f32 %v1109_v52, 0.0  ;;  %v1123_v0 = vadd.f32 %v4227_v2, %v1067_v9  ;;  %v1075_v7 = vmul.f32 %v4215_v6, %v914_v49  ;;  %3287 = vrot.lane.b32.xlu1 %v3286_v13, %s3565_s14  ;;  %v916_v8 = vpop.f32.mrb[15].mxu1  ;;  %v1117_v10 = vadd.f32 %v4206_v32, %v1061_v39 }
 0x35b   :  { %v1124_v3 = vadd.f32 %v4227_v2, %v1068_v53  ;;  %v1076_v25 = vmul.f32 %v4215_v6, %v916_v8  ;;  %v3291_v60 = vpack.i.bf16 %v4289_v61, %v4285_v55  ;;  %v4314_v36 = vadd.f32 %v4204_v27, %v1054_v30 }
 0x35c   :  { %v1155_v42 = vmax.f32 %v1123_v0, 0.0  ;;  %v1131_v45 = vadd.f32 %v4238_v48, %v1075_v7  ;;  %v4311_v37 = vsel %vm3811_vm9, %v1141_v4, 0.0  ;;  %v1149_v11 = vmax.f32 %v1117_v10, 0.0 }
 0x35d   :  { %v1156_v14 = vmax.f32 %v1124_v3, 0.0  ;;  %v963_v43 = vpop.f32.mrb[20].mxu0  ;;  %v3301_v16 = vpack.i.bf16 %v4254_v40, %v4311_v37  ;;  %v1132_v47 = vadd.f32 %v4238_v48, %v1076_v25  ;;  %v1118_v4 = vadd.f32 %v4206_v32, %v1062_v63 }
 0x35e   :  { %v1069_v41 = vmul.f32 %v4210_v21, %v963_v43  ;;  %3292 = vrot.lane.b32.xlu1 %v3291_v60, %s3565_s14  ;;  %v965_v56 = vpop.f32.mrb[21].mxu0  ;;  %v4322_v46 = vsel %vm3802_vm7, %v1155_v42, 0.0  ;;  %v1163_v30 = vmax.f32 %v1131_v45, 0.0  ;;  %v1142_v43 = vmax.f32 %v4314_v36, 0.0 }
 0x35f   :  { %v1070_v59 = vmul.f32 %v4210_v21, %v965_v56  ;;  %v1006_v26 = vpop.f32.mrb[16].mxu1  ;;  %v967_v52 = vpop.f32.mrb[22].mxu0  ;;  %v4328_v9 = vsel %vm3806_vm8, %v1156_v14, 0.0  ;;  %3302 = vrot.lane.b32.xlu0 %v3301_v16, %s3565_s14  ;;  %v4382_v28 = vsel %vm3794_vm6, %v1162_v44, 0.0  ;;  %vm3081_vm6 = vmpackc.low %vm4778_vm5, %vm4778_vm5 }
 0x360   :  { %v1125_v39 = vadd.f32 %v4227_v2, %v1069_v41  ;;  %v1055_v58 = vmul.f32 %v4200_v38, %v1006_v26  ;;  %v1077_v34 = vmul.f32 %v4215_v6, %v967_v52  ;;  %v969_v13 = vpop.f32.mrb[23].mxu0  ;;  %v1008_v53 = vpop.f32.mrb[17].mxu1  ;;  %v3306_v49 = vpack.i.bf16 %v4328_v9, %v4322_v46 }
 0x361   :  { %v1078_v0 = vmul.f32 %v4215_v6, %v969_v13  ;;  %v1056_v7 = vmul.f32 %v4200_v38, %v1008_v53  ;;  %v1010_v8 = vpop.f32.mrb[18].mxu1  ;;  %v1126_v3 = vadd.f32 %v4227_v2, %v1070_v59  ;;  %v4348_v38 = vsel %vm3811_vm9, %v1149_v11, 0.0 }
 0x362   :  { %v1157_v10 = vmax.f32 %v1125_v39, 0.0  ;;  %v1133_v25 = vadd.f32 %v4238_v48, %v1077_v34  ;;  %v1063_v42 = vmul.f32 %v4202_v20, %v1010_v8  ;;  %3297 = vrot.lane.b32.xlu1 %v3296_v31, %s3565_s14  ;;  %v1012_v60 = vpop.f32.mrb[19].mxu1  ;;  %v1111_v14 = vadd.f32 %v4204_v27, %v1055_v58 }
 0x363   :  { %v1134_v63 = vadd.f32 %v4238_v48, %v1078_v0  ;;  %v1064_v45 = vmul.f32 %v4202_v20, %v1012_v60  ;;  %v1164_v41 = vmax.f32 %v1132_v47, 0.0  ;;  %v1112_v16 = vadd.f32 %v4204_v27, %v1056_v7  ;;  %3307 = vrot.lane.b32.xlu0 %v3306_v49, %s3565_s14 }
 0x364   :  { %v1165_v56 = vmax.f32 %v1133_v25, 0.0  ;;  %v1150_v31 = vmax.f32 %v1118_v4, 0.0  ;;  %v1119_v59 = vadd.f32 %v4206_v32, %v1063_v42  ;;  %v4356_v26 = vsel %vm3806_vm8, %v1148_v35, 0.0 }
 0x365   :  { %v4360_v20 = vsel %vm3811_vm9, %v1157_v10, 0.0  ;;  %v1166_v11 = vmax.f32 %v1134_v63, 0.0  ;;  %v3311_v36 = vpack.i.bf16 %v4348_v38, %v4356_v26  ;;  %v4368_v47 = vsel %vm3802_vm7, %v1163_v30, 0.0 }
 0x366   :  { %v3321_v27 = vpack.i.bf16 %v4305_v54, %v4360_v20  ;;  %v1158_v52 = vmax.f32 %v1126_v3, 0.0  ;;  %v1143_v39 = vmax.f32 %v1111_v14, 0.0  ;;  %v1120_v35 = vadd.f32 %v4206_v32, %v1064_v45 }
 0x367   :  { %v1016_v58 = vpop.f32.mrb[20].mxu1  ;;  %v4373_v34 = vsel %vm3811_vm9, %v1165_v56, 0.0  ;;  %v1144_v13 = vmax.f32 %v1112_v16, 0.0  ;;  %3312 = vrot.lane.b32.xlu0 %v3311_v36, %s3565_s14  ;;  %v4386_v32 = vsel %vm3806_vm8, %v1164_v41, 0.0  ;;  %v1151_v33 = vmax.f32 %v1119_v59, 0.0 }
 0x368   :  { %v1071_v53 = vmul.f32 %v4210_v21, %v1016_v58  ;;  %3322 = vrot.lane.b32.xlu1 %v3321_v27, %s3565_s14  ;;  %v1018_v49 = vpop.f32.mrb[21].mxu1  ;;  %v3316_v0 = vpack.i.bf16 %v4368_v47, %v4382_v28  ;;  %v3326_v7 = vpack.i.bf16 %v4373_v34, %v4386_v32  ;;  %v4397_v29 = vsel %vm3838_vm10, %v1150_v31, 0.0 }
 0x369   :  { %v1072_v4 = vmul.f32 %v4210_v21, %v1018_v49  ;;  %v1020_v30 = vpop.f32.mrb[22].mxu1  ;;  %v4401_v8 = vsel %vm3838_vm10, %v1166_v11, 0.0  ;;  %v1152_v21 = vmax.f32 %v1120_v35, 0.0  ;;  %v4410_v42 = vsel %vm3838_vm10, %v1142_v43, 0.0 }
 0x36a   :  { %v1127_v15 = vadd.f32 %v4227_v2, %v1071_v53  ;;  %v1079_v22 = vmul.f32 %v4215_v6, %v1020_v30  ;;  %v1022_v44 = vpop.f32.mrb[23].mxu1  ;;  %v4414_v60 = vsel %vm3838_vm10, %v1158_v52, 0.0  ;;  %v4423_v45 = vsel %vm3857_vm11, %v1143_v39, 0.0 }
 0x36b   :  { %v1128_v10 = vadd.f32 %v4227_v2, %v1072_v4  ;;  %v1080_v3 = vmul.f32 %v4215_v6, %v1022_v44  ;;  %3317 = vrot.lane.b32.xlu0 %v3316_v0, %s3565_s14  ;;  %v3331_v2 = vpack.i.bf16 %v4397_v29, %v4410_v42  ;;  %v3336_v6 = vpack.i.bf16 %v4401_v8, %v4414_v60 }
 0x36c   :  { %v1135_v25 = vadd.f32 %v4238_v48, %v1079_v22  ;;  %3327 = vrot.lane.b32.xlu1 %v3326_v7, %s3565_s14  ;;  %v1159_v63 = vmax.f32 %v1127_v15, 0.0  ;;  %v4427_v43 = vsel %vm3909_vm12, %v1144_v13, 0.0  ;;  %v4431_v19 = vsel %vm3857_vm11, %v1151_v33, 0.0 }
 0x36d   :  { %v1136_v14 = vadd.f32 %v4238_v48, %v1080_v3  ;;  %v1160_v48 = vmax.f32 %v1128_v10, 0.0  ;;  %v4435_v16 = vsel %vm3909_vm12, %v1152_v21, 0.0  ;;  %v3341_v31 = vpack.i.bf16 %v4427_v43, %v4423_v45 }
 0x36e   :  { %v1167_v41 = vmax.f32 %v1135_v25, 0.0  ;;  %v3346_v59 = vpack.i.bf16 %v4435_v16, %v4431_v19  ;;  %v4445_v11 = vsel %vm3857_vm11, %v1159_v63, 0.0  ;;  %vm1618_vm7 = vcmask 1014784  }
 0x36f   :  { %v1168_v56 = vmax.f32 %v1136_v14, 0.0  ;;  %3332 = vrot.lane.b32.xlu0 %v3331_v2, %s3565_s14  ;;  %v4449_v36 = vsel %vm3909_vm12, %v1160_v48, 0.0  ;;  %vm1759_vm8 = vcmask 785408   ;;  %vm5036_vm9 = vmpackc.low %vm1618_vm7, %vm1618_vm7  ;;  %vm2608_vm10 = vcmask 523264  }
 0x370   :  { %3337 = vrot.lane.b32.xlu1 %v3336_v6, %s3565_s14  ;;  %v4453_v27 = vsel %vm3857_vm11, %v1167_v41, 0.0  ;;  %v3351_v39 = vpack.i.bf16 %v4449_v36, %v4445_v11  ;;  %vm2705_vm11 = vcmask 916480  }
 0x371   :  { %v4457_v52 = vsel %vm3909_vm12, %v1168_v56, 0.0  ;;  %vm2754_vm12 = vcmask 982016  }
 0x372   :  { %v3356_v35 = vpack.i.bf16 %v4457_v52, %v4453_v27 }
 0x373   :  { %3342 = vrot.lane.b32.xlu0 %v3341_v31, %s3565_s14 }
 0x374   :  { %3347 = vrot.lane.b32.xlu1 %v3346_v59, %s3565_s14 }
 0x377   :  { %3352 = vrot.lane.b32.xlu0 %v3351_v39, %s3565_s14 }
 0x378   :  { %3357 = vrot.lane.b32.xlu1 %v3356_v35, %s3565_s14 }
 0x3c2   :  { %v3283_v12 = vpop.permute.xlu0 %3282 }
 0x3c3   :  { %v3285_v58 = vunpack.i.h.bf16 %v3283_v12  ;;  %v3284_v13 = vunpack.i.l.bf16 %v3283_v12 }
 0x3c5   :  { %v1297_v53 = vsel %vm735_vm1, %v3284_v13, %v3285_v58 }
 0x3c6   :  { %v4471_v7 = vmax.f32 %v4220_v17, %v1297_v53 }
 0x3cc   :  { %v3288_v50 = vpop.permute.xlu1 %3287 }
 0x3cd   :  { %v3290_v49 = vunpack.i.h.bf16 %v3288_v50  ;;  %v3289_v33 = vunpack.i.l.bf16 %v3288_v50 }
 0x3cf   :  { %v1298_v4 = vsel %vm735_vm1, %v3285_v58, %v3289_v33  ;;  %v1299_v30 = vsel %vm735_vm1, %v3289_v33, %v3290_v49 }
 0x3d0   :  { %v3293_v0 = vpop.permute.xlu1 %3292  ;;  %v4474_v15 = vmax.f32 %v4225_v62, %v1298_v4  ;;  %v4481_v3 = vmax.f32 %v4259_v18, %v1299_v30 }
 0x3d1   :  { %v3295_v22 = vunpack.i.h.bf16 %v3293_v0  ;;  %v3294_v44 = vunpack.i.l.bf16 %v3293_v0  ;;  %v4476_v21 = vpop.permute.xlu0 %3302 }
 0x3d2   :  { %v3361_v10 = vpack.i.bf16 %v4474_v15, %v4471_v7  ;;  %v3305_v14 = vunpack.i.h.bf16 %v4476_v21  ;;  %v3304_v17 = vunpack.i.l.bf16 %v4476_v21  ;;  %v3366_v56 = vpack.i.bf16 %v4481_v3, %v4474_v15 }
 0x3d3   :  { %v1305_v25 = vsel %vm735_vm1, %v3294_v44, %v3295_v22 }
 0x3d4   :  { %v3298_v2 = vpop.permute.xlu1 %3297  ;;  %3362 = vrot.lane.b32.xlu0 %v3361_v10, %s3566_s4  ;;  %v4488_v62 = vmax.f32 %v4285_v55, %v1305_v25  ;;  %v1304_v6 = vsel %vm735_vm1, %v3305_v14, %v3294_v44  ;;  %v1300_v63 = vsel %vm735_vm1, %v3290_v49, %v3304_v17 }
 0x3d5   :  { %v3300_v48 = vunpack.i.h.bf16 %v3298_v2  ;;  %v3299_v18 = vunpack.i.l.bf16 %v3298_v2  ;;  %v3308_v41 = vpop.permute.xlu0 %3307  ;;  %v4495_v31 = vmax.f32 %v4266_v51, %v1300_v63  ;;  %v4498_v59 = vmax.f32 %v4254_v40, %v1304_v6 }
 0x3d6   :  { %v1708_v55 = vpack.c.bf16 %v4488_v62, %v4474_v15  ;;  %v3309_v35 = vunpack.i.l.bf16 %v3308_v41  ;;  %v3310_v30 = vunpack.i.h.bf16 %v3308_v41 }
 0x3d7   :  { %v1311_v39 = vsel %vm735_vm1, %v3299_v18, %v3300_v48  ;;  %v3381_v12 = vpack.i.bf16 %v4495_v31, %v4481_v3  ;;  %v1707_v51 = vpack.c.bf16 %v4498_v59, %v4471_v7  ;;  %v3371_v50 = vpack.i.bf16 %v4488_v62, %v4498_v59 }
 0x3d8   :  { %3367 = vrot.lane.b32.xlu0 %v3366_v56, %s3567_s3  ;;  %v1312_v58 = vsel %vm735_vm1, %v3300_v48, %v3309_v35  ;;  %v4513_v53 = vmax.f32 %v4270_v24, %v1311_v39  ;;  %v1313_v48 = vsel %vm735_vm1, %v3309_v35, %v3310_v30 }
 0x3d9   :  { %v3313_v13 = vpop.permute.xlu0 %3312  ;;  %3382 = vrot.lane.b32.xlu1 %v3381_v12, %s3566_s4  ;;  %v4516_v49 = vmax.f32 %v4274_v57, %v1312_v58 }
 0x3da   :  { %v3323_v40 = vpop.permute.xlu1 %3322  ;;  %v3315_v33 = vunpack.i.h.bf16 %v3313_v13  ;;  %v3314_v4 = vunpack.i.l.bf16 %v3313_v13 }
 0x3db   :  { %v3324_v44 = vunpack.i.l.bf16 %v3323_v40  ;;  %v3376_v25 = vpack.i.bf16 %v4516_v49, %v4513_v53  ;;  %v3325_v57 = vunpack.i.h.bf16 %v3323_v40 }
 0x3dc   :  { %3372 = vrot.lane.b32.xlu0 %v3371_v50, %s3566_s4  ;;  %v1307_v0 = vsel %vm735_vm1, %v3314_v4, %v3315_v33  ;;  %v1306_v24 = vsel %vm735_vm1, %v3295_v22, %v3314_v4 }
 0x3dd   :  { %v3318_v21 = vpop.permute.xlu0 %3317  ;;  %v4523_v14 = vmax.f32 %v4356_v26, %v1307_v0  ;;  %v1314_v18 = vsel %vm735_vm1, %v3310_v30, %v3324_v44  ;;  %v4540_v13 = vmax.f32 %v4289_v61, %v1306_v24  ;;  %v3421_v61 = vpack.i.bf16 %v4498_v59, %v4471_v7 }
 0x3de   :  { %v3328_v10 = vpop.permute.xlu1 %3327  ;;  %v3320_v2 = vunpack.i.h.bf16 %v3318_v21  ;;  %v3319_v6 = vunpack.i.l.bf16 %v3318_v21  ;;  %v4556_v24 = vmax.f32 %v4328_v9, %v1314_v18 }
 0x3df   :  { %v1710_v63 = vpack.c.bf16 %v4523_v14, %v4495_v31  ;;  %v3330_v26 = vunpack.i.h.bf16 %v3328_v10  ;;  %v3329_v40 = vunpack.i.l.bf16 %v3328_v10  ;;  %v4553_v10 = vmax.f32 %v4322_v46, %v1313_v48 }
 0x3e0   :  { %3377 = vrot.lane.b32.xlu0 %v3376_v25, %s3566_s4  ;;  %v1318_v41 = vsel %vm735_vm1, %v3325_v57, %v3319_v6  ;;  %v1319_v56 = vsel %vm735_vm1, %v3319_v6, %v3320_v2 }
 0x3e1   :  { %v3333_v39 = vpop.permute.xlu0 %3332  ;;  %v4534_v22 = vmax.f32 %v4305_v54, %v1318_v41  ;;  %v4537_v58 = vmax.f32 %v4382_v28, %v1319_v56  ;;  %v3391_v41 = vpack.i.bf16 %v4540_v13, %v4488_v62 }
 0x3e2   :  { %v3338_v12 = vpop.permute.xlu1 %3337  ;;  %v3334_v35 = vunpack.i.l.bf16 %v3333_v39  ;;  %v3335_v0 = vunpack.i.h.bf16 %v3333_v39 }
 0x3e3   :  { %v3340_v50 = vunpack.i.h.bf16 %v3338_v12  ;;  %v3339_v4 = vunpack.i.l.bf16 %v3338_v12  ;;  %v3386_v30 = vpack.i.bf16 %v4537_v58, %v4534_v22 }
 0x3e4   :  { %v1301_v21 = vsel %vm735_vm1, %v3304_v17, %v3334_v35  ;;  %v1320_v17 = vsel %vm735_vm1, %v3320_v2, %v3329_v40  ;;  %v1308_v9 = vsel %vm735_vm1, %v3315_v33, %v3335_v0  ;;  %v3401_v2 = vpack.i.bf16 %v4523_v14, %v4540_v13 }
 0x3e5   :  { %v1315_v25 = vsel %vm735_vm1, %v3324_v44, %v3339_v4  ;;  %v3343_v54 = vpop.permute.xlu0 %3342  ;;  %3387 = vrot.lane.b32.xlu0 %v3386_v30, %s3566_s4  ;;  %v4548_v57 = vmax.f32 %v4311_v37, %v1301_v21  ;;  %v1321_v44 = vsel %vm735_vm1, %v3329_v40, %v3330_v26  ;;  %v1322_v6 = vsel %vm735_vm1, %v3330_v26, %v3340_v50 }
 0x3e6   :  { %v3348_v28 = vpop.permute.xlu1 %3347  ;;  %v3345_v37 = vunpack.i.h.bf16 %v3343_v54  ;;  %v4566_v46 = vmax.f32 %v4360_v20, %v1315_v25  ;;  %v3344_v48 = vunpack.i.l.bf16 %v3343_v54  ;;  %v3406_v40 = vpack.i.bf16 %v4556_v24, %v4553_v10 }
 0x3e7   :  { %v3350_v56 = vunpack.i.h.bf16 %v3348_v28  ;;  %v3396_v39 = vpack.i.bf16 %v4548_v57, %v4495_v31  ;;  %v3349_v18 = vunpack.i.l.bf16 %v3348_v28  ;;  %v4575_v30 = vmax.f32 %v4368_v47, %v1320_v17 }
 0x3e8   :  { %v4578_v20 = vmax.f32 %v4386_v32, %v1321_v44  ;;  %v4581_v33 = vmax.f32 %v4373_v34, %v1322_v6  ;;  %v3431_v47 = vpack.i.bf16 %v4566_v46, %v4556_v24  ;;  %v4589_v17 = vmax.f32 %v4348_v38, %v1308_v9 }
 0x3e9   :  { %v3353_v12 = vpop.permute.xlu0 %3352  ;;  %3392 = vrot.lane.b32.xlu0 %v3391_v41, %s3567_s3  ;;  %3397 = vrot.lane.b32.xlu1 %v3396_v39, %s3567_s3  ;;  %v1357_v41 = vsel %vm735_vm1, %v3345_v37, 0.0  ;;  %v1358_v5 = vsel %vm735_vm1, %v3350_v56, 0.0  ;;  %v1302_v32 = vsel %vm735_vm1, %v3334_v35, %v3344_v48  ;;  %v1303_v34 = vsel %vm735_vm1, %v3344_v48, %v3345_v37 }
 0x3ea   :  { %v3358_v26 = vpop.permute.xlu1 %3357  ;;  %v3355_v21 = vunpack.i.h.bf16 %v3353_v12  ;;  %v3354_v25 = vunpack.i.l.bf16 %v3353_v12  ;;  %v1309_v44 = vsel %vm735_vm1, %v3335_v0, %v3349_v18  ;;  %v1310_v6 = vsel %vm735_vm1, %v3349_v18, %v3350_v56 }
 0x3eb   :  { %v3360_v54 = vunpack.i.h.bf16 %v3358_v26  ;;  %v3359_v28 = vunpack.i.l.bf16 %v3358_v26  ;;  %v4601_v38 = vmax.f32 %v4427_v43, %v1357_v41  ;;  %v4604_v35 = vmax.f32 %v4435_v16, %v1358_v5 }
 0x3ec   :  { %v1359_v39 = vsel %vm735_vm1, %v3355_v21, 0.0  ;;  %v1316_v12 = vsel %vm735_vm1, %v3339_v4, %v3354_v25  ;;  %v1317_v0 = vsel %vm735_vm1, %v3354_v25, %v3355_v21  ;;  %v4610_v4 = vmax.f32 %v4410_v42, %v1302_v32 }
 0x3ed   :  { %v1360_v26 = vsel %vm735_vm1, %v3360_v54, 0.0  ;;  %v1323_v23 = vsel %vm735_vm1, %v3340_v50, %v3359_v28  ;;  %3422 = vrot.lane.b32.xlu0 %v3421_v61, %s3567_s3  ;;  %v1324_v37 = vsel %vm735_vm1, %v3359_v28, %v3360_v54  ;;  %3402 = vrot.lane.b32.xlu1 %v3401_v2, %s3566_s4  ;;  %v4613_v56 = vmax.f32 %v4397_v29, %v1309_v44 }
 0x3ee   :  { %v4616_v50 = vmax.f32 %v4423_v45, %v1303_v34  ;;  %v4619_v43 = vmax.f32 %v4431_v19, %v1310_v6  ;;  %v4622_v5 = vmax.f32 %v4449_v36, %v1359_v39  ;;  %v4625_v16 = vmax.f32 %v4457_v52, %v1360_v26 }
 0x3ef   :  { %v4628_v61 = vmax.f32 %v4414_v60, %v1316_v12  ;;  %v4631_v42 = vmax.f32 %v4401_v8, %v1323_v23  ;;  %v4635_v29 = vmax.f32 %v4445_v11, %v1317_v0  ;;  %v4638_v45 = vmax.f32 %v4453_v27, %v1324_v37 }
 0x3f0   :  { %v1716_v19 = vpack.c.bf16 %v4537_v58, %v4516_v49  ;;  %v1715_v36 = vpack.c.bf16 %v4534_v22, %v4513_v53  ;;  %v3411_v23 = vpack.i.bf16 %v4578_v20, %v4575_v30  ;;  %v3446_v8 = vpack.i.bf16 %v4581_v33, %v4578_v20 }
 0x3f1   :  { %3432 = vrot.lane.b32.xlu0 %v3431_v47, %s3567_s3  ;;  %3407 = vrot.lane.b32.xlu1 %v3406_v40, %s3566_s4  ;;  %v1709_v60 = vpack.c.bf16 %v4540_v13, %v4481_v3  ;;  %v1718_v11 = vpack.c.bf16 %v4578_v20, %v4556_v24  ;;  %v1717_v27 = vpack.c.bf16 %v4575_v30, %v4553_v10 }
 0x3f2   :  { %v1712_v52 = vpack.c.bf16 %v4613_v56, %v4610_v4  ;;  %v1711_v9 = vpack.c.bf16 %v4589_v17, %v4548_v57  ;;  %v3451_v54 = vpack.i.bf16 %v4610_v4, %v4548_v57  ;;  %v3416_v28 = vpack.i.bf16 %v4589_v17, %v4523_v14 }
 0x3f3   :  { %v3461_v41 = vpack.i.bf16 %v4613_v56, %v4589_v17  ;;  %v3426_v47 = vpack.i.bf16 %v4553_v10, %v4516_v49  ;;  %v3471_v32 = vpack.i.bf16 %v4628_v61, %v4566_v46  ;;  %v3436_v34 = vpack.i.bf16 %v4575_v30, %v4537_v58 }
 0x3f4   :  { %v3481_v44 = vpack.i.bf16 %v4631_v42, %v4581_v33  ;;  %v3441_v6 = vpack.i.bf16 %v4534_v22, %v4513_v53  ;;  %v3491_v39 = vpack.i.bf16 %v4616_v50, %v4610_v4  ;;  %v3456_v12 = vpack.i.bf16 %v4601_v38, %v4616_v50 }
 0x3f5   :  { %3447 = vrot.lane.b32.xlu0 %v3446_v8, %s3567_s3  ;;  %3412 = vrot.lane.b32.xlu1 %v3411_v23, %s3566_s4  ;;  %v3501_v26 = vpack.i.bf16 %v4604_v35, %v4601_v38  ;;  %v3466_v0 = vpack.i.bf16 %v4604_v35, %v4619_v43  ;;  %v3511_v37 = vpack.i.bf16 %v4638_v45, %v4631_v42  ;;  %v2064_v8 = vld [vmem:[%s5651_s8] sm:$0xff] }
 0x3f6   :  { %v3476_v23 = vpack.i.bf16 %v4622_v5, %v4635_v29 }
 0x3f9   :  { %3452 = vrot.lane.b32.xlu0 %v3451_v54, %s3566_s4  ;;  %3417 = vrot.lane.b32.xlu1 %v3416_v28, %s3567_s3  ;;  %v3486_v54 = vpack.i.bf16 %v4625_v16, %v4638_v45  ;;  %v2066_v28 = vld [vmem:[%s5651_s8 + $0x10] sm:$0xff] }
 0x3fd   :  { %3462 = vrot.lane.b32.xlu0 %v3461_v41, %s3566_s4  ;;  %3427 = vrot.lane.b32.xlu1 %v3426_v47, %s3567_s3  ;;  %v3496_v41 = vpack.i.bf16 %v4619_v43, %v4613_v56  ;;  %v2177_v47 = vld [vmem:[%s5652_s9 + $0x8] sm:$0xff] }
 0x401   :  { %3472 = vrot.lane.b32.xlu0 %v3471_v32, %s3566_s4  ;;  %3437 = vrot.lane.b32.xlu1 %v3436_v34, %s3567_s3  ;;  %v3506_v32 = vpack.i.bf16 %v4635_v29, %v4628_v61  ;;  %v2178_v34 = vld [vmem:[%s5652_s9 + $0x10] sm:$0xff] }
 0x405   :  { %3482 = vrot.lane.b32.xlu0 %v3481_v44, %s3566_s4  ;;  %3442 = vrot.lane.b32.xlu1 %v3441_v6, %s3567_s3  ;;  %v3516_v44 = vpack.i.bf16 %v4625_v16, %v4622_v5  ;;  %v2179_v6 = vld [vmem:[%s5652_s9 + $0x18] sm:$0xff] }
 0x409   :  { %3492 = vrot.lane.b32.xlu0 %v3491_v39, %s3567_s3  ;;  %3457 = vrot.lane.b32.xlu1 %v3456_v12, %s3566_s4  ;;  %v2065_v39 = vld [vmem:[%s5651_s8 + $0x8] sm:$0xff]  ;;  %v2180_v12 = vld [vmem:[%s5652_s9 + $0x20] sm:$0xff] }
 0x40d   :  { %3502 = vrot.lane.b32.xlu0 %v3501_v26, %s3567_s3  ;;  %3467 = vrot.lane.b32.xlu1 %v3466_v0, %s3566_s4  ;;  %v2176_v26 = vld [vmem:[%s5652_s9] sm:$0xff]  ;;  %v2181_v0 = vld [vmem:[%s5652_s9 + $0x28] sm:$0xff] }
 0x411   :  { %3512 = vrot.lane.b32.xlu0 %v3511_v37, %s3567_s3  ;;  %3477 = vrot.lane.b32.xlu1 %v3476_v23, %s3566_s4  ;;  %v2067_v37 = vld [vmem:[%s5651_s8 + $0x18] sm:$0xff]  ;;  %v2182_v23 = vld [vmem:[%s5652_s9 + $0x30] sm:$0xff] }
 0x415   :  { %2074 = vperm.xlu0 %3160, %v2064_v8   ;;  %3487 = vrot.lane.b32.xlu1 %v3486_v54, %s3566_s4  ;;  %v2068_v8 = vld [vmem:[%s5651_s8 + $0x20] sm:$0xff]  ;;  %v2069_v54 = vld [vmem:[%s5651_s8 + $0x28] sm:$0xff] }
 0x419   :  { %2084 = vperm.xlu0 %3160, %v2066_v28   ;;  %3497 = vrot.lane.b32.xlu1 %v3496_v41, %s3567_s3  ;;  %v2070_v28 = vld [vmem:[%s5651_s8 + $0x30] sm:$0xff]  ;;  %v2071_v41 = vld [vmem:[%s5651_s8 + $0x38] sm:$0xff] }
 0x41d   :  { %2191 = vperm.xlu0 %3160, %v2177_v47   ;;  %3507 = vrot.lane.b32.xlu1 %v3506_v32, %s3567_s3  ;;  %v2183_v47 = vld [vmem:[%s5652_s9 + $0x38] sm:$0xff] }
 0x421   :  { %2196 = vperm.xlu0 %3160, %v2178_v34   ;;  %3517 = vrot.lane.b32.xlu1 %v3516_v44, %s3567_s3 }
 0x425   :  { %2201 = vperm.xlu0 %3160, %v2179_v6   ;;  %2079 = vperm.xlu1 %3159, %v2065_v39  }
 0x429   :  { %2206 = vperm.xlu0 %3160, %v2180_v12   ;;  %2186 = vperm.xlu1 %3159, %v2176_v26  }
 0x42d   :  { %2211 = vperm.xlu0 %3160, %v2181_v0   ;;  %2089 = vperm.xlu1 %3159, %v2067_v37  }
 0x431   :  { %2216 = vperm.xlu0 %3160, %v2182_v23   ;;  %2094 = vperm.xlu1 %3159, %v2068_v8  }
 0x435   :  { %2099 = vperm.xlu1 %3159, %v2069_v54  }
 0x439   :  { %2104 = vperm.xlu1 %3159, %v2070_v28  }
 0x43d   :  { %2109 = vperm.xlu1 %3159, %v2071_v41  }
 0x441   :  { %2221 = vperm.xlu1 %3159, %v2183_v47  }
 0x446   :  { %v3363_v32 = vpop.permute.xlu0 %3362 }
 0x447   :  { %v3365_v44 = vunpack.i.h.bf16 %v3363_v32  ;;  %v3364_v6 = vunpack.i.l.bf16 %v3363_v32 }
 0x449   :  { %v1490_v37 = vsel %vm1489_vm4, %v3364_v6, %v3365_v44 }
 0x44a   :  { %v4775_v34 = vpop.permute.xlu0 %3367 }
 0x44e   :  { %v3373_v39 = vpop.permute.xlu0 %3372 }
 0x44f   :  { %v3375_v12 = vunpack.i.h.bf16 %v3373_v39  ;;  %v3374_v26 = vunpack.i.l.bf16 %v3373_v39  ;;  %v4796_v39 = vpop.permute.xlu1 %3382 }
 0x450   :  { %v3384_v2 = vunpack.i.l.bf16 %v4796_v39 }
 0x451   :  { %v1497_v23 = vsel %vm1489_vm4, %v3374_v26, %v3375_v12  ;;  %v3082_v28 = vpack.c.bf16 %v3374_v26, %v3364_v6 }
 0x452   :  { %v4784_v8 = vpop.permute.xlu0 %3377  ;;  %v1692_v54 = vpack.c.bf16 %v1497_v23, %v1490_v37  ;;  %v1491_v62 = vsel %vm1489_vm4, %v3365_v44, %v3384_v2 }
 0x453   :  { %v3380_v41 = vunpack.i.h.bf16 %v4784_v8  ;;  %v3379_v47 = vunpack.i.l.bf16 %v4784_v8 }
 0x454   :  { %1772 = vmatprep.subr.bf16.mxu0 %v1692_v54 }
 0x455   :  { %3083 = vmatpush1.bf16.msk.msra.mxu0 %vm3081_vm6, %v3082_v28  ;;  %v1504_v25 = vsel %vm1489_vm4, %v3379_v47, %v3380_v41 }
 0x457   :  { %v3388_v32 = vpop.permute.xlu0 %3387 }
 0x458   :  { %v3390_v37 = vunpack.i.h.bf16 %v3388_v32  ;;  %v3389_v23 = vunpack.i.l.bf16 %v3388_v32  ;;  %v3385_v32 = vunpack.i.h.bf16 %v4796_v39 }
 0x45a   :  { %v1511_v6 = vsel %vm1489_vm4, %v3389_v23, %v3390_v37  ;;  %v3087_v21 = vpack.c.bf16 %v3389_v23, %v3379_v47  ;;  %v3369_v47 = vunpack.i.l.bf16 %v4775_v34  ;;  %v1492_v48 = vsel %vm1489_vm4, %v3384_v2, %v3385_v32 }
 0x45b   :  { %v4800_v26 = vpop.permute.xlu0 %3392  ;;  %v1700_v54 = vpack.c.bf16 %v1511_v6, %v1504_v25  ;;  %v4802_v40 = vpop.permute.xlu1 %3397  ;;  %v3370_v25 = vunpack.i.h.bf16 %v4775_v34 }
 0x45c   :  { %v3395_v28 = vunpack.i.h.bf16 %v4800_v26  ;;  %v3394_v8 = vunpack.i.l.bf16 %v4800_v26 }
 0x45d   :  { %1774 = vmatprep.subr.bf16.mxu0 %v1700_v54 }
 0x45e   :  { %3088 = vmatpush1.bf16.msk.msra.mxu0 %vm3081_vm6, %v3087_v21  ;;  %v1627_v15 = vsel %vm1618_vm7, %v3394_v8, %v3395_v28 }
 0x45f   :  { %v3423_v18 = vpop.permute.xlu0 %3422  ;;  %1776 = vmatprep.subr.bf16.mxu0 %v1708_v55  ;;  %v4818_v23 = vpop.permute.xlu1 %3402 }
 0x460   :  { %v3425_v6 = vunpack.i.h.bf16 %v3423_v18  ;;  %v3424_v0 = vunpack.i.l.bf16 %v3423_v18  ;;  %v3405_v21 = vunpack.i.h.bf16 %v4818_v23  ;;  %v3404_v54 = vunpack.i.l.bf16 %v4818_v23 }
 0x462   :  { %1777 = vmatpush1.bf16.msra.mxu0 %v1707_v51  ;;  %v1498_v55 = vsel %vm1489_vm4, %v3375_v12, %v3404_v54  ;;  %v1499_v7 = vsel %vm1489_vm4, %v3404_v54, %v3405_v21  ;;  %v1620_v12 = vsel %vm1618_vm7, %v3369_v47, %v3370_v25  ;;  %v1619_v49 = vsel %vm1618_vm7, %v3424_v0, %v3369_v47 }
 0x463   :  { %1778 = vmatprep.subr.bf16.mxu0 %v1716_v19  ;;  %v4833_v18 = vpop.permute.xlu0 %3432  ;;  %v4841_v59 = vpop.permute.xlu1 %3407  ;;  %v1694_v51 = vpack.c.bf16 %v1499_v7, %v1492_v48  ;;  %v1693_v44 = vpack.c.bf16 %v1498_v55, %v1491_v62  ;;  %v1626_v58 = vsel %vm1618_vm7, %v3425_v6, %v3394_v8  ;;  %v1724_v19 = vpack.c.bf16 %v1627_v15, %v1620_v12 }
 0x464   :  { %v3410_v2 = vunpack.i.h.bf16 %v4841_v59  ;;  %v3409_v54 = vunpack.i.l.bf16 %v4841_v59  ;;  %v1723_v62 = vpack.c.bf16 %v1626_v58, %v1619_v49  ;;  %v3400_v49 = vunpack.i.h.bf16 %v4802_v40 }
 0x465   :  { %1845 = vmatprep.subr.bf16.mxu1 %v1694_v51  ;;  %v3399_v58 = vunpack.i.l.bf16 %v4802_v40  ;;  %v3435_v14 = vunpack.i.h.bf16 %v4833_v18 }
 0x466   :  { %1779 = vmatpush1.bf16.msra.mxu0 %v1715_v36  ;;  %1846 = vmatpush1.bf16.msra.mxu1 %v1693_v44  ;;  %v1505_v6 = vsel %vm1489_vm4, %v3380_v41, %v3409_v54  ;;  %v1506_v36 = vsel %vm1489_vm4, %v3409_v54, %v3410_v2 }
 0x467   :  { %1780 = vmatprep.subr.bf16.mxu0 %v1724_v19  ;;  %v4853_v48 = vpop.permute.xlu0 %3447  ;;  %v4855_v55 = vpop.permute.xlu1 %3412  ;;  %v1622_v3 = vsel %vm1618_vm7, %v3399_v58, %v3400_v49 }
 0x468   :  { %v3415_v47 = vunpack.i.h.bf16 %v4855_v55  ;;  %v3414_v8 = vunpack.i.l.bf16 %v4855_v55  ;;  %v5659_v19 = vunpack.i.h.bf16 %v4853_v48  ;;  %v3449_v54 = vunpack.i.l.bf16 %v4853_v48 }
 0x46a   :  { %1781 = vmatpush1.bf16.msra.mxu0 %v1723_v62  ;;  %v1512_v53 = vsel %vm1489_vm4, %v3390_v37, %v3414_v8  ;;  %v1513_v0 = vsel %vm1489_vm4, %v3414_v8, %v3415_v47  ;;  %v1643_v13 = vsel %vm1618_vm7, %v3449_v54, %v5659_v19 }
 0x46b   :  { %v4861_v22 = vpop.permute.xlu0 %3452  ;;  %v1701_v15 = vpack.c.bf16 %v1512_v53, %v1505_v6  ;;  %v4869_v7 = vpop.permute.xlu1 %3417  ;;  %v1702_v51 = vpack.c.bf16 %v1513_v0, %v1506_v36 }
 0x46c   :  { %v5660_v44 = vunpack.i.h.bf16 %v4869_v7  ;;  %v3419_v41 = vunpack.i.l.bf16 %v4869_v7  ;;  %v3455_v20 = vunpack.i.h.bf16 %v4861_v22 }
 0x46d   :  { %1847 = vmatprep.subr.bf16.mxu1 %v1702_v51 }
 0x46e   :  { %1848 = vmatpush1.bf16.msra.mxu1 %v1701_v15  ;;  %v1629_v31 = vsel %vm1618_vm7, %v3419_v41, %v5660_v44 }
 0x46f   :  { %v4873_v37 = vpop.permute.xlu0 %3462  ;;  %v3428_v12 = vpop.permute.xlu1 %3427  ;;  %1849 = vmatprep.subr.bf16.mxu1 %v1710_v63  ;;  %v3434_v63 = vunpack.i.l.bf16 %v4833_v18  ;;  %v1726_v24 = vpack.c.bf16 %v1629_v31, %v1622_v3 }
 0x470   :  { %v3430_v62 = vunpack.i.h.bf16 %v3428_v12  ;;  %v3429_v8 = vunpack.i.l.bf16 %v3428_v12  ;;  %v3465_v15 = vunpack.i.h.bf16 %v4873_v37  ;;  %v3464_v51 = vunpack.i.l.bf16 %v4873_v37 }
 0x472   :  { %1850 = vmatpush1.bf16.msra.mxu1 %v1709_v60  ;;  %v1628_v60 = vsel %vm1618_vm7, %v3395_v28, %v3419_v41  ;;  %v1621_v28 = vsel %vm1618_vm7, %v3370_v25, %v3399_v58  ;;  %v1501_v34 = vsel %vm1489_vm4, %v3464_v51, %v3465_v15 }
 0x473   :  { %v4885_v6 = vpop.permute.xlu0 %3472  ;;  %v3438_v53 = vpop.permute.xlu1 %3437  ;;  %1851 = vmatprep.subr.bf16.mxu1 %v1718_v11  ;;  %v3454_v11 = vunpack.i.l.bf16 %v4861_v22  ;;  %v1636_v22 = vsel %vm1618_vm7, %v3434_v63, %v3435_v14  ;;  %v1725_v31 = vpack.c.bf16 %v1628_v60, %v1621_v28  ;;  %v1635_v60 = vsel %vm1618_vm7, %v3430_v62, %v3434_v63 }
 0x474   :  { %v3440_v36 = vunpack.i.h.bf16 %v3438_v53  ;;  %v3439_v0 = vunpack.i.l.bf16 %v3438_v53  ;;  %v1634_v53 = vsel %vm1618_vm7, %v3429_v8, %v3430_v62 }
 0x475   :  { %v1493_v23 = vsel %vm1489_vm4, %v3385_v32, %v3454_v11 }
 0x476   :  { %1852 = vmatpush1.bf16.msra.mxu1 %v1717_v27  ;;  %v1641_v26 = vsel %vm1618_vm7, %v3439_v0, %v3440_v36  ;;  %v1734_v27 = vpack.c.bf16 %v1643_v13, %v1636_v22  ;;  %v1642_v3 = vsel %vm1618_vm7, %v3440_v36, %v3449_v54  ;;  %v3475_v13 = vunpack.i.h.bf16 %v4885_v6 }
 0x477   :  { %v4911_v12 = vpop.permute.xlu0 %3482  ;;  %v3443_v41 = vpop.permute.xlu1 %3442  ;;  %1853 = vmatprep.subr.bf16.mxu1 %v1726_v24  ;;  %v1732_v37 = vpack.c.bf16 %v1641_v26, %v1634_v53  ;;  %v1494_v24 = vsel %vm1489_vm4, %v3454_v11, %v3455_v20  ;;  %v3474_v54 = vunpack.i.l.bf16 %v4885_v6  ;;  %v1500_v26 = vsel %vm1489_vm4, %v3405_v21, %v3464_v51 }
 0x478   :  { %v3445_v10 = vunpack.i.h.bf16 %v3443_v41  ;;  %v3444_v30 = vunpack.i.l.bf16 %v3443_v41  ;;  %v3485_v19 = vunpack.i.h.bf16 %v4911_v12  ;;  %v3484_v44 = vunpack.i.l.bf16 %v4911_v12 }
 0x479   :  { %1782 = vmatprep.subr.bf16.mxu0 %v1732_v37  ;;  %v1733_v28 = vpack.c.bf16 %v1642_v3, %v1635_v60  ;;  %v1695_v63 = vpack.c.bf16 %v1500_v26, %v1493_v23  ;;  %v1508_v37 = vsel %vm1489_vm4, %v3474_v54, %v3475_v13  ;;  %v1507_v32 = vsel %vm1489_vm4, %v3410_v2, %v3474_v54 }
 0x47a   :  { %v1633_v25 = vsel %vm1618_vm7, %v3444_v30, %v3429_v8  ;;  %v1640_v58 = vsel %vm1618_vm7, %v3445_v10, %v3439_v0  ;;  %1854 = vmatpush1.bf16.msra.mxu1 %v1725_v31  ;;  %v1696_v8 = vpack.c.bf16 %v1501_v34, %v1494_v24  ;;  %v4937_v0 = vld [vmem:[%s5650_s7] sm:$0xff]   ;;  %v1515_v62 = vsel %vm1489_vm4, %v3484_v44, %v3485_v19 }
 0x47b   :  { %v1731_v36 = vpack.c.bf16 %v1640_v58, %v1633_v25  ;;  %v3458_v53 = vpop.permute.xlu1 %3457  ;;  %1855 = vmatprep.subr.bf16.mxu1 %v1734_v27  ;;  %v4945_v21 = vpop.permute.xlu0 %3492  ;;  %v1514_v22 = vsel %vm1489_vm4, %v3415_v47, %v3484_v44  ;;  %v1704_v39 = vpack.c.bf16 %v1515_v62, %v1508_v37  ;;  %v5679_v30 = vmov 0  }
 0x47c   :  { %v3459_v41 = vunpack.i.l.bf16 %v3458_v53  ;;  %v3460_v6 = vunpack.i.h.bf16 %v3458_v53  ;;  %v1703_v27 = vpack.c.bf16 %v1514_v22, %v1507_v32  ;;  %v3494_v54 = vunpack.i.l.bf16 %v4945_v21 }
 0x47d   :  { %1783 = vmatpush1.bf16.msra.mxu0 %v1731_v36  ;;  %v3495_v4 = vunpack.i.h.bf16 %v4945_v21  ;;  %v5680_v53 = vpack.c.bf16 %v4631_v42, %v4628_v61  ;;  %v5681_v12 = vpack.c.bf16 %v4581_v33, %v4566_v46  ;;  %v5682_v62 = vunpack.i.h.bf16 %v4869_v7 }
 0x47e   :  { %1856 = vmatpush1.bf16.msra.mxu1 %v1733_v28  ;;  %1918 = vmatprep.subr.bf16.mxu0 %v1696_v8  ;;  %v1495_v11 = vsel %vm1489_vm4, %v3455_v20, %v3459_v41  ;;  %v1496_v47 = vsel %vm1489_vm4, %v3459_v41, %v3460_v6  ;;  %v4969_v20 = vld [vmem:[%s5650_s7 + $0x8] sm:$0xff]   ;;  %v1623_v61 = vsel %vm1618_vm7, %v3400_v49, %v3494_v54  ;;  %v5684_v22 = vunpack.i.h.bf16 %v4853_v48 }
 0x47f   :  { %v3468_v51 = vpop.permute.xlu1 %3467  ;;  %v4964_v2 = vpop.permute.xlu0 %3502  ;;  %v1624_v6 = vsel %vm1618_vm7, %v3494_v54, %v3495_v4  ;;  %v5683_v49 = vpack.c.bf16 %v4604_v35, %v4601_v38  ;;  %v5685_v35 = vpack.c.bf16 %v4619_v43, %v4616_v50  ;;  %v3527_v50 = vld [vmem:[%s5650_s7 + $0x18] sm:$0xff]  }
 0x480   :  { %v3470_v31 = vunpack.i.h.bf16 %v3468_v51  ;;  %v3469_v10 = vunpack.i.l.bf16 %v3468_v51  ;;  %3089 = vmatmul.mubr.msk.bf16.vlgmr.msra.gmra.mrb[24].mxu0 %vm1759_vm8, %v4937_v0  ;;  %v3505_v7 = vunpack.i.h.bf16 %v4964_v2  ;;  %v3504_v37 = vunpack.i.l.bf16 %v4964_v2 }
 0x481   :  { %3093 = vmatmul.mubr.msk.bf16.vlgmr.msra.gmra.mrb[24].mxu1 %vm1759_vm8, %v4937_v0  ;;  %1919 = vmatpush1.bf16.msra.mxu0 %v1695_v63 }
 0x482   :  { %v1502_v55 = vsel %vm1489_vm4, %v3465_v15, %v3469_v10  ;;  %1920 = vmatprep.subr.bf16.mxu0 %v1704_v39  ;;  %v1503_v44 = vsel %vm1489_vm4, %v3469_v10, %v3470_v31  ;;  %1814 = vmatprep.mubr.bf16.mxu0 %v5679_v30  ;;  %v3102_v43 = vpack.c.bf16 %v3505_v7, %v3504_v37 }
 0x483   :  { %v1697_v3 = vpack.c.bf16 %v1502_v55, %v1495_v11  ;;  %v3478_v59 = vpop.permute.xlu1 %3477  ;;  %v1698_v34 = vpack.c.bf16 %v1503_v44, %v1496_v47  ;;  %1887 = vmatprep.mubr.bf16.mxu1 %v5679_v30  ;;  %v3513_v56 = vpop.permute.xlu0 %3512  ;;  %v5686_v11 = vpack.c.bf16 %v4625_v16, %v4622_v5  ;;  %v5689_v47 = vpack.c.bf16 %v4638_v45, %v4635_v29 }
 0x484   :  { %v3479_v15 = vunpack.i.l.bf16 %v3478_v59  ;;  %v3480_v25 = vunpack.i.h.bf16 %v3478_v59  ;;  %v3514_v42 = vunpack.i.l.bf16 %v3513_v56  ;;  %v3515_v41 = vunpack.i.h.bf16 %v3513_v56 }
 0x485   :  { %1921 = vmatpush1.bf16.msra.mxu0 %v1703_v27  ;;  %1991 = vmatprep.subr.bf16.mxu1 %v1698_v34  ;;  %v1625_v44 = vsel %vm1618_vm7, %v3495_v4, %v3504_v37 }
 0x486   :  { %1922 = vmatprep.subr.bf16.mxu0 %v1712_v52  ;;  %1992 = vmatpush1.bf16.msra.mxu1 %v1697_v3  ;;  %v1509_v36 = vsel %vm1489_vm4, %v3475_v13, %v3479_v15  ;;  %v1510_v13 = vsel %vm1489_vm4, %v3479_v15, %v3480_v25  ;;  %v1644_v31 = vsel %vm1618_vm7, %v5684_v22, %v3514_v42 }
 0x487   :  { %v3488_v58 = vpop.permute.xlu1 %3487  ;;  %v1645_v39 = vsel %vm1618_vm7, %v3514_v42, %v3515_v41 }
 0x488   :  { %v3490_v24 = vunpack.i.h.bf16 %v3488_v58  ;;  %v3489_v60 = vunpack.i.l.bf16 %v3488_v58  ;;  %3090 = vmatmul.mubr.msk.bf16.gmra.mrb[28].mxu0 %vm1759_vm8, %v4969_v20 }
 0x489   :  { %3094 = vmatmul.mubr.msk.bf16.gmra.mrb[28].mxu1 %vm1759_vm8, %v4969_v20  ;;  %1923 = vmatpush1.bf16.msra.mxu0 %v1711_v9 }
 0x48a   :  { %v1516_v52 = vsel %vm1489_vm4, %v3485_v19, %v3489_v60  ;;  %1924 = vmatprep.subr.bf16.mxu0 %v5680_v53  ;;  %v1517_v26 = vsel %vm1489_vm4, %v3489_v60, %v3490_v24  ;;  %1824 = vmatprep.mubr.bf16.mxu0 %v5679_v30  ;;  %v4997_v19 = vld [vmem:[%s5650_s7 + $0x10] sm:$0xff]   ;;  %s3568_s7 = smov 64  }
 0x48b   :  { %v1705_v28 = vpack.c.bf16 %v1516_v52, %v1509_v36  ;;  %v3498_v57 = vpop.permute.xlu1 %3497  ;;  %v1706_v17 = vpack.c.bf16 %v1517_v26, %v1510_v13  ;;  %1897 = vmatprep.mubr.bf16.mxu1 %v5679_v30 }
 0x48c   :  { %v3500_v9 = vunpack.i.h.bf16 %v3498_v57  ;;  %v3499_v8 = vunpack.i.l.bf16 %v3498_v57 }
 0x48d   :  { %1925 = vmatpush1.bf16.msra.mxu0 %v5681_v12  ;;  %1993 = vmatprep.subr.bf16.mxu1 %v1706_v17 }
 0x48e   :  { %v1630_v23 = vsel %vm1618_vm7, %v5682_v62, %v3499_v8  ;;  %1994 = vmatpush1.bf16.msra.mxu1 %v1705_v28  ;;  %v1631_v21 = vsel %vm1618_vm7, %v3499_v8, %v3500_v9  ;;  %v2353_v62 = vld [vmem:[%s5653_s10 + $0x8] sm:$0xff] }
 0x48f   :  { %v1727_v63 = vpack.c.bf16 %v1630_v23, %v1623_v61  ;;  %v3508_v40 = vpop.permute.xlu1 %3507  ;;  %1995 = vmatprep.subr.bf16.mxu1 %v5683_v49  ;;  %v1728_v51 = vpack.c.bf16 %v1631_v21, %v1624_v6  ;;  %v2354_v23 = vld [vmem:[%s5653_s10 + $0x10] sm:$0xff] }
 0x490   :  { %v3510_v46 = vunpack.i.h.bf16 %v3508_v40  ;;  %v3509_v33 = vunpack.i.l.bf16 %v3508_v40  ;;  %3091 = vmatmul.mubr.msk.bf16.gmra.mrb[32].mxu0 %vm1759_vm8, %v4997_v19 }
 0x491   :  { %3095 = vmatmul.mubr.msk.bf16.gmra.mrb[32].mxu1 %vm1759_vm8, %v4997_v19  ;;  %1926 = vmatprep.subr.bf16.mxu0 %v1728_v51  ;;  %v2360_v51 = vld [vmem:[%s5653_s10 + $0x40] sm:$0xff] }
 0x492   :  { %v1637_v38 = vsel %vm1618_vm7, %v3435_v14, %v3509_v33  ;;  %1927 = vmatpush1.bf16.msra.mxu0 %v1727_v63  ;;  %1996 = vmatpush1.bf16.msra.mxu1 %v5685_v35  ;;  %v1638_v10 = vsel %vm1618_vm7, %v3509_v33, %v3510_v46  ;;  %v1632_v14 = vsel %vm1618_vm7, %v3500_v9, %v3505_v7  ;;  %v2352_v9 = vld [vmem:[%s5653_s10] sm:$0xff]  ;;  %v2361_v35 = vld [vmem:[%s5653_s10 + $0x48] sm:$0xff] }
 0x493   :  { %v1735_v48 = vpack.c.bf16 %v1644_v31, %v1637_v38  ;;  %v3518_v32 = vpop.permute.xlu1 %3517  ;;  %1997 = vmatprep.subr.bf16.mxu1 %v5686_v11  ;;  %v1736_v55 = vpack.c.bf16 %v1645_v39, %v1638_v10  ;;  %1834 = vmatprep.mubr.bf16.mxu0 %v5679_v30  ;;  %v1729_v27 = vpack.c.bf16 %v1632_v14, %v1625_v44  ;;  %v2362_v10 = vld [vmem:[%s5653_s10 + $0x50] sm:$0xff] }
 0x494   :  { %1907 = vmatprep.mubr.bf16.mxu1 %v5679_v30  ;;  %v3520_v5 = vunpack.i.h.bf16 %v3518_v32  ;;  %v3519_v16 = vunpack.i.l.bf16 %v3518_v32  ;;  %v5079_v45 = vpop.permute.xlu0 %2074 }
 0x495   :  { %1928 = vmatprep.subr.bf16.mxu0 %v1736_v55 }
 0x496   :  { %1929 = vmatpush1.bf16.msra.mxu0 %v1735_v48  ;;  %1998 = vmatpush1.bf16.msra.mxu1 %v5689_v47  ;;  %v1639_v3 = vsel %vm1618_vm7, %v3510_v46, %v3519_v16  ;;  %v1646_v59 = vsel %vm1618_vm7, %v3515_v41, %v3520_v5  ;;  %v3105_v34 = vpack.c.bf16 %v3520_v5, %v3519_v16  ;;  %v2355_v46 = vld [vmem:[%s5653_s10 + $0x18] sm:$0xff] }
 0x497   :  { %3103 = vmatprep.subr.msk.bf16.mxu1 %vm5036_vm9, %v3102_v43  ;;  %v1737_v29 = vpack.c.bf16 %v1646_v59, %v1639_v3 }
 0x498   :  { %3092 = vmatmul.mubr.msk.bf16.gmra.mrb[36].mxu0 %vm1759_vm8, %v3527_v50  ;;  %v5083_v2 = vpop.permute.xlu0 %2084 }
 0x499   :  { %3096 = vmatmul.mubr.msk.bf16.gmra.mrb[36].mxu1 %vm1759_vm8, %v3527_v50  ;;  %1950 = vmatprep.mubr.bf16.mxu0 %v5679_v30 }
 0x49a   :  { %2000 = vmatpush1.bf16.msra.mxu1 %v1729_v27  ;;  %2023 = vmatprep.mubr.bf16.mxu1 %v5679_v30 }
 0x49b   :  { %3106 = vmatprep.subr.msk.bf16.mxu1 %vm5036_vm9, %v3105_v34 }
 0x49c   :  { %v5087_v15 = vpop.permute.xlu0 %2191 }
 0x49e   :  { %2002 = vmatpush1.bf16.msra.mxu1 %v1737_v29 }
 0x4a0   :  { %3097 = vmatmul.mubr.msk.bf16.vlgmr.msra.gmra.mrb[40].mxu0 %vm1759_vm8, %v4937_v0  ;;  %v5091_v58 = vpop.permute.xlu0 %2196 }
 0x4a1   :  { %3107 = vmatmul.mubr.msk.bf16.vlgmr.msra.gmra.mrb[40].mxu1 %vm1759_vm8, %v4937_v0  ;;  %1960 = vmatprep.mubr.bf16.mxu0 %v5679_v30 }
 0x4a2   :  { %2033 = vmatprep.mubr.bf16.mxu1 %v5679_v30 }
 0x4a4   :  { %v5081_v0 = vpop.permute.xlu1 %2079  ;;  %v5125_v37 = vpop.permute.xlu0 %2201 }
 0x4a8   :  { %3098 = vmatmul.mubr.msk.bf16.gmra.mrb[44].mxu0 %vm1759_vm8, %v4969_v20 }
 0x4a9   :  { %3108 = vmatmul.mubr.msk.bf16.gmra.mrb[44].mxu1 %vm1759_vm8, %v4969_v20  ;;  %1970 = vmatprep.mubr.bf16.mxu0 %v5679_v30  ;;  %v5085_v20 = vpop.permute.xlu1 %2186 }
 0x4aa   :  { %2043 = vmatprep.mubr.bf16.mxu1 %v5679_v30 }
 0x4ad   :  { %v5089_v25 = vpop.permute.xlu1 %2089 }
 0x4b0   :  { %3099 = vmatmul.mubr.msk.bf16.gmra.mrb[48].mxu0 %vm1759_vm8, %v4997_v19 }
 0x4b1   :  { %3109 = vmatmul.mubr.msk.bf16.gmra.mrb[48].mxu1 %vm1759_vm8, %v4997_v19  ;;  %1980 = vmatprep.mubr.bf16.mxu0 %v5679_v30  ;;  %v5093_v24 = vpop.permute.xlu1 %2094 }
 0x4b2   :  { %2053 = vmatprep.mubr.bf16.mxu1 %v5679_v30 }
 0x4b5   :  { %v5134_v48 = vpop.permute.xlu1 %2099 }
 0x4b8   :  { %3100 = vmatmul.mubr.msk.bf16.gmra.mrb[52].mxu0 %vm1759_vm8, %v3527_v50 }
 0x4b9   :  { %3110 = vmatmul.mubr.msk.bf16.gmra.mrb[52].mxu1 %vm1759_vm8, %v3527_v50  ;;  %v2363_v50 = vld [vmem:[%s5653_s10 + $0x58] sm:$0xff] }
 0x553   :  { %v1806_v30 = vpop.f32.mrb[24].mxu0 }
 0x554   :  { %v2112_v60 = vmul.f32 %v5079_v45, %v1806_v30  ;;  %v1808_v54 = vpop.f32.mrb[25].mxu0  ;;  %v1879_v36 = vpop.f32.mrb[24].mxu1 }
 0x555   :  { %v2113_v4 = vmul.f32 %v5079_v45, %v1808_v54  ;;  %v2114_v56 = vmul.f32 %v5079_v45, %v1879_v36  ;;  %v1810_v52 = vpop.f32.mrb[26].mxu0  ;;  %v1881_v53 = vpop.f32.mrb[25].mxu1 }
 0x556   :  { %v2224_v13 = vadd.f32 %v5085_v20, %v2112_v60  ;;  %v2120_v26 = vmul.f32 %v5081_v0, %v1810_v52  ;;  %v2115_v28 = vmul.f32 %v5079_v45, %v1881_v53  ;;  %v1812_v57 = vpop.f32.mrb[27].mxu0  ;;  %v1883_v17 = vpop.f32.mrb[26].mxu1 }
 0x557   :  { %v2225_v8 = vadd.f32 %v5085_v20, %v2113_v4  ;;  %v2226_v19 = vadd.f32 %v5085_v20, %v2114_v56  ;;  %v2121_v61 = vmul.f32 %v5081_v0, %v1812_v57  ;;  %v2122_v42 = vmul.f32 %v5081_v0, %v1883_v17  ;;  %v1885_v12 = vpop.f32.mrb[27].mxu1 }
 0x558   :  { %v2288_v41 = vmax.f32 %v2224_v13, 0.0  ;;  %v2232_v6 = vadd.f32 %v5087_v15, %v2120_v26  ;;  %v2227_v21 = vadd.f32 %v5085_v20, %v2115_v28  ;;  %v2123_v63 = vmul.f32 %v5081_v0, %v1885_v12  ;;  %v2368_v28 = vld [vmem:[%s5653_s10 + $0x80] sm:$0xff] }
 0x559   :  { %v2289_v40 = vmax.f32 %v2225_v8, 0.0  ;;  %v2290_v49 = vmax.f32 %v2226_v19, 0.0  ;;  %v2233_v33 = vadd.f32 %v5087_v15, %v2121_v61  ;;  %v2234_v7 = vadd.f32 %v5087_v15, %v2122_v42  ;;  %v2369_v61 = vld [vmem:[%s5653_s10 + $0x88] sm:$0xff]  ;;  %v2370_v42 = vld [vmem:[%s5653_s10 + $0x90] sm:$0xff] }
 0x55a   :  { %v2416_v22 = vmul.f32 %v2352_v9, %v2288_v41  ;;  %v2296_v31 = vmax.f32 %v2232_v6, 0.0  ;;  %v2291_v38 = vmax.f32 %v2227_v21, 0.0  ;;  %v2235_v39 = vadd.f32 %v5087_v15, %v2123_v63  ;;  %v2376_v6 = vld [vmem:[%s5653_s10 + $0xc0] sm:$0xff] }
 0x55b   :  { %v2417_v32 = vmul.f32 %v2353_v62, %v2289_v40  ;;  %v2418_v11 = vmul.f32 %v2354_v23, %v2290_v49  ;;  %v2297_v55 = vmax.f32 %v2233_v33, 0.0  ;;  %v2298_v18 = vmax.f32 %v2234_v7, 0.0  ;;  %v1816_v43 = vpop.f32.mrb[28].mxu0  ;;  %v5162_v40 = vpop.permute.xlu0 %2206 }
 0x55c   :  { %v2424_v14 = vmul.f32 %v2360_v51, %v2296_v31  ;;  %v2419_v5 = vmul.f32 %v2355_v46, %v2291_v38  ;;  %v2299_v16 = vmax.f32 %v2235_v39, 0.0  ;;  %v2128_v47 = vmul.f32 %v5083_v2, %v1816_v43  ;;  %v1818_v44 = vpop.f32.mrb[29].mxu0  ;;  %v1889_v27 = vpop.f32.mrb[28].mxu1  ;;  %v2371_v38 = vld [vmem:[%s5653_s10 + $0x98] sm:$0xff] }
 0x55d   :  { %v2425_v3 = vmul.f32 %v2361_v35, %v2297_v55  ;;  %v2426_v59 = vmul.f32 %v2362_v10, %v2298_v18  ;;  %v2129_v34 = vmul.f32 %v5083_v2, %v1818_v44  ;;  %v2130_v29 = vmul.f32 %v5083_v2, %v1889_v27  ;;  %v1820_v30 = vpop.f32.mrb[30].mxu0  ;;  %v1891_v60 = vpop.f32.mrb[29].mxu1  ;;  %v2377_v18 = vld [vmem:[%s5653_s10 + $0xc8] sm:$0xff] }
 0x55e   :  { %v2480_v54 = vadd.f32 %v2424_v14, %v2416_v22  ;;  %v2427_v36 = vmul.f32 %v2363_v50, %v2299_v16  ;;  %v2240_v4 = vadd.f32 %v5091_v58, %v2128_v47  ;;  %v2136_v56 = vmul.f32 %v5089_v25, %v1820_v30  ;;  %v1822_v52 = vpop.f32.mrb[31].mxu0  ;;  %v1893_v53 = vpop.f32.mrb[30].mxu1  ;;  %v2378_v50 = vld [vmem:[%s5653_s10 + $0xd0] sm:$0xff] }
 0x55f   :  { %v2493_v13 = vadd.f32 %v2425_v3, %v2417_v32  ;;  %v2506_v26 = vadd.f32 %v2426_v59, %v2418_v11  ;;  %v2241_v57 = vadd.f32 %v5091_v58, %v2129_v34  ;;  %v2242_v17 = vadd.f32 %v5091_v58, %v2130_v29  ;;  %v1895_v9 = vpop.f32.mrb[31].mxu1  ;;  %v5166_v7 = vpop.permute.xlu1 %2104  ;;  %v2379_v3 = vld [vmem:[%s5653_s10 + $0xd8] sm:$0xff] }
 0x560   :  { %v2519_v8 = vadd.f32 %v2427_v36, %v2419_v5  ;;  %v2304_v19 = vmax.f32 %v2240_v4, 0.0  ;;  %v2248_v12 = vadd.f32 %v5125_v37, %v2136_v56  ;;  %v2131_v41 = vmul.f32 %v5083_v2, %v1891_v60 }
 0x561   :  { %v2305_v62 = vmax.f32 %v2241_v57, 0.0  ;;  %v2306_v23 = vmax.f32 %v2242_v17, 0.0  ;;  %v2137_v21 = vmul.f32 %v5089_v25, %v1822_v52  ;;  %v2138_v63 = vmul.f32 %v5089_v25, %v1893_v53 }
 0x562   :  { %v2432_v49 = vmul.f32 %v2368_v28, %v2304_v19  ;;  %v2312_v51 = vmax.f32 %v2248_v12, 0.0  ;;  %v2243_v46 = vadd.f32 %v5091_v58, %v2131_v41  ;;  %v2139_v33 = vmul.f32 %v5089_v25, %v1895_v9  ;;  %v5188_v19 = vpop.permute.xlu0 %2211  ;;  %v2384_v12 = vld [vmem:[%s5653_s10 + $0x100] sm:$0xff] }
 0x563   :  { %v2433_v22 = vmul.f32 %v2369_v61, %v2305_v62  ;;  %v2434_v31 = vmul.f32 %v2370_v42, %v2306_v23  ;;  %v2249_v35 = vadd.f32 %v5125_v37, %v2137_v21  ;;  %v2250_v10 = vadd.f32 %v5125_v37, %v2138_v63  ;;  %v1826_v39 = vpop.f32.mrb[32].mxu0  ;;  %v2386_v21 = vld [vmem:[%s5653_s10 + $0x110] sm:$0xff] }
 0x564   :  { %v2481_v32 = vadd.f32 %v2480_v54, %v2432_v49  ;;  %v2440_v11 = vmul.f32 %v2376_v6, %v2312_v51  ;;  %v2307_v55 = vmax.f32 %v2243_v46, 0.0  ;;  %v2251_v43 = vadd.f32 %v5125_v37, %v2139_v33  ;;  %v1828_v14 = vpop.f32.mrb[33].mxu0  ;;  %v1899_v5 = vpop.f32.mrb[32].mxu1 }
 0x565   :  { %v2494_v16 = vadd.f32 %v2493_v13, %v2433_v22  ;;  %v2507_v47 = vadd.f32 %v2506_v26, %v2434_v31  ;;  %v2313_v44 = vmax.f32 %v2249_v35, 0.0  ;;  %v2314_v27 = vmax.f32 %v2250_v10, 0.0  ;;  %v1830_v59 = vpop.f32.mrb[34].mxu0  ;;  %v1901_v34 = vpop.f32.mrb[33].mxu1  ;;  %v2392_v22 = vld [vmem:[%s5653_s10 + $0x140] sm:$0xff] }
 0x566   :  { %v2482_v29 = vadd.f32 %v2481_v32, %v2440_v11  ;;  %v2435_v30 = vmul.f32 %v2371_v38, %v2307_v55  ;;  %v2315_v60 = vmax.f32 %v2251_v43, 0.0  ;;  %v2144_v54 = vmul.f32 %v5093_v24, %v1826_v39  ;;  %v1832_v36 = vpop.f32.mrb[35].mxu0  ;;  %v1903_v4 = vpop.f32.mrb[34].mxu1 }
 0x567   :  { %v2441_v56 = vmul.f32 %v2377_v18, %v2313_v44  ;;  %v2442_v52 = vmul.f32 %v2378_v50, %v2314_v27  ;;  %v2145_v53 = vmul.f32 %v5093_v24, %v1828_v14  ;;  %v2146_v13 = vmul.f32 %v5093_v24, %v1899_v5  ;;  %v1905_v26 = vpop.f32.mrb[35].mxu1  ;;  %v5203_v51 = vpop.permute.xlu1 %2109  ;;  %v2387_v14 = vld [vmem:[%s5653_s10 + $0x118] sm:$0xff] }
 0x568   :  { %v2520_v28 = vadd.f32 %v2519_v8, %v2435_v30  ;;  %v2443_v57 = vmul.f32 %v2379_v3, %v2315_v60  ;;  %v2256_v17 = vadd.f32 %v5162_v40, %v2144_v54  ;;  %v2152_v9 = vmul.f32 %v5134_v48, %v1830_v59  ;;  %v2385_v8 = vld [vmem:[%s5653_s10 + $0x108] sm:$0xff]  ;;  %v2394_v30 = vld [vmem:[%s5653_s10 + $0x150] sm:$0xff] }
 0x569   :  { %v2495_v61 = vadd.f32 %v2494_v16, %v2441_v56  ;;  %v2508_v42 = vadd.f32 %v2507_v47, %v2442_v52  ;;  %v2257_v41 = vadd.f32 %v5162_v40, %v2145_v53  ;;  %v2258_v62 = vadd.f32 %v5162_v40, %v2146_v13 }
 0x56a   :  { %v2521_v23 = vadd.f32 %v2520_v28, %v2443_v57  ;;  %v2320_v6 = vmax.f32 %v2256_v17, 0.0  ;;  %v2264_v63 = vadd.f32 %v5188_v19, %v2152_v9  ;;  %v2147_v49 = vmul.f32 %v5093_v24, %v1901_v34  ;;  %v2393_v34 = vld [vmem:[%s5653_s10 + $0x148] sm:$0xff]  ;;  %v5228_v9 = vpop.permute.xlu0 %2216 }
 0x56b   :  { %v2321_v46 = vmax.f32 %v2257_v41, 0.0  ;;  %v2322_v33 = vmax.f32 %v2258_v62, 0.0  ;;  %v2153_v31 = vmul.f32 %v5134_v48, %v1832_v36  ;;  %v2154_v38 = vmul.f32 %v5134_v48, %v1903_v4  ;;  %v1836_v35 = vpop.f32.mrb[36].mxu0 }
 0x56c   :  { %v2448_v10 = vmul.f32 %v2384_v12, %v2320_v6  ;;  %v2328_v39 = vmax.f32 %v2264_v63, 0.0  ;;  %v2259_v32 = vadd.f32 %v5162_v40, %v2147_v49  ;;  %v2155_v11 = vmul.f32 %v5134_v48, %v1905_v26  ;;  %v1838_v55 = vpop.f32.mrb[37].mxu0  ;;  %v1909_v18 = vpop.f32.mrb[36].mxu1 }
 0x56d   :  { %v2449_v50 = vmul.f32 %v2385_v8, %v2321_v46  ;;  %v2450_v43 = vmul.f32 %v2386_v21, %v2322_v33  ;;  %v2265_v5 = vadd.f32 %v5188_v19, %v2153_v31  ;;  %v2266_v16 = vadd.f32 %v5188_v19, %v2154_v38  ;;  %v1840_v47 = vpop.f32.mrb[38].mxu0  ;;  %v1911_v44 = vpop.f32.mrb[37].mxu1  ;;  %v2400_v33 = vld [vmem:[%s5653_s10 + $0x180] sm:$0xff] }
 0x56e   :  { %v2483_v27 = vadd.f32 %v2482_v29, %v2448_v10  ;;  %v2456_v3 = vmul.f32 %v2392_v22, %v2328_v39  ;;  %v2323_v59 = vmax.f32 %v2259_v32, 0.0  ;;  %v2267_v60 = vadd.f32 %v5188_v19, %v2155_v11  ;;  %v1842_v54 = vpop.f32.mrb[39].mxu0  ;;  %v1913_v36 = vpop.f32.mrb[38].mxu1  ;;  %v2395_v29 = vld [vmem:[%s5653_s10 + $0x158] sm:$0xff]  ;;  %v2401_v10 = vld [vmem:[%s5653_s10 + $0x188] sm:$0xff]  ;;  %v2402_v39 = vld [vmem:[%s5653_s10 + $0x190] sm:$0xff] }
 0x56f   :  { %v2496_v4 = vadd.f32 %v2495_v61, %v2449_v50  ;;  %v2509_v56 = vadd.f32 %v2508_v42, %v2450_v43  ;;  %v2329_v52 = vmax.f32 %v2265_v5, 0.0  ;;  %v2330_v53 = vmax.f32 %v2266_v16, 0.0  ;;  %v1915_v13 = vpop.f32.mrb[39].mxu1  ;;  %v5234_v63 = vpop.permute.xlu1 %2221 }
 0x570   :  { %v2484_v26 = vadd.f32 %v2483_v27, %v2456_v3  ;;  %v2451_v28 = vmul.f32 %v2387_v14, %v2323_v59  ;;  %v2331_v57 = vmax.f32 %v2267_v60, 0.0  ;;  %v2160_v17 = vmul.f32 %v5166_v7, %v1836_v35  ;;  %v2408_v14 = vld [vmem:[%s5653_s10 + $0x1c0] sm:$0xff] }
 0x571   :  { %v2457_v12 = vmul.f32 %v2393_v34, %v2329_v52  ;;  %v2458_v41 = vmul.f32 %v2394_v30, %v2330_v53  ;;  %v2161_v62 = vmul.f32 %v5166_v7, %v1838_v55  ;;  %v2162_v61 = vmul.f32 %v5166_v7, %v1909_v18 }
 0x572   :  { %v2522_v42 = vadd.f32 %v2521_v23, %v2451_v28  ;;  %v2459_v6 = vmul.f32 %v2395_v29, %v2331_v57  ;;  %v2272_v8 = vadd.f32 %v5228_v9, %v2160_v17  ;;  %v2168_v21 = vmul.f32 %v5203_v51, %v1840_v47  ;;  %v2410_v17 = vld [vmem:[%s5653_s10 + $0x1d0] sm:$0xff] }
 0x573   :  { %v2497_v49 = vadd.f32 %v2496_v4, %v2457_v12  ;;  %v2510_v46 = vadd.f32 %v2509_v56, %v2458_v41  ;;  %v2273_v22 = vadd.f32 %v5228_v9, %v2161_v62  ;;  %v2274_v31 = vadd.f32 %v5228_v9, %v2162_v61  ;;  %v1952_v38 = vpop.f32.mrb[40].mxu0 }
 0x574   :  { %v2523_v35 = vadd.f32 %v2522_v42, %v2459_v6  ;;  %v2336_v23 = vmax.f32 %v2272_v8, 0.0  ;;  %v2280_v32 = vadd.f32 %v5234_v63, %v2168_v21  ;;  %v2163_v11 = vmul.f32 %v5166_v7, %v1911_v44  ;;  %v1954_v55 = vpop.f32.mrb[41].mxu0  ;;  %v2025_v18 = vpop.f32.mrb[40].mxu1 }
 0x575   :  { %v2337_v50 = vmax.f32 %v2273_v22, 0.0  ;;  %v2338_v43 = vmax.f32 %v2274_v31, 0.0  ;;  %v2169_v5 = vmul.f32 %v5203_v51, %v1842_v54  ;;  %v2170_v16 = vmul.f32 %v5203_v51, %v1913_v36  ;;  %v1956_v47 = vpop.f32.mrb[42].mxu0  ;;  %v5254_v27 = vpop.f32.mrb[41].mxu1  ;;  %v2403_v54 = vld [vmem:[%s5653_s10 + $0x198] sm:$0xff] }
 0x576   :  { %v2464_v3 = vmul.f32 %v2400_v33, %v2336_v23  ;;  %v2344_v59 = vmax.f32 %v2280_v32, 0.0  ;;  %v2275_v34 = vadd.f32 %v5228_v9, %v2163_v11  ;;  %v2171_v44 = vmul.f32 %v5203_v51, %v1915_v13  ;;  %v5258_v30 = vpop.f32.mrb[43].mxu0  ;;  %v5260_v60 = vpop.f32.mrb[42].mxu1  ;;  %v2409_v13 = vld [vmem:[%s5653_s10 + $0x1c8] sm:$0xff] }
 0x577   :  { %v2465_v4 = vmul.f32 %v2401_v10, %v2337_v50  ;;  %v2466_v56 = vmul.f32 %v2402_v39, %v2338_v43  ;;  %v2281_v36 = vadd.f32 %v5234_v63, %v2169_v5  ;;  %v2282_v52 = vadd.f32 %v5234_v63, %v2170_v16  ;;  %v5267_v53 = vpop.f32.mrb[43].mxu1 }
 0x578   :  { %v2485_v29 = vadd.f32 %v2484_v26, %v2464_v3  ;;  %v2472_v28 = vmul.f32 %v2408_v14, %v2344_v59  ;;  %v2339_v57 = vmax.f32 %v2275_v34, 0.0  ;;  %v2283_v12 = vadd.f32 %v5234_v63, %v2171_v44  ;;  %v2411_v26 = vld [vmem:[%s5653_s10 + $0x1d8] sm:$0xff]  ;;  %v2357_v44 = vld [vmem:[%s5653_s10 + $0x28] sm:$0xff] }
 0x579   :  { %v2498_v41 = vadd.f32 %v2497_v49, %v2465_v4  ;;  %v2511_v62 = vadd.f32 %v2510_v46, %v2466_v56  ;;  %v2345_v61 = vmax.f32 %v2281_v36, 0.0  ;;  %v2346_v42 = vmax.f32 %v2282_v52, 0.0  ;;  %v2358_v4 = vld [vmem:[%s5653_s10 + $0x30] sm:$0xff] }
 0x57a   :  { %v2486_v6 = vadd.f32 %v2485_v29, %v2472_v28  ;;  %v2467_v8 = vmul.f32 %v2403_v54, %v2339_v57  ;;  %v2347_v21 = vmax.f32 %v2283_v12, 0.0  ;;  %v2116_v33 = vmul.f32 %v5079_v45, %v1952_v38  ;;  %v2356_v38 = vld [vmem:[%s5653_s10 + $0x20] sm:$0xff] }
 0x57b   :  { %v2473_v22 = vmul.f32 %v2409_v13, %v2345_v61  ;;  %v2474_v31 = vmul.f32 %v2410_v17, %v2346_v42  ;;  %v2117_v23 = vmul.f32 %v5079_v45, %v1954_v55  ;;  %v2118_v10 = vmul.f32 %v5079_v45, %v2025_v18  ;;  %v1962_v39 = vpop.f32.mrb[44].mxu0 }
 0x57c   :  { %v2487_v49 = vrot.slane %v2486_v6, 4  ;;  %v2524_v46 = vadd.f32 %v2523_v35, %v2467_v8  ;;  %v2475_v32 = vmul.f32 %v2411_v26, %v2347_v21  ;;  %v2228_v11 = vadd.f32 %v5085_v20, %v2116_v33  ;;  %v1964_v50 = vpop.f32.mrb[45].mxu0  ;;  %v2035_v43 = vpop.f32.mrb[44].mxu1 }
 0x57d   :  { %v2499_v14 = vadd.f32 %v2498_v41, %v2473_v22  ;;  %v2512_v5 = vadd.f32 %v2511_v62, %v2474_v31  ;;  %v2229_v16 = vadd.f32 %v5085_v20, %v2117_v23  ;;  %v2230_v55 = vadd.f32 %v5085_v20, %v2118_v10  ;;  %v5288_v3 = vpop.f32.mrb[46].mxu0  ;;  %v5290_v18 = vpop.f32.mrb[45].mxu1 }
 0x57e   :  { %v5292_v35 = vadd.f32 %v2487_v49, %v2486_v6  ;;  %v2525_v59 = vadd.f32 %v2524_v46, %v2475_v32  ;;  %v2292_v34 = vmax.f32 %v2228_v11, 0.0  ;;  %v2124_v56 = vmul.f32 %v5081_v0, %v1956_v47  ;;  %v5301_v54 = vpop.f32.mrb[47].mxu0  ;;  %v5303_v36 = vpop.f32.mrb[46].mxu1  ;;  %v2364_v6 = vld [vmem:[%s5653_s10 + $0x60] sm:$0xff] }
 0x57f   :  { %v2500_v52 = vrot.slane %v2499_v14, 4  ;;  %v2513_v29 = vrot.slane %v2512_v5, 4  ;;  %v2293_v28 = vmax.f32 %v2229_v16, 0.0  ;;  %v2294_v57 = vmax.f32 %v2230_v55, 0.0  ;;  %v5305_v13 = vpop.f32.mrb[47].mxu1 }
 0x580   :  { %v2489_v17 = vrot.slane %v5292_v35, 2  ;;  %v2526_v12 = vrot.slane %v2525_v59, 4  ;;  %v2420_v41 = vmul.f32 %v2356_v38, %v2292_v34  ;;  %v2236_v62 = vadd.f32 %v5087_v15, %v2124_v56  ;;  %v2367_v56 = vld [vmem:[%s5653_s10 + $0x78] sm:$0xff] }
 0x581   :  { %v5309_v61 = vadd.f32 %v2500_v52, %v2499_v14  ;;  %v5311_v42 = vadd.f32 %v2513_v29, %v2512_v5  ;;  %v2421_v47 = vmul.f32 %v2357_v44, %v2293_v28  ;;  %v2422_v26 = vmul.f32 %v2358_v4, %v2294_v57  ;;  %v2366_v4 = vld [vmem:[%s5653_s10 + $0x70] sm:$0xff] }
 0x582   :  { %v5316_v8 = vadd.f32 %v2526_v12, %v2525_v59  ;;  %v2300_v21 = vmax.f32 %v2236_v62, 0.0  ;;  %v2119_v33 = vmul.f32 %v5079_v45, %v5254_v27  ;;  %v2125_v22 = vmul.f32 %v5081_v0, %v5258_v30 }
 0x583   :  { %v2502_v31 = vrot.slane %v5309_v61, 2  ;;  %v2515_v23 = vrot.slane %v5311_v42, 2  ;;  %v2126_v10 = vmul.f32 %v5081_v0, %v5260_v60  ;;  %v2127_v49 = vmul.f32 %v5081_v0, %v5267_v53  ;;  %v5328_v46 = vpop.f32.mrb[48].mxu0  ;;  %v2359_v60 = vld [vmem:[%s5653_s10 + $0x38] sm:$0xff]  ;;  %v2365_v0 = vld [vmem:[%s5653_s10 + $0x68] sm:$0xff] }
 0x584   :  { %v2528_v32 = vrot.slane %v5316_v8, 2  ;;  %v2428_v11 = vmul.f32 %v2364_v6, %v2300_v21  ;;  %v2231_v45 = vadd.f32 %v5085_v20, %v2119_v33  ;;  %v2237_v27 = vadd.f32 %v5087_v15, %v2125_v22  ;;  %v5333_v30 = vpop.f32.mrb[49].mxu0  ;;  %v5335_v14 = vpop.f32.mrb[48].mxu1  ;;  %v2372_v6 = vld [vmem:[%s5653_s10 + $0xa0] sm:$0xff] }
 0x585   :  { %v2238_v53 = vadd.f32 %v5087_v15, %v2126_v10  ;;  %v2239_v5 = vadd.f32 %v5087_v15, %v2127_v49  ;;  %v2132_v20 = vmul.f32 %v5083_v2, %v1962_v39  ;;  %v2133_v38 = vmul.f32 %v5083_v2, %v1964_v50  ;;  %v5347_v16 = vpop.f32.mrb[50].mxu0  ;;  %v5349_v55 = vpop.f32.mrb[49].mxu1 }
 0x586   :  { %v2532_v59 = vadd.f32 %v2428_v11, %v2420_v41  ;;  %v2295_v34 = vmax.f32 %v2231_v45, 0.0  ;;  %v2301_v44 = vmax.f32 %v2237_v27, 0.0  ;;  %v2134_v15 = vmul.f32 %v5083_v2, %v2035_v43  ;;  %v5358_v39 = vpop.f32.mrb[51].mxu0  ;;  %v5360_v50 = vpop.f32.mrb[50].mxu1  ;;  %v2373_v43 = vld [vmem:[%s5653_s10 + $0xa8] sm:$0xff]  ;;  %v2374_v45 = vld [vmem:[%s5653_s10 + $0xb0] sm:$0xff] }
 0x587   :  { %v2302_v52 = vmax.f32 %v2238_v53, 0.0  ;;  %v2303_v29 = vmax.f32 %v2239_v5, 0.0  ;;  %v2244_v28 = vadd.f32 %v5091_v58, %v2132_v20  ;;  %v2245_v57 = vadd.f32 %v5091_v58, %v2133_v38  ;;  %v5364_v12 = vpop.f32.mrb[51].mxu1 }
 0x588   :  { %v2423_v41 = vmul.f32 %v2359_v60, %v2295_v34  ;;  %v2429_v62 = vmul.f32 %v2365_v0, %v2301_v44  ;;  %v2246_v21 = vadd.f32 %v5091_v58, %v2134_v15  ;;  %v2140_v33 = vmul.f32 %v5089_v25, %v5288_v3  ;;  %v2380_v3 = vld [vmem:[%s5653_s10 + $0xe0] sm:$0xff] }
 0x589   :  { %v2430_v22 = vmul.f32 %v2366_v4, %v2302_v52  ;;  %v2431_v10 = vmul.f32 %v2367_v56, %v2303_v29  ;;  %v2308_v49 = vmax.f32 %v2244_v28, 0.0  ;;  %v2309_v11 = vmax.f32 %v2245_v57, 0.0  ;;  %v2375_v29 = vld [vmem:[%s5653_s10 + $0xb8] sm:$0xff] }
 0x58a   :  { %v2545_v27 = vadd.f32 %v2429_v62, %v2421_v47  ;;  %v2310_v60 = vmax.f32 %v2246_v21, 0.0  ;;  %v2252_v0 = vadd.f32 %v5125_v37, %v2140_v33  ;;  %v2135_v53 = vmul.f32 %v5083_v2, %v5290_v18 }
 0x58b   :  { %v2558_v5 = vadd.f32 %v2430_v22, %v2422_v26  ;;  %v2571_v20 = vadd.f32 %v2431_v10, %v2423_v41  ;;  %v2436_v38 = vmul.f32 %v2372_v6, %v2308_v49  ;;  %v2437_v34 = vmul.f32 %v2373_v43, %v2309_v11  ;;  %v5384_v44 = vpop.f32.mrb[52].mxu0 }
 0x58c   :  { %v2438_v4 = vmul.f32 %v2374_v45, %v2310_v60  ;;  %v2316_v56 = vmax.f32 %v2252_v0, 0.0  ;;  %v2247_v47 = vadd.f32 %v5091_v58, %v2135_v53  ;;  %v2141_v15 = vmul.f32 %v5089_v25, %v5301_v54  ;;  %v5389_v52 = vpop.f32.mrb[53].mxu0  ;;  %v5391_v2 = vpop.f32.mrb[52].mxu1 }
 0x58d   :  { %v2533_v18 = vadd.f32 %v2532_v59, %v2436_v38  ;;  %v2546_v26 = vadd.f32 %v2545_v27, %v2437_v34  ;;  %v2142_v28 = vmul.f32 %v5089_v25, %v5303_v36  ;;  %v2143_v57 = vmul.f32 %v5089_v25, %v5305_v13  ;;  %v5400_v58 = vpop.f32.mrb[54].mxu0  ;;  %v5402_v41 = vpop.f32.mrb[53].mxu1  ;;  %v2381_v36 = vld [vmem:[%s5653_s10 + $0xe8] sm:$0xff]  ;;  %v2382_v27 = vld [vmem:[%s5653_s10 + $0xf0] sm:$0xff]  ;;  %v2388_v38 = vld [vmem:[%s5653_s10 + $0x120] sm:$0xff] }
 0x58e   :  { %v2559_v54 = vadd.f32 %v2558_v5, %v2438_v4  ;;  %v2444_v62 = vmul.f32 %v2380_v3, %v2316_v56  ;;  %v2311_v6 = vmax.f32 %v2247_v47, 0.0  ;;  %v2253_v59 = vadd.f32 %v5125_v37, %v2141_v15  ;;  %v5405_v43 = vpop.f32.mrb[55].mxu0  ;;  %v5407_v21 = vpop.f32.mrb[54].mxu1  ;;  %v2389_v15 = vld [vmem:[%s5653_s10 + $0x128] sm:$0xff] }
 0x58f   :  { %v2254_v33 = vadd.f32 %v5125_v37, %v2142_v28  ;;  %v2255_v25 = vadd.f32 %v5125_v37, %v2143_v57  ;;  %v2148_v13 = vmul.f32 %v5093_v24, %v5328_v46  ;;  %v2490_v22 = vadd.f32 %v2489_v17, %v5292_v35  ;;  %v5419_v10 = vpop.f32.mrb[55].mxu1  ;;  %v2383_v37 = vld [vmem:[%s5653_s10 + $0xf8] sm:$0xff] }
 0x590   :  { %v2534_v49 = vadd.f32 %v2533_v18, %v2444_v62  ;;  %v2439_v11 = vmul.f32 %v2375_v29, %v2311_v6  ;;  %v2317_v45 = vmax.f32 %v2253_v59, 0.0  ;;  %v2149_v46 = vmul.f32 %v5093_v24, %v5333_v30  ;;  %v2390_v6 = vld [vmem:[%s5653_s10 + $0x130] sm:$0xff] }
 0x591   :  { %v2318_v60 = vmax.f32 %v2254_v33, 0.0  ;;  %v2319_v0 = vmax.f32 %v2255_v25, 0.0  ;;  %v2260_v35 = vadd.f32 %v5162_v40, %v2148_v13  ;;  %v2491_v17 = vrot.slane %v2490_v22, 1 }
 0x592   :  { %v2572_v53 = vadd.f32 %v2571_v20, %v2439_v11  ;;  %v2445_v5 = vmul.f32 %v2381_v36, %v2317_v45  ;;  %v2261_v34 = vadd.f32 %v5162_v40, %v2149_v46  ;;  %v2150_v3 = vmul.f32 %v5093_v24, %v5335_v14 }
 0x593   :  { %v2446_v4 = vmul.f32 %v2382_v27, %v2318_v60  ;;  %v2447_v56 = vmul.f32 %v2383_v37, %v2319_v0  ;;  %v2324_v47 = vmax.f32 %v2260_v35, 0.0  ;;  %v5436_v30 = vadd.f32 %v2491_v17, %v2490_v22  ;;  %v2398_v60 = vld [vmem:[%s5653_s10 + $0x170] sm:$0xff] }
 0x594   :  { %v2547_v20 = vadd.f32 %v2546_v26, %v2445_v5  ;;  %v2325_v18 = vmax.f32 %v2261_v34, 0.0  ;;  %v2262_v29 = vadd.f32 %v5162_v40, %v2150_v3  ;;  %v2503_v28 = vadd.f32 %v2502_v31, %v5309_v61 }
 0x595   :  { %v2560_v57 = vadd.f32 %v2559_v54, %v2446_v4  ;;  %v2573_v62 = vadd.f32 %v2572_v53, %v2447_v56  ;;  %v2452_v14 = vmul.f32 %v2388_v38, %v2324_v47  ;;  %2592 = vrot.lane.b32.xlu0 %v5436_v30, %s3568_s7  ;;  %v2156_v26 = vmul.f32 %v5134_v48, %v5347_v16  ;;  %v2396_v16 = vld [vmem:[%s5653_s10 + $0x160] sm:$0xff]  ;;  %v2399_v38 = vld [vmem:[%s5653_s10 + $0x178] sm:$0xff] }
 0x596   :  { %v2453_v59 = vmul.f32 %v2389_v15, %v2325_v18  ;;  %v2326_v36 = vmax.f32 %v2262_v29, 0.0  ;;  %v2504_v33 = vrot.slane %v2503_v28, 1  ;;  %v2151_v61 = vmul.f32 %v5093_v24, %v5349_v55  ;;  %v2391_v55 = vld [vmem:[%s5653_s10 + $0x138] sm:$0xff] }
 0x597   :  { %v2535_v31 = vadd.f32 %v2534_v49, %v2452_v14  ;;  %v2268_v54 = vadd.f32 %v5188_v19, %v2156_v26  ;;  %v2157_v25 = vmul.f32 %v5134_v48, %v5358_v39  ;;  %v2158_v13 = vmul.f32 %v5134_v48, %v5360_v50 }
 0x598   :  { %v2548_v22 = vadd.f32 %v2547_v20, %v2453_v59  ;;  %v2454_v11 = vmul.f32 %v2390_v6, %v2326_v36  ;;  %v5459_v45 = vadd.f32 %v2504_v33, %v2503_v28  ;;  %v2263_v27 = vadd.f32 %v5162_v40, %v2151_v61  ;;  %v2397_v40 = vld [vmem:[%s5653_s10 + $0x168] sm:$0xff]  ;;  %v2404_v28 = vld [vmem:[%s5653_s10 + $0x1a0] sm:$0xff] }
 0x599   :  { %v2332_v24 = vmax.f32 %v2268_v54, 0.0  ;;  %v2269_v39 = vadd.f32 %v5188_v19, %v2157_v25  ;;  %v2270_v49 = vadd.f32 %v5188_v19, %v2158_v13  ;;  %v2159_v50 = vmul.f32 %v5134_v48, %v5364_v12 }
 0x59a   :  { %v2561_v37 = vadd.f32 %v2560_v57, %v2454_v11  ;;  %2594 = vrot.lane.b32.xlu1 %v5459_v45, %s3568_s7  ;;  %v2327_v46 = vmax.f32 %v2263_v27, 0.0  ;;  %v2516_v0 = vadd.f32 %v2515_v23, %v5311_v42  ;;  %v2529_v48 = vadd.f32 %v2528_v32, %v5316_v8  ;;  %v2413_v27 = vld [vmem:[%s5653_s10 + $0x1e8] sm:$0xff] }
 0x59b   :  { %v2460_v12 = vmul.f32 %v2396_v16, %v2332_v24  ;;  %v2333_v35 = vmax.f32 %v2269_v39, 0.0  ;;  %v2334_v17 = vmax.f32 %v2270_v49, 0.0  ;;  %v2271_v53 = vadd.f32 %v5188_v19, %v2159_v50  ;;  %v2414_v24 = vld [vmem:[%s5653_s10 + $0x1f0] sm:$0xff] }
 0x59c   :  { %v2455_v5 = vmul.f32 %v2391_v55, %v2327_v46  ;;  %v2517_v34 = vrot.slane %v2516_v0, 1  ;;  %v2530_v3 = vrot.slane %v2529_v48, 1  ;;  %v2164_v4 = vmul.f32 %v5166_v7, %v5384_v44 }
 0x59d   :  { %v2536_v42 = vadd.f32 %v2535_v31, %v2460_v12  ;;  %v2461_v23 = vmul.f32 %v2397_v40, %v2333_v35  ;;  %v2462_v56 = vmul.f32 %v2398_v60, %v2334_v17  ;;  %v2335_v47 = vmax.f32 %v2271_v53, 0.0  ;;  %v2406_v31 = vld [vmem:[%s5653_s10 + $0x1b0] sm:$0xff] }
 0x59e   :  { %v2574_v8 = vadd.f32 %v2573_v62, %v2455_v5  ;;  %v5492_v32 = vadd.f32 %v2517_v34, %v2516_v0  ;;  %v5494_v15 = vadd.f32 %v2530_v3, %v2529_v48  ;;  %v2276_v19 = vadd.f32 %v5228_v9, %v2164_v4 }
 0x59f   :  { %v2549_v20 = vadd.f32 %v2548_v22, %v2461_v23  ;;  %v2562_v18 = vadd.f32 %v2561_v37, %v2462_v56  ;;  %v2463_v29 = vmul.f32 %v2399_v38, %v2335_v47  ;;  %v2165_v44 = vmul.f32 %v5166_v7, %v5389_v52 }
 0x5a0   :  { %2596 = vrot.lane.b32.xlu0 %v5492_v32, %s3568_s7  ;;  %2598 = vrot.lane.b32.xlu1 %v5494_v15, %s3568_s7  ;;  %v2340_v57 = vmax.f32 %v2276_v19, 0.0  ;;  %v2166_v62 = vmul.f32 %v5166_v7, %v5391_v2  ;;  %v2172_v14 = vmul.f32 %v5203_v51, %v5400_v58  ;;  %v2167_v6 = vmul.f32 %v5166_v7, %v5402_v41  ;;  %v2405_v2 = vld [vmem:[%s5653_s10 + $0x1a8] sm:$0xff] }
 0x5a1   :  { %v2575_v26 = vadd.f32 %v2574_v8, %v2463_v29  ;;  %v2277_v59 = vadd.f32 %v5228_v9, %v2165_v44  ;;  %v2173_v52 = vmul.f32 %v5203_v51, %v5405_v43  ;;  %v2174_v36 = vmul.f32 %v5203_v51, %v5407_v21  ;;  %v2412_v43 = vld [vmem:[%s5653_s10 + $0x1e0] sm:$0xff]  ;;  %v2407_v21 = vld [vmem:[%s5653_s10 + $0x1b8] sm:$0xff] }
 0x5a2   :  { %v2468_v33 = vmul.f32 %v2404_v28, %v2340_v57  ;;  %v2278_v61 = vadd.f32 %v5228_v9, %v2166_v62  ;;  %v2284_v58 = vadd.f32 %v5234_v63, %v2172_v14  ;;  %v2279_v7 = vadd.f32 %v5228_v9, %v2167_v6 }
 0x5a3   :  { %v2341_v41 = vmax.f32 %v2277_v59, 0.0  ;;  %v2285_v54 = vadd.f32 %v5234_v63, %v2173_v52  ;;  %v2286_v25 = vadd.f32 %v5234_v63, %v2174_v36  ;;  %v2175_v9 = vmul.f32 %v5203_v51, %v5419_v10  ;;  %v2415_v10 = vld [vmem:[%s5653_s10 + $0x1f8] sm:$0xff]  ;;  %s3569_s10 = smov 96  }
 0x5a4   :  { %v2537_v13 = vadd.f32 %v2536_v42, %v2468_v33  ;;  %v2342_v22 = vmax.f32 %v2278_v61, 0.0  ;;  %v2348_v11 = vmax.f32 %v2284_v58, 0.0  ;;  %v2343_v16 = vmax.f32 %v2279_v7, 0.0 }
 0x5a5   :  { %v2469_v55 = vmul.f32 %v2405_v2, %v2341_v41  ;;  %v2349_v39 = vmax.f32 %v2285_v54, 0.0  ;;  %v2350_v49 = vmax.f32 %v2286_v25, 0.0  ;;  %v2287_v50 = vadd.f32 %v5234_v63, %v2175_v9 }
 0x5a6   :  { %v2470_v37 = vmul.f32 %v2406_v31, %v2342_v22  ;;  %v2476_v46 = vmul.f32 %v2412_v43, %v2348_v11  ;;  %v2471_v51 = vmul.f32 %v2407_v21, %v2343_v16 }
 0x5a7   :  { %v2550_v40 = vadd.f32 %v2549_v20, %v2469_v55  ;;  %v2477_v60 = vmul.f32 %v2413_v27, %v2349_v39  ;;  %v2478_v0 = vmul.f32 %v2414_v24, %v2350_v49  ;;  %v2351_v48 = vmax.f32 %v2287_v50, 0.0 }
 0x5a8   :  { %v2563_v12 = vadd.f32 %v2562_v18, %v2470_v37  ;;  %v2538_v35 = vadd.f32 %v2537_v13, %v2476_v46  ;;  %v2576_v17 = vadd.f32 %v2575_v26, %v2471_v51 }
 0x5a9   :  { %v2551_v53 = vadd.f32 %v2550_v40, %v2477_v60  ;;  %v2479_v5 = vmul.f32 %v2415_v10, %v2351_v48 }
 0x5aa   :  { %v2539_v38 = vrot.slane %v2538_v35, 4  ;;  %v2564_v34 = vadd.f32 %v2563_v12, %v2478_v0 }
 0x5ab   :  { %v2552_v3 = vrot.slane %v2551_v53, 4  ;;  %v2577_v63 = vadd.f32 %v2576_v17, %v2479_v5 }
 0x5ac   :  { %v2540_v4 = vadd.f32 %v2539_v38, %v2538_v35  ;;  %v2565_v42 = vrot.slane %v2564_v34, 4 }
 0x5ad   :  { %v2553_v23 = vadd.f32 %v2552_v3, %v2551_v53  ;;  %v2578_v56 = vrot.slane %v2577_v63, 4 }
 0x5ae   :  { %v2541_v47 = vrot.slane %v2540_v4, 2  ;;  %v2566_v8 = vadd.f32 %v2565_v42, %v2564_v34 }
 0x5af   :  { %v2554_v19 = vrot.slane %v2553_v23, 2  ;;  %v2579_v20 = vadd.f32 %v2578_v56, %v2577_v63 }
 0x5b0   :  { %v2567_v29 = vrot.slane %v2566_v8, 2  ;;  %v2542_v28 = vadd.f32 %v2541_v47, %v2540_v4 }
 0x5b1   :  { %v2580_v44 = vrot.slane %v2579_v20, 2  ;;  %v2555_v18 = vadd.f32 %v2554_v19, %v2553_v23 }
 0x5b2   :  { %v2543_v57 = vrot.slane %v2542_v28, 1  ;;  %v2568_v62 = vadd.f32 %v2567_v29, %v2566_v8 }
 0x5b3   :  { %v2556_v14 = vrot.slane %v2555_v18, 1  ;;  %v2581_v6 = vadd.f32 %v2580_v44, %v2579_v20 }
 0x5b4   :  { %v2544_v26 = vadd.f32 %v2543_v57, %v2542_v28  ;;  %v2569_v59 = vrot.slane %v2568_v62, 1 }
 0x5b5   :  { %v2557_v52 = vadd.f32 %v2556_v14, %v2555_v18  ;;  %v2582_v36 = vrot.slane %v2581_v6, 1 }
 0x5b6   :  { %2600 = vrot.lane.b32.xlu0 %v2544_v26, %s3568_s7  ;;  %v2570_v33 = vadd.f32 %v2569_v59, %v2568_v62 }
 0x5b7   :  { %2602 = vrot.lane.b32.xlu1 %v2557_v52, %s3568_s7  ;;  %v2583_v2 = vadd.f32 %v2582_v36, %v2581_v6 }
 0x5ba   :  { %2604 = vrot.lane.b32.xlu0 %v2570_v33, %s3568_s7 }
 0x5bb   :  { %2606 = vrot.lane.b32.xlu1 %v2583_v2, %s3568_s7  ;;  %s3570_s7 = smov 112  }
 0x607   :  { %v2593_v61 = vpop.permute.xlu0 %2592 }
 0x60c   :  { %v2595_v58 = vpop.permute.xlu1 %2594 }
 0x60d   :  { %v2609_v7 = vsel %vm2608_vm10, %v2593_v61, %v2595_v58 }
 0x60e   :  { %v2625_v41 = vadd.f32 %v2609_v7, %v5436_v30 }
 0x610   :  { %2641 = vrot.lane.b32.xlu0 %v2625_v41, %s3569_s10 }
 0x612   :  { %v2597_v31 = vpop.permute.xlu0 %2596  ;;  %v2599_v43 = vpop.permute.xlu1 %2598 }
 0x613   :  { %v2610_v21 = vsel %vm2608_vm10, %v2595_v58, %v2597_v31  ;;  %v2611_v54 = vsel %vm2608_vm10, %v2597_v31, %v2599_v43 }
 0x614   :  { %v2626_v25 = vadd.f32 %v2610_v21, %v5459_v45  ;;  %v2627_v9 = vadd.f32 %v2611_v54, %v5492_v32 }
 0x616   :  { %2643 = vrot.lane.b32.xlu1 %v2626_v25, %s3569_s10  ;;  %2645 = vrot.lane.b32.xlu0 %v2627_v9, %s3569_s10 }
 0x628   :  { %v2601_v13 = vpop.permute.xlu0 %2600 }
 0x629   :  { %v2612_v22 = vsel %vm2608_vm10, %v2599_v43, %v2601_v13  ;;  %v2603_v11 = vpop.permute.xlu1 %2602 }
 0x62a   :  { %v2628_v30 = vadd.f32 %v2612_v22, %v5494_v15  ;;  %v2613_v16 = vsel %vm2608_vm10, %v2601_v13, %v2603_v11 }
 0x62b   :  { %v2629_v27 = vadd.f32 %v2613_v16, %v2544_v26 }
 0x62c   :  { %v2605_v24 = vpop.permute.xlu0 %2604  ;;  %2647 = vrot.lane.b32.xlu1 %v2628_v30, %s3569_s10 }
 0x62d   :  { %v2614_v55 = vsel %vm2608_vm10, %v2603_v11, %v2605_v24  ;;  %2649 = vrot.lane.b32.xlu0 %v2629_v27, %s3569_s10  ;;  %v2607_v39 = vpop.permute.xlu1 %2606 }
 0x62e   :  { %v2630_v45 = vadd.f32 %v2614_v55, %v2557_v52  ;;  %v2615_v32 = vsel %vm2608_vm10, %v2605_v24, %v2607_v39  ;;  %v2624_v49 = vsel %vm2608_vm10, %v2607_v39, 0.0 }
 0x62f   :  { %v2631_v50 = vadd.f32 %v2615_v32, %v2570_v33  ;;  %v2632_v37 = vadd.f32 %v2624_v49, %v2583_v2 }
 0x630   :  { %2651 = vrot.lane.b32.xlu1 %v2630_v45, %s3569_s10 }
 0x631   :  { %2653 = vrot.lane.b32.xlu0 %v2631_v50, %s3569_s10 }
 0x634   :  { %2655 = vrot.lane.b32.xlu1 %v2632_v37, %s3569_s10 }
 0x682   :  { %v2642_v15 = vpop.permute.xlu0 %2641 }
 0x688   :  { %v2644_v46 = vpop.permute.xlu1 %2643  ;;  %v2646_v51 = vpop.permute.xlu0 %2645 }
 0x689   :  { %v2657_v10 = vsel %vm1759_vm8, %v2642_v15, %v2644_v46  ;;  %v2658_v40 = vsel %vm1759_vm8, %v2644_v46, %v2646_v51 }
 0x68a   :  { %v2673_v60 = vadd.f32 %v2657_v10, %v2625_v41  ;;  %v2674_v0 = vadd.f32 %v2658_v40, %v2626_v25  ;;  %v17_v40 = vstv %s5654_s11 }
 0x68b   :  { %18 = vst [vmem:[#allocation2] sm:$0x1] %v17_v40 }
 0x68c   :  { %2689 = vrot.lane.b32.xlu0 %v2673_v60, %s3570_s7  ;;  %2691 = vrot.lane.b32.xlu1 %v2674_v0, %s3570_s7 }
 0x69e   :  { %v2648_v48 = vpop.permute.xlu1 %2647 }
 0x69f   :  { %v2659_v12 = vsel %vm1759_vm8, %v2646_v51, %v2648_v48  ;;  %v2650_v35 = vpop.permute.xlu0 %2649 }
 0x6a0   :  { %v2675_v17 = vadd.f32 %v2659_v12, %v2627_v9  ;;  %v2660_v53 = vsel %vm1759_vm8, %v2648_v48, %v2650_v35 }
 0x6a1   :  { %v2676_v5 = vadd.f32 %v2660_v53, %v2628_v30 }
 0x6a2   :  { %2693 = vrot.lane.b32.xlu0 %v2675_v17, %s3570_s7  ;;  %v2652_v38 = vpop.permute.xlu1 %2651 }
 0x6a3   :  { %v2661_v34 = vsel %vm1759_vm8, %v2650_v35, %v2652_v38  ;;  %v2654_v3 = vpop.permute.xlu0 %2653  ;;  %2695 = vrot.lane.b32.xlu1 %v2676_v5, %s3570_s7 }
 0x6a4   :  { %v2677_v63 = vadd.f32 %v2661_v34, %v2629_v27  ;;  %v2662_v4 = vsel %vm1759_vm8, %v2652_v38, %v2654_v3 }
 0x6a5   :  { %v2678_v42 = vadd.f32 %v2662_v4, %v2630_v45 }
 0x6a6   :  { %2697 = vrot.lane.b32.xlu0 %v2677_v63, %s3570_s7  ;;  %v2656_v23 = vpop.permute.xlu1 %2655 }
 0x6a7   :  { %v2663_v56 = vsel %vm1759_vm8, %v2654_v3, %v2656_v23  ;;  %v2672_v47 = vsel %vm1759_vm8, %v2656_v23, 0.0  ;;  %2699 = vrot.lane.b32.xlu1 %v2678_v42, %s3570_s7 }
 0x6a8   :  { %v2679_v8 = vadd.f32 %v2663_v56, %v2631_v50  ;;  %v2680_v19 = vadd.f32 %v2672_v47, %v2632_v37 }
 0x6aa   :  { %2701 = vrot.lane.b32.xlu0 %v2679_v8, %s3570_s7 }
 0x6ab   :  { %2703 = vrot.lane.b32.xlu1 %v2680_v19, %s3570_s7 }
 0x6fe   :  { %v2690_v20 = vpop.permute.xlu0 %2689  ;;  %v2692_v29 = vpop.permute.xlu1 %2691 }
 0x6ff   :  { %v2706_v28 = vsel %vm2705_vm11, %v2690_v20, %v2692_v29 }
 0x700   :  { %v2722_v44 = vadd.f32 %v2706_v28, %v2673_v60 }
 0x702   :  { %2738 = vrot.lane.b32.xlu0 %v2722_v44, %s3571_s2 }
 0x714   :  { %v2694_v18 = vpop.permute.xlu0 %2693 }
 0x715   :  { %v2707_v57 = vsel %vm2705_vm11, %v2692_v29, %v2694_v18  ;;  %v2696_v62 = vpop.permute.xlu1 %2695 }
 0x716   :  { %v2723_v14 = vadd.f32 %v2707_v57, %v2674_v0  ;;  %v2708_v6 = vsel %vm2705_vm11, %v2694_v18, %v2696_v62 }
 0x717   :  { %v2724_v26 = vadd.f32 %v2708_v6, %v2675_v17 }
 0x718   :  { %v2698_v59 = vpop.permute.xlu0 %2697  ;;  %2740 = vrot.lane.b32.xlu1 %v2723_v14, %s3571_s2 }
 0x719   :  { %v2709_v52 = vsel %vm2705_vm11, %v2696_v62, %v2698_v59  ;;  %2742 = vrot.lane.b32.xlu0 %v2724_v26, %s3571_s2  ;;  %v2700_v36 = vpop.permute.xlu1 %2699 }
 0x71a   :  { %v2725_v33 = vadd.f32 %v2709_v52, %v2676_v5  ;;  %v2710_v2 = vsel %vm2705_vm11, %v2698_v59, %v2700_v36  ;;  %v2923_v59 = vld [vmem:[#allocation2] sm:$0x1] }
 0x71b   :  { %v2726_v61 = vadd.f32 %v2710_v2, %v2677_v63 }
 0x71c   :  { %v2702_v58 = vpop.permute.xlu0 %2701  ;;  %2744 = vrot.lane.b32.xlu1 %v2725_v33, %s3571_s2 }
 0x71d   :  { %v2711_v7 = vsel %vm2705_vm11, %v2700_v36, %v2702_v58  ;;  %2746 = vrot.lane.b32.xlu0 %v2726_v61, %s3571_s2  ;;  %v2704_v41 = vpop.permute.xlu1 %2703 }
 0x71e   :  { %v2727_v31 = vadd.f32 %v2711_v7, %v2678_v42  ;;  %v2712_v43 = vsel %vm2705_vm11, %v2702_v58, %v2704_v41  ;;  %v2721_v21 = vsel %vm2705_vm11, %v2704_v41, 0.0 }
 0x71f   :  { %v2728_v54 = vadd.f32 %v2712_v43, %v2679_v8  ;;  %v2729_v25 = vadd.f32 %v2721_v21, %v2680_v19 }
 0x720   :  { %2748 = vrot.lane.b32.xlu1 %v2727_v31, %s3571_s2 }
 0x721   :  { %2750 = vrot.lane.b32.xlu0 %v2728_v54, %s3571_s2 }
 0x724   :  { %2752 = vrot.lane.b32.xlu1 %v2729_v25, %s3571_s2 }
 0x774   :  { %v2739_v9 = vpop.permute.xlu0 %2738 }
 0x78a   :  { %v2741_v13 = vpop.permute.xlu1 %2740 }
 0x78b   :  { %v2755_v22 = vsel %vm2754_vm12, %v2739_v9, %v2741_v13  ;;  %v2743_v11 = vpop.permute.xlu0 %2742 }
 0x78c   :  { %v2771_v30 = vadd.f32 %v2755_v22, %v2722_v44  ;;  %v2756_v16 = vsel %vm2754_vm12, %v2741_v13, %v2743_v11 }
 0x78d   :  { %v2772_v27 = vadd.f32 %v2756_v16, %v2723_v14 }
 0x78e   :  { %2787 = vrot.lane.b32.xlu0 %v2771_v30, %s3567_s3  ;;  %v2745_v24 = vpop.permute.xlu1 %2744 }
 0x78f   :  { %v2757_v55 = vsel %vm2754_vm12, %v2743_v11, %v2745_v24  ;;  %v2747_v39 = vpop.permute.xlu0 %2746  ;;  %2789 = vrot.lane.b32.xlu1 %v2772_v27, %s3567_s3 }
 0x790   :  { %v2773_v45 = vadd.f32 %v2757_v55, %v2724_v26  ;;  %v2758_v32 = vsel %vm2754_vm12, %v2745_v24, %v2747_v39 }
 0x791   :  { %v2774_v49 = vadd.f32 %v2758_v32, %v2725_v33 }
 0x792   :  { %2791 = vrot.lane.b32.xlu0 %v2773_v45, %s3567_s3  ;;  %v2749_v50 = vpop.permute.xlu1 %2748 }
 0x793   :  { %v2759_v37 = vsel %vm2754_vm12, %v2747_v39, %v2749_v50  ;;  %v2751_v15 = vpop.permute.xlu0 %2750  ;;  %2793 = vrot.lane.b32.xlu1 %v2774_v49, %s3567_s3 }
 0x794   :  { %v2775_v46 = vadd.f32 %v2759_v37, %v2726_v61  ;;  %v2760_v51 = vsel %vm2754_vm12, %v2749_v50, %v2751_v15 }
 0x795   :  { %v2776_v10 = vadd.f32 %v2760_v51, %v2727_v31 }
 0x796   :  { %2795 = vrot.lane.b32.xlu0 %v2775_v46, %s3567_s3  ;;  %v2753_v60 = vpop.permute.xlu1 %2752 }
 0x797   :  { %v2761_v0 = vsel %vm2754_vm12, %v2751_v15, %v2753_v60  ;;  %v2770_v48 = vsel %vm2754_vm12, %v2753_v60, 0.0  ;;  %2797 = vrot.lane.b32.xlu1 %v2776_v10, %s3567_s3  ;;  %v5690_v15 = vsub.s32 0, %v3639_v1 }
 0x798   :  { %v2777_v12 = vadd.f32 %v2761_v0, %v2728_v54  ;;  %v2778_v35 = vadd.f32 %v2770_v48, %v2729_v25 }
 0x79a   :  { %2799 = vrot.lane.b32.xlu0 %v2777_v12, %s3567_s3 }
 0x79b   :  { %2801 = vrot.lane.b32.xlu1 %v2778_v35, %s3567_s3 }
 0x800   :  { %v2788_v17 = vpop.permute.xlu0 %2787 }
 0x801   :  { %v2790_v53 = vpop.permute.xlu1 %2789 }
 0x802   :  { %v2803_v5 = vsel %vm1618_vm7, %v2788_v17, %v2790_v53 }
 0x803   :  { %v2819_v38 = vadd.f32 %v2803_v5, %v2771_v30 }
 0x804   :  { %v2792_v34 = vpop.permute.xlu0 %2791 }
 0x805   :  { %v2804_v3 = vsel %vm1618_vm7, %v2790_v53, %v2792_v34  ;;  %2835 = vrot.lane.b32.xlu0 %v2819_v38, %s3565_s14  ;;  %v2794_v63 = vpop.permute.xlu1 %2793 }
 0x806   :  { %v2820_v4 = vadd.f32 %v2804_v3, %v2772_v27  ;;  %v2805_v42 = vsel %vm1618_vm7, %v2792_v34, %v2794_v63 }
 0x807   :  { %v2821_v23 = vadd.f32 %v2805_v42, %v2773_v45 }
 0x808   :  { %v2796_v56 = vpop.permute.xlu0 %2795  ;;  %2837 = vrot.lane.b32.xlu1 %v2820_v4, %s3565_s14 }
 0x809   :  { %v2806_v47 = vsel %vm1618_vm7, %v2794_v63, %v2796_v56  ;;  %2839 = vrot.lane.b32.xlu0 %v2821_v23, %s3565_s14  ;;  %v2798_v8 = vpop.permute.xlu1 %2797 }
 0x80a   :  { %v2822_v19 = vadd.f32 %v2806_v47, %v2774_v49  ;;  %v2807_v20 = vsel %vm1618_vm7, %v2796_v56, %v2798_v8 }
 0x80b   :  { %v2823_v29 = vadd.f32 %v2807_v20, %v2775_v46 }
 0x80c   :  { %v2800_v28 = vpop.permute.xlu0 %2799  ;;  %2841 = vrot.lane.b32.xlu1 %v2822_v19, %s3565_s14 }
 0x80d   :  { %v2808_v44 = vsel %vm1618_vm7, %v2798_v8, %v2800_v28  ;;  %2843 = vrot.lane.b32.xlu0 %v2823_v29, %s3565_s14  ;;  %v2802_v18 = vpop.permute.xlu1 %2801 }
 0x80e   :  { %v2824_v57 = vadd.f32 %v2808_v44, %v2776_v10  ;;  %v2809_v62 = vsel %vm1618_vm7, %v2800_v28, %v2802_v18  ;;  %v2818_v14 = vsel %vm1618_vm7, %v2802_v18, 0.0 }
 0x80f   :  { %v2825_v6 = vadd.f32 %v2809_v62, %v2777_v12  ;;  %v2826_v26 = vadd.f32 %v2818_v14, %v2778_v35 }
 0x810   :  { %2845 = vrot.lane.b32.xlu1 %v2824_v57, %s3565_s14 }
 0x811   :  { %2847 = vrot.lane.b32.xlu0 %v2825_v6, %s3565_s14 }
 0x814   :  { %2849 = vrot.lane.b32.xlu1 %v2826_v26, %s3565_s14 }
 0x815   :  { %2926 = vperm.xlu0 %3160, %v2923_v59  }
 0x877   :  { %v2836_v52 = vpop.permute.xlu0 %2835 }
 0x87a   :  { %v2838_v36 = vpop.permute.xlu1 %2837 }
 0x87b   :  { %v2851_v33 = vsel %vm735_vm1, %v2836_v52, %v2838_v36  ;;  %v2840_v2 = vpop.permute.xlu0 %2839 }
 0x87c   :  { %v2867_v61 = vadd.f32 %v2851_v33, %v2819_v38  ;;  %v2852_v58 = vsel %vm735_vm1, %v2838_v36, %v2840_v2 }
 0x87d   :  { %v2868_v7 = vadd.f32 %v2852_v58, %v2820_v4 }
 0x87e   :  { %2883 = vrot.lane.b32.xlu1 %v2867_v61, %s3560_s0  ;;  %v2842_v41 = vpop.permute.xlu1 %2841 }
 0x87f   :  { %v2853_v31 = vsel %vm735_vm1, %v2840_v2, %v2842_v41  ;;  %v2844_v43 = vpop.permute.xlu0 %2843  ;;  %2885 = vrot.lane.b32.xlu0 %v2868_v7, %s3560_s0 }
 0x880   :  { %v2869_v21 = vadd.f32 %v2853_v31, %v2821_v23  ;;  %v2854_v54 = vsel %vm735_vm1, %v2842_v41, %v2844_v43 }
 0x881   :  { %v2870_v25 = vadd.f32 %v2854_v54, %v2822_v19 }
 0x882   :  { %2887 = vrot.lane.b32.xlu1 %v2869_v21, %s3560_s0  ;;  %v2846_v9 = vpop.permute.xlu1 %2845 }
 0x883   :  { %v2855_v13 = vsel %vm735_vm1, %v2844_v43, %v2846_v9  ;;  %v2848_v22 = vpop.permute.xlu0 %2847  ;;  %2889 = vrot.lane.b32.xlu0 %v2870_v25, %s3560_s0 }
 0x884   :  { %v2871_v11 = vadd.f32 %v2855_v13, %v2823_v29  ;;  %v2856_v30 = vsel %vm735_vm1, %v2846_v9, %v2848_v22 }
 0x885   :  { %v2872_v16 = vadd.f32 %v2856_v30, %v2824_v57 }
 0x886   :  { %2891 = vrot.lane.b32.xlu1 %v2871_v11, %s3560_s0  ;;  %v2850_v27 = vpop.permute.xlu1 %2849 }
 0x887   :  { %v2857_v24 = vsel %vm735_vm1, %v2848_v22, %v2850_v27  ;;  %v2866_v55 = vsel %vm735_vm1, %v2850_v27, 0.0  ;;  %2893 = vrot.lane.b32.xlu0 %v2872_v16, %s3560_s0 }
 0x888   :  { %v2873_v39 = vadd.f32 %v2857_v24, %v2825_v6  ;;  %v2874_v45 = vadd.f32 %v2866_v55, %v2826_v26 }
 0x88a   :  { %2895 = vrot.lane.b32.xlu1 %v2873_v39, %s3560_s0 }
 0x88b   :  { %2897 = vrot.lane.b32.xlu0 %v2874_v45, %s3560_s0 }
 0x894   :  { %v2927_v32 = vpop.permute.xlu0 %2926 }
 0x895   :  { %v2932_v46 = vrot.slane %v2927_v32, %v5690_v15  ;;  %v3572_v15 = vmov 1966171168  }
 0x8f0   :  { %v2884_v49 = vpop.permute.xlu1 %2883 }
 0x8f1   :  { %v2886_v50 = vpop.permute.xlu0 %2885 }
 0x8f2   :  { %v2899_v37 = vsel %vm152_vm0, %v2884_v49, %v2886_v50 }
 0x8f3   :  { %v2915_v51 = vadd.f32 %v2899_v37, %v2867_v61 }
 0x8f4   :  { %v2888_v10 = vpop.permute.xlu1 %2887 }
 0x8f5   :  { %v2933_v40 = vadd.f32 %v2932_v46, %v2915_v51  ;;  %v2900_v60 = vsel %vm152_vm0, %v2886_v50, %v2888_v10  ;;  %v2890_v0 = vpop.permute.xlu0 %2889 }
 0x8f6   :  { %v2916_v48 = vadd.f32 %v2900_v60, %v2868_v7  ;;  %v2901_v12 = vsel %vm152_vm0, %v2888_v10, %v2890_v0 }
 0x8f7   :  { %v2917_v35 = vadd.f32 %v2901_v12, %v2869_v21  ;;  %v2941_v17 = vsub.f32 0.0, %v2933_v40 }
 0x8f8   :  { %v2934_v53 = vadd.f32 %v2932_v46, %v2916_v48  ;;  %v2892_v5 = vpop.permute.xlu1 %2891 }
 0x8f9   :  { %v2935_v38 = vadd.f32 %v2932_v46, %v2917_v35  ;;  %v2902_v34 = vsel %vm152_vm0, %v2890_v0, %v2892_v5  ;;  %v2894_v3 = vpop.permute.xlu0 %2893  ;;  %v2949_v47 = vmul.f32 1.442695, %v2941_v17 }
 0x8fa   :  { %v2942_v63 = vsub.f32 0.0, %v2934_v53  ;;  %v2918_v4 = vadd.f32 %v2902_v34, %v2870_v25  ;;  %v2903_v42 = vsel %vm152_vm0, %v2892_v5, %v2894_v3 }
 0x8fb   :  { %v2943_v23 = vsub.f32 0.0, %v2935_v38  ;;  %v2919_v56 = vadd.f32 %v2903_v42, %v2871_v11 }
 0x8fc   :  { %v2951_v8 = vmul.f32 1.442695, %v2942_v63  ;;  %v2936_v19 = vadd.f32 %v2932_v46, %v2918_v4  ;;  %v2896_v20 = vpop.permute.xlu1 %2895 }
 0x8fd   :  { %v2953_v29 = vmul.f32 1.442695, %v2943_v23  ;;  %v2937_v28 = vadd.f32 %v2932_v46, %v2919_v56  ;;  %v2904_v44 = vsel %vm152_vm0, %v2894_v3, %v2896_v20  ;;  %v2898_v18 = vpop.permute.xlu0 %2897 }
 0x8fe   :  { %3528 = vpow2.f32 %v2951_v8  ;;  %v2944_v57 = vsub.f32 0.0, %v2936_v19  ;;  %v2920_v62 = vadd.f32 %v2904_v44, %v2872_v16  ;;  %v2905_v14 = vsel %vm152_vm0, %v2896_v20, %v2898_v18 }
 0x8ff   :  { %3530 = vpow2.f32 %v2953_v29  ;;  %v2945_v6 = vsub.f32 0.0, %v2937_v28  ;;  %v2914_v26 = vsel %vm152_vm0, %v2898_v18, 0.0  ;;  %v2921_v59 = vadd.f32 %v2905_v14, %v2873_v39 }
 0x900   :  { %3532 = vpow2.f32 %v2949_v47  ;;  %v2955_v52 = vmul.f32 1.442695, %v2944_v57  ;;  %v2938_v36 = vadd.f32 %v2932_v46, %v2920_v62  ;;  %v2922_v33 = vadd.f32 %v2914_v26, %v2874_v45 }
 0x901   :  { %v2957_v2 = vmul.f32 1.442695, %v2945_v6  ;;  %v2939_v61 = vadd.f32 %v2932_v46, %v2921_v59 }
 0x902   :  { %3534 = vpow2.f32 %v2955_v52  ;;  %v2946_v58 = vsub.f32 0.0, %v2938_v36  ;;  %v2940_v7 = vadd.f32 %v2932_v46, %v2922_v33  ;;  %v3002_v46 = vunpack.c.l.s4 %v3572_v15 }
 0x903   :  { %3536 = vpow2.f32 %v2957_v2  ;;  %v2947_v41 = vsub.f32 0.0, %v2939_v61 }
 0x904   :  { %v2959_v31 = vmul.f32 1.442695, %v2946_v58  ;;  %v2948_v43 = vsub.f32 0.0, %v2940_v7  ;;  %v3003_v40 = vunpack.c.0.s8 %v3002_v46 }
 0x905   :  { %v2961_v21 = vmul.f32 1.442695, %v2947_v41 }
 0x906   :  { %3538 = vpow2.f32 %v2959_v31  ;;  %v2963_v54 = vmul.f32 1.442695, %v2948_v43  ;;  %v3006_v17 = vsub.s32 %v3003_v40, %v3639_v1 }
 0x907   :  { %3540 = vpow2.f32 %v2961_v21 }
 0x908   :  { %v3529_v25 = vpop.eup %3528  ;;  %3542 = vpow2.f32 %v2963_v54 }
 0x909   :  { %v3531_v9 = vpop.eup %3530  ;;  %v2966_v22 = vadd.f32 1.0, %v3529_v25 }
 0x90a   :  { %v3533_v13 = vpop.eup %3532  ;;  %v2967_v30 = vadd.f32 1.0, %v3531_v9 }
 0x90b   :  { %v2965_v27 = vadd.f32 1.0, %v3533_v13  ;;  %3544 = vrcp.f32 %v2966_v22 }
 0x90c   :  { %v3535_v11 = vpop.eup %3534 }
 0x90d   :  { %v3537_v16 = vpop.eup %3536  ;;  %v2968_v24 = vadd.f32 1.0, %v3535_v11 }
 0x90e   :  { %v2969_v55 = vadd.f32 1.0, %v3537_v16 }
 0x90f   :  { %3546 = vrcp.f32 %v2968_v24 }
 0x910   :  { %v3539_v39 = vpop.eup %3538  ;;  %3548 = vrcp.f32 %v2967_v30 }
 0x911   :  { %v3541_v45 = vpop.eup %3540  ;;  %3550 = vrcp.f32 %v2965_v27  ;;  %v2970_v32 = vadd.f32 1.0, %v3539_v39 }
 0x912   :  { %3552 = vrcp.f32 %v2969_v55  ;;  %v2971_v49 = vadd.f32 1.0, %v3541_v45  ;;  %v3543_v50 = vpop.eup %3542 }
 0x913   :  { %3554 = vrcp.f32 %v2970_v32  ;;  %v2972_v37 = vadd.f32 1.0, %v3543_v50 }
 0x914   :  { %3556 = vrcp.f32 %v2971_v49 }
 0x915   :  { %3558 = vrcp.f32 %v2972_v37  ;;  %v3545_v51 = vpop.eup %3544 }
 0x919   :  { %v3547_v10 = vpop.eup %3546 }
 0x91a   :  { %v3549_v60 = vpop.eup %3548 }
 0x91b   :  { %v3551_v0 = vpop.eup %3550  ;;  %v2998_v48 = vcombine.low %v3549_v60, %v3547_v10 }
 0x91c   :  { %v3553_v12 = vpop.eup %3552  ;;  %v2997_v53 = vcombine.low %v3551_v0, %v3545_v51 }
 0x91d   :  { %v3555_v35 = vpop.eup %3554  ;;  %v3014_v34 = vrot.slane %v2998_v48, %v3006_v17 }
 0x91e   :  { %v3557_v5 = vpop.eup %3556  ;;  %v2999_v38 = vcombine.low %v3553_v12, %v3555_v35  ;;  %v3007_v63 = vrot.slane %v2997_v53, %v3006_v17 }
 0x91f   :  { %v3559_v3 = vpop.eup %3558 }
 0x920   :  { %v3021_v4 = vrot.slane %v2999_v38, %v3006_v17  ;;  %v3000_v42 = vcombine.low %v3557_v5, %v3559_v3  ;;  %v3029_v23 = vcombine.low %v3007_v63, %v3014_v34 }
 0x922   :  { %v3028_v56 = vrot.slane %v3000_v42, %v3006_v17  ;;  %v3037_v8 = vrot.slane %v3029_v23, %v3006_v17 }
 0x924   :  { %v3030_v47 = vcombine.low %v3021_v4, %v3028_v56 }
 0x926   :  { %v3044_v19 = vrot.slane %v3030_v47, %v3006_v17 }
 0x928   :  { %v3045_v20 = vcombine.low %v3037_v8, %v3044_v19 }
 0x92a   :  { %3047 = vst [vmem:[%s5655_s12] sm:$0xff] %v3045_v20 }

</bundles_post_ra>
